<compile_context>
chip_gen: v6e
topology: v6e:2x2x1
jax: 0.10.0
libtpu: 0.0.40
codegen_flags: <defaults>
</compile_context>

<pallas_src>
import functools

import jax
import jax.numpy as jnp
from jax import lax
from jax.experimental import pallas as pl
from jax.experimental.pallas import tpu as pltpu

KS = 5            # conv kernel size
PAD = 2           # conv spatial padding
HALO = 2 * PAD    # extra x rows needed per stripe (out1 recompute halo)
EPS = 1e-6        # LayerNorm eps
_INV_SQRT2 = 0.7071067811865476


def _erf_f32(x):
  # float32-accurate rational approximation of erf (same scheme Eigen/XLA use
  # for f32 erf); built from mul/add/div only so it always lowers in Mosaic.
  # TODO(synk): if the VALU ever becomes the binding slot, switch to lax.erf /
  # a tanh-GELU so the transcendental runs on the EUP slot (re-check numerics).
  x = jnp.clip(x, -4.0, 4.0)
  x2 = x * x
  p = jnp.float32(-2.72614225801306e-10)
  p = p * x2 + jnp.float32(2.77068142495902e-08)
  p = p * x2 + jnp.float32(-2.10102402082508e-06)
  p = p * x2 + jnp.float32(-5.69250639462346e-05)
  p = p * x2 + jnp.float32(-7.34990630326855e-04)
  p = p * x2 + jnp.float32(-2.95459980854025e-03)
  p = p * x2 + jnp.float32(-1.60960333262415e-02)
  p = x * p
  q = jnp.float32(-1.45660718464996e-05)
  q = q * x2 + jnp.float32(-2.13374055278905e-04)
  q = q * x2 + jnp.float32(-1.68282697438203e-03)
  q = q * x2 + jnp.float32(-7.37332916720468e-03)
  q = q * x2 + jnp.float32(-1.42647390514189e-02)
  return p / q


def _gelu_exact(x):
  # nn.GELU() default is the exact erf-based GELU.
  return 0.5 * x * (1.0 + _erf_f32(x * _INV_SQRT2))


def _block2_kernel(xres_ref, xh_ref, wA_ref, w2a_ref, b12_ref,
                   ln_w_ref, ln_b_ref, pw1_w_ref, pw1_b_ref,
                   pw2_w_ref, pw2_b_ref, gamma_ref,
                   o_ref, xst_ref, o1st_ref, acc_ref, acc2_ref,
                   *, TH, W, C, dt):
  """One grid step = one (batch element, row stripe) of TH output rows.

  xres_ref : (1, TH, W, C)    f32  residual rows of x for this stripe
  xh_ref   : (1, H+8, W, C)   dt   full H-zero-padded image (VMEM-resident / batch)
  wA_ref   : (5, 5C, 2C)      dt   per-kh chunks of [dwconv1 | x-half of dwconv2]
  w2a_ref  : (5, 5C, C)       dt   per-kh chunks of dwconv2 acting on dwconv1(x)
  b12_ref  : (1, 2C)          f32  [b1 | b2]
  xst_ref  : (TH+8, W+4, C)   dt   scratch: W-padded x stripe (4-row halo)
  o1st_ref : (TH+4, W+4, C)   dt   scratch: W-padded dwconv1-output stripe
  acc_ref  : ((TH+4)*W, 2C)   f32  scratch: fused pass-1 accumulator
  acc2_ref : (TH*W, C)        f32  scratch: pass-2 (dwconv2) accumulator
  """
  s = pl.program_id(1)
  n_stripes = pl.num_programs(1)
  THp = TH + HALO                 # dwconv1 output rows computed per stripe
  HWp = THp * W
  HWo = TH * W

  # ---- stage the x stripe: copy TH+8 rows, zero the 2-column W halo --------
  # (done every step: with "parallel" axes each core owns its own scratch, so
  # a program_id(0)==0 guard would be unsafe; the halo zeroing is tiny.)
  xst_ref[:, :PAD, :] = jnp.zeros((TH + 2 * HALO, PAD, C), dt)
  xst_ref[:, PAD + W:, :] = jnp.zeros((TH + 2 * HALO, PAD, C), dt)
  xst_ref[:, PAD:PAD + W, :] = xh_ref[0, pl.ds(s * TH, TH + 2 * HALO), :, :]

  # ---- fused conv accumulator starts at the biases [b1 | b2] ---------------
  acc_ref[...] = jnp.broadcast_to(b12_ref[...], (HWp, 2 * C))

  # ---- pass 1: dwconv1(x) and the x-half of dwconv2 -------------------------
  # 5 row-chunk matmuls: (HWp, 5C) @ (5C, 2C), sequential loop so only one
  # im2col chunk is live at a time (no (HW, 25C) slab).
  def pass1(kh, carry):
    chunk = jnp.concatenate(
        [xst_ref[pl.ds(kh, THp), kw:kw + W, :].reshape(HWp, C)
         for kw in range(KS)], axis=-1)                        # (HWp, 5C) dt
    acc_ref[...] += jnp.dot(chunk, wA_ref[kh],
                            preferred_element_type=jnp.float32)
    return carry
  lax.fori_loop(0, KS, pass1, 0)

  # ---- stage dwconv1 output stripe (dt); zero W halo & out-of-image rows ----
  o1st_ref[:, :PAD, :] = jnp.zeros((THp, PAD, C), dt)
  o1st_ref[:, PAD + W:, :] = jnp.zeros((THp, PAD, C), dt)
  o1st_ref[:, PAD:PAD + W, :] = acc_ref[:, :C].reshape(THp, W, C).astype(dt)

  @pl.when(s == 0)
  def _():   # rows above the image: dwconv2 sees zero padding there
    o1st_ref[:PAD, PAD:PAD + W, :] = jnp.zeros((PAD, W, C), dt)

  @pl.when(s == n_stripes - 1)
  def _():   # rows below the image
    o1st_ref[TH + PAD:, PAD:PAD + W, :] = jnp.zeros((PAD, W, C), dt)

  # ---- pass 2: dwconv1-half of dwconv2 --------------------------------------
  # start from the x-half (+ b2) already accumulated for the TH output rows.
  acc2_ref[...] = acc_ref[PAD * W:PAD * W + HWo, C:]
  def pass2(kh, carry):
    chunk = jnp.concatenate(
        [o1st_ref[pl.ds(kh, TH), kw:kw + W, :].reshape(HWo, C)
         for kw in range(KS)], axis=-1)                        # (HWo, 5C) dt
    acc2_ref[...] += jnp.dot(chunk, w2a_ref[kh],
                             preferred_element_type=jnp.float32)
    return carry
  lax.fori_loop(0, KS, pass2, 0)

  out2 = acc2_ref[...]                                         # (HWo, C) f32

  # ---- LayerNorm over channels (channels_last, eps=1e-6, biased variance) ---
  mean = jnp.mean(out2, axis=-1, keepdims=True)
  var = jnp.mean((out2 - mean) ** 2, axis=-1, keepdims=True)
  xn = (out2 - mean) * lax.rsqrt(var + EPS)
  xn = xn * ln_w_ref[...] + ln_b_ref[...]

  # ---- pwconv1 -> GELU(exact) -> pwconv2 -> layer scale -> residual ---------
  y = jnp.dot(xn.astype(dt), pw1_w_ref[...],
              preferred_element_type=jnp.float32) + pw1_b_ref[...]
  y = _gelu_exact(y)
  y = jnp.dot(y.astype(dt), pw2_w_ref[...],
              preferred_element_type=jnp.float32) + pw2_b_ref[...]
  y = y * gamma_ref[...]

  # TODO(synk): for C < 128 this store is lane-masked; a lane-dense (N, H, W*C)
  # output layout would avoid masked vst (moot for production C >= 128).
  o_ref[0] = xres_ref[0] + y.reshape(TH, W, C)


def _densify_grouped_conv(w, groups):
  """Torch grouped-conv weight (C_out, C_in/groups, K, K) -> dense
  block-diagonal weight (K*K, C_in_total, C_out).  Pure jnp (jit-safe)."""
  w = jnp.asarray(w, jnp.float32)
  c_out, cin_g, kh, kw = w.shape
  cout_g = c_out // groups
  c_in = cin_g * groups
  w_r = jnp.transpose(w, (2, 3, 1, 0)).reshape(kh * kw, cin_g, c_out)
  i_idx = jnp.arange(c_in)
  o_idx = jnp.arange(c_out)
  mask = (i_idx[:, None] // cin_g) == (o_idx[None, :] // cout_g)
  gathered = w_r[:, i_idx % cin_g, :]                       # (K*K, c_in, c_out)
  return jnp.where(mask[None, :, :], gathered, 0.0)


def prepare_block2_params(params, *, compute_dtype=jnp.bfloat16):
  """Densify / fuse / cast the Block2 weights once.  Hoisted out of the
  per-call forward so static inference weights are not rebuilt every step."""
  dt = compute_dtype
  C = params['b1'].shape[0]
  groups = C // 8
  # TODO(synk): for C >= 256 the dense block-diagonal conv weights still waste
  # MXU passes multiplying zeros across 128-lane tiles; loop over C/128 output
  # tiles with per-tile (25*128)-deep contractions instead.
  w1d = _densify_grouped_conv(params['w1'], groups).reshape(KS, KS * C, C)
  w2d = _densify_grouped_conv(params['w2'], groups).reshape(KS, KS, 2 * C, C)
  w2a = w2d[:, :, :C, :].reshape(KS, KS * C, C).astype(dt)    # acts on dwconv1(x)
  w2b = w2d[:, :, C:, :].reshape(KS, KS * C, C)               # acts on x
  wA = jnp.concatenate([w1d, w2b], axis=-1).astype(dt)        # (5, 5C, 2C)
  b12 = jnp.concatenate([jnp.asarray(params['b1'], jnp.float32),
                         jnp.asarray(params['b2'], jnp.float32)]).reshape(1, 2 * C)
  return {
      'wA': wA, 'w2a': w2a, 'b12': b12,
      'ln_w': jnp.asarray(params['ln_w'], jnp.float32).reshape(1, C),
      'ln_b': jnp.asarray(params['ln_b'], jnp.float32).reshape(1, C),
      'pw1_w': jnp.transpose(jnp.asarray(params['pw1_w'])).astype(dt),   # (C, 2C)
      'pw1_b': jnp.asarray(params['pw1_b'], jnp.float32).reshape(1, 2 * C),
      'pw2_w': jnp.transpose(jnp.asarray(params['pw2_w'])).astype(dt),   # (2C, C)
      'pw2_b': jnp.asarray(params['pw2_b'], jnp.float32).reshape(1, C),
      'gamma': jnp.asarray(params['gamma'], jnp.float32).reshape(1, C),
  }


def _pick_row_block(H, requested):
  """Largest divisor of H <= the requested stripe height (default 64).
  TODO(synk): support ragged H % row_block via a masked last stripe."""
  target = min(H, 64 if requested is None else max(1, requested))
  while H % target:
    target -= 1
  return target


def _vmem_limit_bytes(est_bytes):
  """Per-generation VMEM limit derived from the actual shapes."""
  cap = 64 * 1024 * 1024                    # conservative fallback (v7x-sized)
  try:
    cap = int(getattr(pltpu.get_tpu_info(), 'vmem_capacity_bytes', cap))
  except Exception:
    pass
  hi = (cap * 3) // 4                       # ~48 MB on v7x, ~96 MB on v5e/v6e
  want = max(48 * 1024 * 1024, (est_bytes * 5) // 4)
  return int(min(hi, want))


def block2_forward_nhwc(x_nhwc, params, *, compute_dtype=jnp.bfloat16,
                        row_block=None):
  """Block2 forward in NHWC (no layout transposes).  `params` may be either
  the raw torch-shaped dict or the output of prepare_block2_params."""
  if 'wA' not in params:
    params = prepare_block2_params(params, compute_dtype=compute_dtype)
  p = params
  dt = p['wA'].dtype
  N, H, W, C = x_nhwc.shape
  TH = _pick_row_block(H, row_block)
  S = H // TH

  x_res = x_nhwc.astype(jnp.float32)
  # 4-row zero halo in H so every stripe window is in-bounds; the 2-column W
  # halo is zero-filled in VMEM inside the kernel (no wrapper W pad).
  xh = jnp.pad(x_nhwc.astype(dt), ((0, 0), (HALO, HALO), (0, 0), (0, 0)))

  def full(a):
    return pl.BlockSpec(a.shape, lambda n, s, _nd=a.ndim: (0,) * _nd)

  kernel = functools.partial(_block2_kernel, TH=TH, W=W, C=C, dt=dt)

  # --- VMEM budget from the actual shapes (double-buffered I/O + scratch) ----
  isz = jnp.dtype(dt).itemsize
  est = 2 * (H + 2 * HALO) * W * C * isz               # resident padded image
  est += 4 * TH * W * C * 4                            # x_res + out blocks
  est += 2 * (KS * KS * C * 3 * C + 4 * C * C) * isz   # weights
  est += (TH + 2 * HALO) * (W + 2 * PAD) * C * isz     # xst scratch
  est += (TH + HALO) * (W + 2 * PAD) * C * isz         # o1st scratch
  est += (TH + HALO) * W * 2 * C * 4                   # acc scratch
  est += TH * W * C * 4                                # acc2 scratch
  est += (TH + HALO) * W * C * (KS * isz + 12 * 4)     # im2col chunk + temps
  est += 2 * 1024 * 1024

  out_nhwc = pl.pallas_call(
      kernel,
      out_shape=jax.ShapeDtypeStruct((N, H, W, C), jnp.float32),
      grid=(N, S),
      in_specs=[
          pl.BlockSpec((1, TH, W, C), lambda n, s: (n, s, 0, 0)),            # residual
          pl.BlockSpec((1, H + 2 * HALO, W, C), lambda n, s: (n, 0, 0, 0)),  # padded x
          full(p['wA']), full(p['w2a']), full(p['b12']),
          full(p['ln_w']), full(p['ln_b']),
          full(p['pw1_w']), full(p['pw1_b']),
          full(p['pw2_w']), full(p['pw2_b']), full(p['gamma']),
      ],
      out_specs=pl.BlockSpec((1, TH, W, C), lambda n, s: (n, s, 0, 0)),
      scratch_shapes=[
          pltpu.VMEM((TH + 2 * HALO, W + 2 * PAD, C), dt),     # padded x stripe
          pltpu.VMEM((TH + HALO, W + 2 * PAD, C), dt),         # padded dwconv1 stripe
          pltpu.VMEM(((TH + HALO) * W, 2 * C), jnp.float32),   # fused conv acc
          pltpu.VMEM((TH * W, C), jnp.float32),                # dwconv2 acc
      ],
      compiler_params=pltpu.CompilerParams(
          dimension_semantics=("parallel", "parallel"),
          vmem_limit_bytes=_vmem_limit_bytes(est)),
  )(x_res, xh, p['wA'], p['w2a'], p['b12'], p['ln_w'], p['ln_b'],
    p['pw1_w'], p['pw1_b'], p['pw2_w'], p['pw2_b'], p['gamma'])
  return out_nhwc


def block2_forward(x_nchw, params, *, compute_dtype=jnp.bfloat16, row_block=None):
  """PyTorch-layout entry point (NCHW in/out, matching Block2.forward).
  TODO(synk): if the surrounding model is already NHWC, call
  block2_forward_nhwc directly — each transpose here is a full HBM pass."""
  x = jnp.transpose(x_nchw, (0, 2, 3, 1))
  out = block2_forward_nhwc(x, params, compute_dtype=compute_dtype,
                            row_block=row_block)
  return jnp.transpose(out, (0, 3, 1, 2))


def init_params(key, dim, layer_scale_init_value=1e-5):
  """Deterministic synthetic parameters with the shapes Block2.__init__ implies."""
  groups = dim // 8
  cin2_g = (2 * dim) // groups
  ks = jax.random.split(key, 8)
  return {
      'w1': 0.05 * jax.random.normal(ks[0], (dim, dim // groups, KS, KS), jnp.float32),
      'b1': 0.05 * jax.random.normal(ks[1], (dim,), jnp.float32),
      'w2': 0.05 * jax.random.normal(ks[2], (dim, cin2_g, KS, KS), jnp.float32),
      'b2': 0.05 * jax.random.normal(ks[3], (dim,), jnp.float32),
      'ln_w': jnp.ones((dim,), jnp.float32),
      'ln_b': jnp.zeros((dim,), jnp.float32),
      'pw1_w': 0.05 * jax.random.normal(ks[4], (2 * dim, dim), jnp.float32),
      'pw1_b': 0.05 * jax.random.normal(ks[5], (2 * dim,), jnp.float32),
      'pw2_w': 0.05 * jax.random.normal(ks[6], (dim, 2 * dim), jnp.float32),
      'pw2_b': 0.05 * jax.random.normal(ks[7], (2 * dim // 2,), jnp.float32) * 0
             + 0.05 * jax.random.normal(ks[7], (dim,), jnp.float32),
      'gamma': layer_scale_init_value * jnp.ones((dim,), jnp.float32),
  }


def block2_reference(x, p, compute_dtype=jnp.float32):
  """Plain-JAX (XLA) reference mirroring the PyTorch forward, for validation.
  compute_dtype mimics the kernel's MXU-input casts (f32 = exact semantics)."""
  N, C, H, W = x.shape
  dt = compute_dtype
  groups = C // 8
  dn = ('NCHW', 'OIHW', 'NCHW')
  conv = functools.partial(
      lax.conv_general_dilated, window_strides=(1, 1),
      padding=((PAD, PAD), (PAD, PAD)), dimension_numbers=dn,
      feature_group_count=groups, preferred_element_type=jnp.float32)
  y = conv(x.astype(dt), p['w1'].astype(dt)) + p['b1'][None, :, None, None]
  cat = jnp.concatenate([y.astype(dt), x.astype(dt)], axis=1)
  y = conv(cat, p['w2'].astype(dt)) + p['b2'][None, :, None, None]
  y = jnp.transpose(y, (0, 2, 3, 1))
  mean = y.mean(-1, keepdims=True)
  var = ((y - mean) ** 2).mean(-1, keepdims=True)
  y = (y - mean) / jnp.sqrt(var + EPS)
  y = y * p['ln_w'] + p['ln_b']
  y = jnp.dot(y.astype(dt), p['pw1_w'].T.astype(dt),
              preferred_element_type=jnp.float32) + p['pw1_b']
  y = _gelu_exact(y)
  y = jnp.dot(y.astype(dt), p['pw2_w'].T.astype(dt),
              preferred_element_type=jnp.float32) + p['pw2_b']
  y = p['gamma'] * y
  return x + jnp.transpose(y, (0, 3, 1, 2))


if __name__ == "__main__":
  N, dim, H, W = 2, 16, 16, 16     # dim must be a multiple of 8 (groups = dim//8)
  key = jax.random.PRNGKey(0)
  kx, kp = jax.random.split(key)
  x = jax.random.normal(kx, (N, dim, H, W), jnp.float32)
  params = init_params(kp, dim)

  # Weight densification / fusion / casts hoisted out of the forward path.
  prep_bf16 = prepare_block2_params(params, compute_dtype=jnp.bfloat16)

  fwd = jax.jit(functools.partial(block2_forward, row_block=8))   # 2 row stripes
  fwd_1stripe = jax.jit(block2_forward)                           # single stripe

  out = jax.block_until_ready(fwd(x, prep_bf16))
  assert out.shape == (N, dim, H, W) and out.dtype == jnp.float32

  # gamma=1 makes the checks sensitive to the whole conv/LN/MLP path (the
  # default gamma=1e-5 buries it under the residual).
  params_chk = dict(params, gamma=jnp.ones((dim,), jnp.float32))
  prep_chk_f32 = prepare_block2_params(params_chk, compute_dtype=jnp.float32)
  prep_chk_bf16 = prepare_block2_params(params_chk, compute_dtype=jnp.bfloat16)

  ref_f32 = jax.block_until_ready(block2_reference(x, params_chk, jnp.float32))

  # (1) exact-semantics check: f32 MXU path, multi-stripe grid, vs plain JAX.
  out_f32 = jax.block_until_ready(fwd(x, prep_chk_f32))
  err_f32 = float(jnp.max(jnp.abs(out_f32 - ref_f32)))
  assert err_f32 < 1e-3, f"f32 striped path: max abs err vs reference {err_f32}"

  # (1b) single-stripe path exercises the grid=(N,1) boundary handling.
  out_1s = jax.block_until_ready(fwd_1stripe(x, prep_chk_f32))
  err_1s = float(jnp.max(jnp.abs(out_1s - ref_f32)))
  assert err_1s < 1e-3, f"f32 single-stripe path: max abs err {err_1s}"

  # (2) fast path: bf16 MXU inputs vs a reference with matching casts.
  out_bf = jax.block_until_ready(fwd(x, prep_chk_bf16))
  ref_bf = jax.block_until_ready(block2_reference(x, params_chk, jnp.bfloat16))
  err_bf = float(jnp.max(jnp.abs(out_bf - ref_bf)))
  assert err_bf < 5e-3, f"bf16 path: max abs err vs reference {err_bf}"

  print("KERNEL_OK")
</pallas_src>

<mosaic_0001>
module attributes {stable_mosaic.version = 11 : i64} {
  func.func @_block2_kernel(%arg0: i32, %arg1: i32, %arg2: memref<1x8x16x16xf32, #tpu.memory_space<vmem>>, %arg3: memref<1x24x16x16xbf16, #tpu.memory_space<vmem>>, %arg4: memref<5x80x32xbf16, #tpu.memory_space<vmem>>, %arg5: memref<5x80x16xbf16, #tpu.memory_space<vmem>>, %arg6: memref<1x32xf32, #tpu.memory_space<vmem>>, %arg7: memref<1x16xf32, #tpu.memory_space<vmem>>, %arg8: memref<1x16xf32, #tpu.memory_space<vmem>>, %arg9: memref<16x32xbf16, #tpu.memory_space<vmem>>, %arg10: memref<1x32xf32, #tpu.memory_space<vmem>>, %arg11: memref<32x16xbf16, #tpu.memory_space<vmem>>, %arg12: memref<1x16xf32, #tpu.memory_space<vmem>>, %arg13: memref<1x16xf32, #tpu.memory_space<vmem>>, %arg14: memref<1x8x16x16xf32, #tpu.memory_space<vmem>>, %arg15: memref<16x20x16xbf16, #tpu.memory_space<vmem>>, %arg16: memref<12x20x16xbf16, #tpu.memory_space<vmem>>, %arg17: memref<192x32xf32, #tpu.memory_space<vmem>>, %arg18: memref<128x16xf32, #tpu.memory_space<vmem>>) attributes {dimension_semantics = [#tpu.dimension_semantics<parallel>, #tpu.dimension_semantics<parallel>], iteration_bounds = array<i64: 2, 2>, scalar_prefetch = 0 : i64, scratch_operands = 4 : i64, tpu.core_type = #tpu.core_type<tc>, window_params = [{transform_indices = @transform_0, window_bounds = array<i64: 1, 8, 16, 16>}, {transform_indices = @transform_1, window_bounds = array<i64: 1, 24, 16, 16>}, {pipeline_mode = #tpu.pipeline_mode<synchronous>, transform_indices = @transform_2, window_bounds = array<i64: 5, 80, 32>}, {pipeline_mode = #tpu.pipeline_mode<synchronous>, transform_indices = @transform_3, window_bounds = array<i64: 5, 80, 16>}, {pipeline_mode = #tpu.pipeline_mode<synchronous>, transform_indices = @transform_4, window_bounds = array<i64: 1, 32>}, {pipeline_mode = #tpu.pipeline_mode<synchronous>, transform_indices = @transform_5, window_bounds = array<i64: 1, 16>}, {pipeline_mode = #tpu.pipeline_mode<synchronous>, transform_indices = @transform_6, window_bounds = array<i64: 1, 16>}, {pipeline_mode = #tpu.pipeline_mode<synchronous>, transform_indices = @transform_7, window_bounds = array<i64: 16, 32>}, {pipeline_mode = #tpu.pipeline_mode<synchronous>, transform_indices = @transform_8, window_bounds = array<i64: 1, 32>}, {pipeline_mode = #tpu.pipeline_mode<synchronous>, transform_indices = @transform_9, window_bounds = array<i64: 32, 16>}, {pipeline_mode = #tpu.pipeline_mode<synchronous>, transform_indices = @transform_10, window_bounds = array<i64: 1, 16>}, {pipeline_mode = #tpu.pipeline_mode<synchronous>, transform_indices = @transform_11, window_bounds = array<i64: 1, 16>}, {transform_indices = @transform_12, window_bounds = array<i64: 1, 8, 16, 16>}]} {
    %cst = arith.constant 0.000000e+00 : bf16
    %0 = vector.broadcast %cst : bf16 to vector<16x2x16xbf16>
    %c0 = arith.constant 0 : index
    %c0_0 = arith.constant 0 : index
    %c0_1 = arith.constant 0 : index
    %1 = vector.load %arg15[%c0, %c0_0, %c0_1] : memref<16x20x16xbf16, #tpu.memory_space<vmem>>, vector<16x2x16xbf16>
    tpu.vector_store %arg15[%c0, %c0_0, %c0_1], %0 {strides = array<i32>} : memref<16x20x16xbf16, #tpu.memory_space<vmem>>, vector<16x2x16xbf16>,
    %cst_2 = arith.constant 0.000000e+00 : bf16
    %2 = vector.broadcast %cst_2 : bf16 to vector<16x2x16xbf16>
    %c0_3 = arith.constant 0 : index
    %c18 = arith.constant 18 : index
    %c0_4 = arith.constant 0 : index
    %3 = vector.load %arg15[%c0_3, %c18, %c0_4] : memref<16x20x16xbf16, #tpu.memory_space<vmem>>, vector<16x2x16xbf16>
    tpu.vector_store %arg15[%c0_3, %c18, %c0_4], %2 {strides = array<i32>} : memref<16x20x16xbf16, #tpu.memory_space<vmem>>, vector<16x2x16xbf16>,
    %c8_i32 = arith.constant 8 : i32
    %4 = arith.muli %arg1, %c8_i32 : i32
    %c0_5 = arith.constant 0 : index
    %5 = arith.index_cast %4 : i32 to index
    %c0_6 = arith.constant 0 : index
    %c0_7 = arith.constant 0 : index
    %6 = vector.load %arg3[%c0_5, %5, %c0_6, %c0_7] : memref<1x24x16x16xbf16, #tpu.memory_space<vmem>>, vector<1x16x16x16xbf16>
    %7 = vector.shape_cast %6 : vector<1x16x16x16xbf16> to vector<16x16x16xbf16>
    %c0_8 = arith.constant 0 : index
    %c2 = arith.constant 2 : index
    %c0_9 = arith.constant 0 : index
    %8 = vector.load %arg15[%c0_8, %c2, %c0_9] : memref<16x20x16xbf16, #tpu.memory_space<vmem>>, vector<16x16x16xbf16>
    tpu.vector_store %arg15[%c0_8, %c2, %c0_9], %7 {strides = array<i32>} : memref<16x20x16xbf16, #tpu.memory_space<vmem>>, vector<16x16x16xbf16>,
    %c0_10 = arith.constant 0 : index
    %c0_11 = arith.constant 0 : index
    %9 = vector.load %arg6[%c0_10, %c0_11] : memref<1x32xf32, #tpu.memory_space<vmem>>, vector<1x32xf32>
    %10 = vector.shape_cast %9 : vector<1x32xf32> to vector<1x32xf32>
    %11 = vector.broadcast %10 : vector<1x32xf32> to vector<192x32xf32>
    %c0_12 = arith.constant 0 : index
    %c0_13 = arith.constant 0 : index
    %12 = vector.load %arg17[%c0_12, %c0_13] : memref<192x32xf32, #tpu.memory_space<vmem>>, vector<192x32xf32>
    tpu.vector_store %arg17[%c0_12, %c0_13], %11 {strides = array<i32>} : memref<192x32xf32, #tpu.memory_space<vmem>>, vector<192x32xf32>,
    %c0_i32 = arith.constant 0 : i32
    %c5_i32 = arith.constant 5 : i32
    %13 = arith.addi %c0_i32, %c5_i32 : i32
    %c1_i32 = arith.constant 1 : i32
    scf.for %arg19 = %c0_i32 to %13 step %c1_i32  : i32 {
      %124 = arith.index_cast %arg19 : i32 to index
      %c0_86 = arith.constant 0 : index
      %c0_87 = arith.constant 0 : index
      %125 = vector.load %arg15[%124, %c0_86, %c0_87] : memref<16x20x16xbf16, #tpu.memory_space<vmem>>, vector<12x16x16xbf16>
      %126 = vector.shape_cast %125 : vector<12x16x16xbf16> to vector<192x16xbf16>
      %127 = arith.index_cast %arg19 : i32 to index
      %c1 = arith.constant 1 : index
      %c0_88 = arith.constant 0 : index
      %128 = vector.load %arg15[%127, %c1, %c0_88] : memref<16x20x16xbf16, #tpu.memory_space<vmem>>, vector<12x16x16xbf16>
      %129 = vector.shape_cast %128 : vector<12x16x16xbf16> to vector<192x16xbf16>
      %130 = arith.index_cast %arg19 : i32 to index
      %c2_89 = arith.constant 2 : index
      %c0_90 = arith.constant 0 : index
      %131 = vector.load %arg15[%130, %c2_89, %c0_90] : memref<16x20x16xbf16, #tpu.memory_space<vmem>>, vector<12x16x16xbf16>
      %132 = vector.shape_cast %131 : vector<12x16x16xbf16> to vector<192x16xbf16>
      %133 = arith.index_cast %arg19 : i32 to index
      %c3 = arith.constant 3 : index
      %c0_91 = arith.constant 0 : index
      %134 = vector.load %arg15[%133, %c3, %c0_91] : memref<16x20x16xbf16, #tpu.memory_space<vmem>>, vector<12x16x16xbf16>
      %135 = vector.shape_cast %134 : vector<12x16x16xbf16> to vector<192x16xbf16>
      %136 = arith.index_cast %arg19 : i32 to index
      %c4 = arith.constant 4 : index
      %c0_92 = arith.constant 0 : index
      %137 = vector.load %arg15[%136, %c4, %c0_92] : memref<16x20x16xbf16, #tpu.memory_space<vmem>>, vector<12x16x16xbf16>
      %138 = vector.shape_cast %137 : vector<12x16x16xbf16> to vector<192x16xbf16>
      %139 = tpu.concatenate %126, %129, %132, %135, %138 in 1 : vector<192x16xbf16>, vector<192x16xbf16>, vector<192x16xbf16>, vector<192x16xbf16>, vector<192x16xbf16> -> vector<192x80xbf16>
      %c0_93 = arith.constant 0 : index
      %c0_94 = arith.constant 0 : index
      %140 = vector.load %arg17[%c0_93, %c0_94] : memref<192x32xf32, #tpu.memory_space<vmem>>, vector<192x32xf32>
      %141 = arith.index_cast %arg19 : i32 to index
      %c0_95 = arith.constant 0 : index
      %c0_96 = arith.constant 0 : index
      %142 = vector.load %arg4[%141, %c0_95, %c0_96] : memref<5x80x32xbf16, #tpu.memory_space<vmem>>, vector<1x80x32xbf16>
      %143 = vector.shape_cast %142 : vector<1x80x32xbf16> to vector<80x32xbf16>
      %cst_97 = arith.constant dense<0.000000e+00> : vector<192x32xf32>
      %144 = tpu.matmul %139, %143, %cst_97 {dimension_numbers = #tpu.dot_dimension_numbers<[1], [0], [0], [1], [0, 0, 1, 1], [], []>} : vector<192x80xbf16>, vector<80x32xbf16>, vector<192x32xf32> -> vector<192x32xf32>
      %145 = arith.addf %140, %144 : vector<192x32xf32>
      %c0_98 = arith.constant 0 : index
      %c0_99 = arith.constant 0 : index
      %146 = vector.load %arg17[%c0_98, %c0_99] : memref<192x32xf32, #tpu.memory_space<vmem>>, vector<192x32xf32>
      tpu.vector_store %arg17[%c0_98, %c0_99], %145 {strides = array<i32>} : memref<192x32xf32, #tpu.memory_space<vmem>>, vector<192x32xf32>,
    }
    %c5_i32_14 = arith.constant 5 : i32
    %cst_15 = arith.constant 0.000000e+00 : bf16
    %14 = vector.broadcast %cst_15 : bf16 to vector<12x2x16xbf16>
    %c0_16 = arith.constant 0 : index
    %c0_17 = arith.constant 0 : index
    %c0_18 = arith.constant 0 : index
    %15 = vector.load %arg16[%c0_16, %c0_17, %c0_18] : memref<12x20x16xbf16, #tpu.memory_space<vmem>>, vector<12x2x16xbf16>
    tpu.vector_store %arg16[%c0_16, %c0_17, %c0_18], %14 {strides = array<i32>} : memref<12x20x16xbf16, #tpu.memory_space<vmem>>, vector<12x2x16xbf16>,
    %cst_19 = arith.constant 0.000000e+00 : bf16
    %16 = vector.broadcast %cst_19 : bf16 to vector<12x2x16xbf16>
    %c0_20 = arith.constant 0 : index
    %c18_21 = arith.constant 18 : index
    %c0_22 = arith.constant 0 : index
    %17 = vector.load %arg16[%c0_20, %c18_21, %c0_22] : memref<12x20x16xbf16, #tpu.memory_space<vmem>>, vector<12x2x16xbf16>
    tpu.vector_store %arg16[%c0_20, %c18_21, %c0_22], %16 {strides = array<i32>} : memref<12x20x16xbf16, #tpu.memory_space<vmem>>, vector<12x2x16xbf16>,
    %c0_23 = arith.constant 0 : index
    %c0_24 = arith.constant 0 : index
    %18 = vector.load %arg17[%c0_23, %c0_24] : memref<192x32xf32, #tpu.memory_space<vmem>>, vector<192x16xf32>
    %19 = vector.shape_cast %18 : vector<192x16xf32> to vector<12x16x16xf32>
    %20 = arith.truncf %19 : vector<12x16x16xf32> to vector<12x16x16xbf16>
    %c0_25 = arith.constant 0 : index
    %c2_26 = arith.constant 2 : index
    %c0_27 = arith.constant 0 : index
    %21 = vector.load %arg16[%c0_25, %c2_26, %c0_27] : memref<12x20x16xbf16, #tpu.memory_space<vmem>>, vector<12x16x16xbf16>
    tpu.vector_store %arg16[%c0_25, %c2_26, %c0_27], %20 {strides = array<i32>} : memref<12x20x16xbf16, #tpu.memory_space<vmem>>, vector<12x16x16xbf16>,
    %c0_i32_28 = arith.constant 0 : i32
    %22 = arith.cmpi eq, %arg1, %c0_i32_28 : i32
    %23 = arith.extui %22 : i1 to i32
    %c0_i32_29 = arith.constant 0 : i32
    %24 = arith.cmpi ne, %23, %c0_i32_29 : i32
    scf.if %24 {
      %cst_86 = arith.constant 0.000000e+00 : bf16
      %124 = vector.broadcast %cst_86 : bf16 to vector<2x16x16xbf16>
      %c0_87 = arith.constant 0 : index
      %c2_88 = arith.constant 2 : index
      %c0_89 = arith.constant 0 : index
      %125 = vector.load %arg16[%c0_87, %c2_88, %c0_89] : memref<12x20x16xbf16, #tpu.memory_space<vmem>>, vector<2x16x16xbf16>
      tpu.vector_store %arg16[%c0_87, %c2_88, %c0_89], %124 {strides = array<i32>} : memref<12x20x16xbf16, #tpu.memory_space<vmem>>, vector<2x16x16xbf16>,
    } else {
    }
    %c1_i32_30 = arith.constant 1 : i32
    %25 = arith.cmpi eq, %arg1, %c1_i32_30 : i32
    %26 = arith.extui %25 : i1 to i32
    %c0_i32_31 = arith.constant 0 : i32
    %27 = arith.cmpi ne, %26, %c0_i32_31 : i32
    scf.if %27 {
      %cst_86 = arith.constant 0.000000e+00 : bf16
      %124 = vector.broadcast %cst_86 : bf16 to vector<2x16x16xbf16>
      %c10 = arith.constant 10 : index
      %c2_87 = arith.constant 2 : index
      %c0_88 = arith.constant 0 : index
      %125 = vector.load %arg16[%c10, %c2_87, %c0_88] : memref<12x20x16xbf16, #tpu.memory_space<vmem>>, vector<2x16x16xbf16>
      tpu.vector_store %arg16[%c10, %c2_87, %c0_88], %124 {strides = array<i32>} : memref<12x20x16xbf16, #tpu.memory_space<vmem>>, vector<2x16x16xbf16>,
    } else {
    }
    %c32 = arith.constant 32 : index
    %c16 = arith.constant 16 : index
    %28 = vector.load %arg17[%c32, %c16] : memref<192x32xf32, #tpu.memory_space<vmem>>, vector<128x16xf32>
    %c0_32 = arith.constant 0 : index
    %c0_33 = arith.constant 0 : index
    %29 = vector.load %arg18[%c0_32, %c0_33] : memref<128x16xf32, #tpu.memory_space<vmem>>, vector<128x16xf32>
    tpu.vector_store %arg18[%c0_32, %c0_33], %28 {strides = array<i32>} : memref<128x16xf32, #tpu.memory_space<vmem>>, vector<128x16xf32>,
    %c0_i32_34 = arith.constant 0 : i32
    %c5_i32_35 = arith.constant 5 : i32
    %30 = arith.addi %c0_i32_34, %c5_i32_35 : i32
    %c1_i32_36 = arith.constant 1 : i32
    scf.for %arg19 = %c0_i32_34 to %30 step %c1_i32_36  : i32 {
      %124 = arith.index_cast %arg19 : i32 to index
      %c0_86 = arith.constant 0 : index
      %c0_87 = arith.constant 0 : index
      %125 = vector.load %arg16[%124, %c0_86, %c0_87] : memref<12x20x16xbf16, #tpu.memory_space<vmem>>, vector<8x16x16xbf16>
      %126 = vector.shape_cast %125 : vector<8x16x16xbf16> to vector<128x16xbf16>
      %127 = arith.index_cast %arg19 : i32 to index
      %c1 = arith.constant 1 : index
      %c0_88 = arith.constant 0 : index
      %128 = vector.load %arg16[%127, %c1, %c0_88] : memref<12x20x16xbf16, #tpu.memory_space<vmem>>, vector<8x16x16xbf16>
      %129 = vector.shape_cast %128 : vector<8x16x16xbf16> to vector<128x16xbf16>
      %130 = arith.index_cast %arg19 : i32 to index
      %c2_89 = arith.constant 2 : index
      %c0_90 = arith.constant 0 : index
      %131 = vector.load %arg16[%130, %c2_89, %c0_90] : memref<12x20x16xbf16, #tpu.memory_space<vmem>>, vector<8x16x16xbf16>
      %132 = vector.shape_cast %131 : vector<8x16x16xbf16> to vector<128x16xbf16>
      %133 = arith.index_cast %arg19 : i32 to index
      %c3 = arith.constant 3 : index
      %c0_91 = arith.constant 0 : index
      %134 = vector.load %arg16[%133, %c3, %c0_91] : memref<12x20x16xbf16, #tpu.memory_space<vmem>>, vector<8x16x16xbf16>
      %135 = vector.shape_cast %134 : vector<8x16x16xbf16> to vector<128x16xbf16>
      %136 = arith.index_cast %arg19 : i32 to index
      %c4 = arith.constant 4 : index
      %c0_92 = arith.constant 0 : index
      %137 = vector.load %arg16[%136, %c4, %c0_92] : memref<12x20x16xbf16, #tpu.memory_space<vmem>>, vector<8x16x16xbf16>
      %138 = vector.shape_cast %137 : vector<8x16x16xbf16> to vector<128x16xbf16>
      %139 = tpu.concatenate %126, %129, %132, %135, %138 in 1 : vector<128x16xbf16>, vector<128x16xbf16>, vector<128x16xbf16>, vector<128x16xbf16>, vector<128x16xbf16> -> vector<128x80xbf16>
      %c0_93 = arith.constant 0 : index
      %c0_94 = arith.constant 0 : index
      %140 = vector.load %arg18[%c0_93, %c0_94] : memref<128x16xf32, #tpu.memory_space<vmem>>, vector<128x16xf32>
      %141 = arith.index_cast %arg19 : i32 to index
      %c0_95 = arith.constant 0 : index
      %c0_96 = arith.constant 0 : index
      %142 = vector.load %arg5[%141, %c0_95, %c0_96] : memref<5x80x16xbf16, #tpu.memory_space<vmem>>, vector<1x80x16xbf16>
      %143 = vector.shape_cast %142 : vector<1x80x16xbf16> to vector<80x16xbf16>
      %cst_97 = arith.constant dense<0.000000e+00> : vector<128x16xf32>
      %144 = tpu.matmul %139, %143, %cst_97 {dimension_numbers = #tpu.dot_dimension_numbers<[1], [0], [0], [1], [0, 0, 1, 1], [], []>} : vector<128x80xbf16>, vector<80x16xbf16>, vector<128x16xf32> -> vector<128x16xf32>
      %145 = arith.addf %140, %144 : vector<128x16xf32>
      %c0_98 = arith.constant 0 : index
      %c0_99 = arith.constant 0 : index
      %146 = vector.load %arg18[%c0_98, %c0_99] : memref<128x16xf32, #tpu.memory_space<vmem>>, vector<128x16xf32>
      tpu.vector_store %arg18[%c0_98, %c0_99], %145 {strides = array<i32>} : memref<128x16xf32, #tpu.memory_space<vmem>>, vector<128x16xf32>,
    }
    %c5_i32_37 = arith.constant 5 : i32
    %c0_38 = arith.constant 0 : index
    %c0_39 = arith.constant 0 : index
    %31 = vector.load %arg18[%c0_38, %c0_39] : memref<128x16xf32, #tpu.memory_space<vmem>>, vector<128x16xf32>
    %cst_40 = arith.constant dense<0.000000e+00> : vector<128xf32>
    %32 = vector.multi_reduction <add>, %31, %cst_40 [1] : vector<128x16xf32> to vector<128xf32>
    %33 = vector.shape_cast %32 : vector<128xf32> to vector<128x1xf32>
    %cst_41 = arith.constant 1.600000e+01 : f32
    %34 = vector.broadcast %cst_41 : f32 to vector<128x1xf32>
    %35 = arith.divf %33, %34 : vector<128x1xf32>
    %36 = vector.broadcast %35 : vector<128x1xf32> to vector<128x16xf32>
    %37 = arith.subf %31, %36 : vector<128x16xf32>
    %38 = arith.mulf %37, %37 : vector<128x16xf32>
    %cst_42 = arith.constant dense<0.000000e+00> : vector<128xf32>
    %39 = vector.multi_reduction <add>, %38, %cst_42 [1] : vector<128x16xf32> to vector<128xf32>
    %40 = vector.shape_cast %39 : vector<128xf32> to vector<128x1xf32>
    %cst_43 = arith.constant 1.600000e+01 : f32
    %41 = vector.broadcast %cst_43 : f32 to vector<128x1xf32>
    %42 = arith.divf %40, %41 : vector<128x1xf32>
    %43 = vector.broadcast %35 : vector<128x1xf32> to vector<128x16xf32>
    %44 = arith.subf %31, %43 : vector<128x16xf32>
    %cst_44 = arith.constant 9.99999997E-7 : f32
    %45 = vector.broadcast %cst_44 : f32 to vector<128x1xf32>
    %46 = arith.addf %42, %45 : vector<128x1xf32>
    %47 = math.rsqrt %46 : vector<128x1xf32>
    %48 = vector.broadcast %47 : vector<128x1xf32> to vector<128x16xf32>
    %49 = arith.mulf %44, %48 : vector<128x16xf32>
    %c0_45 = arith.constant 0 : index
    %c0_46 = arith.constant 0 : index
    %50 = vector.load %arg7[%c0_45, %c0_46] : memref<1x16xf32, #tpu.memory_space<vmem>>, vector<1x16xf32>
    %51 = vector.broadcast %50 : vector<1x16xf32> to vector<128x16xf32>
    %52 = arith.mulf %49, %51 : vector<128x16xf32>
    %c0_47 = arith.constant 0 : index
    %c0_48 = arith.constant 0 : index
    %53 = vector.load %arg8[%c0_47, %c0_48] : memref<1x16xf32, #tpu.memory_space<vmem>>, vector<1x16xf32>
    %54 = vector.broadcast %53 : vector<1x16xf32> to vector<128x16xf32>
    %55 = arith.addf %52, %54 : vector<128x16xf32>
    %56 = arith.truncf %55 : vector<128x16xf32> to vector<128x16xbf16>
    %c0_49 = arith.constant 0 : index
    %c0_50 = arith.constant 0 : index
    %57 = vector.load %arg9[%c0_49, %c0_50] : memref<16x32xbf16, #tpu.memory_space<vmem>>, vector<16x32xbf16>
    %cst_51 = arith.constant dense<0.000000e+00> : vector<128x32xf32>
    %58 = tpu.matmul %56, %57, %cst_51 {dimension_numbers = #tpu.dot_dimension_numbers<[1], [0], [0], [1], [0, 0, 1, 1], [], []>} : vector<128x16xbf16>, vector<16x32xbf16>, vector<128x32xf32> -> vector<128x32xf32>
    %c0_52 = arith.constant 0 : index
    %c0_53 = arith.constant 0 : index
    %59 = vector.load %arg10[%c0_52, %c0_53] : memref<1x32xf32, #tpu.memory_space<vmem>>, vector<1x32xf32>
    %60 = vector.broadcast %59 : vector<1x32xf32> to vector<128x32xf32>
    %61 = arith.addf %58, %60 : vector<128x32xf32>
    %cst_54 = arith.constant 5.000000e-01 : f32
    %62 = vector.broadcast %cst_54 : f32 to vector<128x32xf32>
    %63 = arith.mulf %62, %61 : vector<128x32xf32>
    %cst_55 = arith.constant 0.707106769 : f32
    %64 = vector.broadcast %cst_55 : f32 to vector<128x32xf32>
    %65 = arith.mulf %61, %64 : vector<128x32xf32>
    %cst_56 = arith.constant -4.000000e+00 : f32
    %cst_57 = arith.constant 4.000000e+00 : f32
    %66 = vector.broadcast %cst_56 : f32 to vector<128x32xf32>
    %67 = arith.maximumf %66, %65 : vector<128x32xf32>
    %68 = vector.broadcast %cst_57 : f32 to vector<128x32xf32>
    %69 = arith.minimumf %68, %67 : vector<128x32xf32>
    %70 = arith.mulf %69, %69 : vector<128x32xf32>
    %cst_58 = arith.constant -2.72614237E-10 : f32
    %71 = vector.broadcast %cst_58 : f32 to vector<128x32xf32>
    %72 = arith.mulf %71, %70 : vector<128x32xf32>
    %cst_59 = arith.constant 2.77068146E-8 : f32
    %73 = vector.broadcast %cst_59 : f32 to vector<128x32xf32>
    %74 = arith.addf %72, %73 : vector<128x32xf32>
    %75 = arith.mulf %74, %70 : vector<128x32xf32>
    %cst_60 = arith.constant -2.10102394E-6 : f32
    %76 = vector.broadcast %cst_60 : f32 to vector<128x32xf32>
    %77 = arith.addf %75, %76 : vector<128x32xf32>
    %78 = arith.mulf %77, %70 : vector<128x32xf32>
    %cst_61 = arith.constant -5.69250624E-5 : f32
    %79 = vector.broadcast %cst_61 : f32 to vector<128x32xf32>
    %80 = arith.addf %78, %79 : vector<128x32xf32>
    %81 = arith.mulf %80, %70 : vector<128x32xf32>
    %cst_62 = arith.constant -7.34990637E-4 : f32
    %82 = vector.broadcast %cst_62 : f32 to vector<128x32xf32>
    %83 = arith.addf %81, %82 : vector<128x32xf32>
    %84 = arith.mulf %83, %70 : vector<128x32xf32>
    %cst_63 = arith.constant -2.954600e-03 : f32
    %85 = vector.broadcast %cst_63 : f32 to vector<128x32xf32>
    %86 = arith.addf %84, %85 : vector<128x32xf32>
    %87 = arith.mulf %86, %70 : vector<128x32xf32>
    %cst_64 = arith.constant -0.0160960332 : f32
    %88 = vector.broadcast %cst_64 : f32 to vector<128x32xf32>
    %89 = arith.addf %87, %88 : vector<128x32xf32>
    %90 = arith.mulf %69, %89 : vector<128x32xf32>
    %cst_65 = arith.constant -1.45660715E-5 : f32
    %91 = vector.broadcast %cst_65 : f32 to vector<128x32xf32>
    %92 = arith.mulf %91, %70 : vector<128x32xf32>
    %cst_66 = arith.constant -2.13374049E-4 : f32
    %93 = vector.broadcast %cst_66 : f32 to vector<128x32xf32>
    %94 = arith.addf %92, %93 : vector<128x32xf32>
    %95 = arith.mulf %94, %70 : vector<128x32xf32>
    %cst_67 = arith.constant -0.00168282702 : f32
    %96 = vector.broadcast %cst_67 : f32 to vector<128x32xf32>
    %97 = arith.addf %95, %96 : vector<128x32xf32>
    %98 = arith.mulf %97, %70 : vector<128x32xf32>
    %cst_68 = arith.constant -0.00737332925 : f32
    %99 = vector.broadcast %cst_68 : f32 to vector<128x32xf32>
    %100 = arith.addf %98, %99 : vector<128x32xf32>
    %101 = arith.mulf %100, %70 : vector<128x32xf32>
    %cst_69 = arith.constant -0.0142647391 : f32
    %102 = vector.broadcast %cst_69 : f32 to vector<128x32xf32>
    %103 = arith.addf %101, %102 : vector<128x32xf32>
    %104 = arith.divf %90, %103 : vector<128x32xf32>
    %cst_70 = arith.constant 1.000000e+00 : f32
    %105 = vector.broadcast %cst_70 : f32 to vector<128x32xf32>
    %106 = arith.addf %105, %104 : vector<128x32xf32>
    %107 = arith.mulf %63, %106 : vector<128x32xf32>
    %108 = arith.truncf %107 : vector<128x32xf32> to vector<128x32xbf16>
    %c0_71 = arith.constant 0 : index
    %c0_72 = arith.constant 0 : index
    %109 = vector.load %arg11[%c0_71, %c0_72] : memref<32x16xbf16, #tpu.memory_space<vmem>>, vector<32x16xbf16>
    %cst_73 = arith.constant dense<0.000000e+00> : vector<128x16xf32>
    %110 = tpu.matmul %108, %109, %cst_73 {dimension_numbers = #tpu.dot_dimension_numbers<[1], [0], [0], [1], [0, 0, 1, 1], [], []>} : vector<128x32xbf16>, vector<32x16xbf16>, vector<128x16xf32> -> vector<128x16xf32>
    %c0_74 = arith.constant 0 : index
    %c0_75 = arith.constant 0 : index
    %111 = vector.load %arg12[%c0_74, %c0_75] : memref<1x16xf32, #tpu.memory_space<vmem>>, vector<1x16xf32>
    %112 = vector.broadcast %111 : vector<1x16xf32> to vector<128x16xf32>
    %113 = arith.addf %110, %112 : vector<128x16xf32>
    %c0_76 = arith.constant 0 : index
    %c0_77 = arith.constant 0 : index
    %114 = vector.load %arg13[%c0_76, %c0_77] : memref<1x16xf32, #tpu.memory_space<vmem>>, vector<1x16xf32>
    %115 = vector.broadcast %114 : vector<1x16xf32> to vector<128x16xf32>
    %116 = arith.mulf %113, %115 : vector<128x16xf32>
    %c0_78 = arith.constant 0 : index
    %c0_79 = arith.constant 0 : index
    %c0_80 = arith.constant 0 : index
    %c0_81 = arith.constant 0 : index
    %117 = vector.load %arg2[%c0_78, %c0_79, %c0_80, %c0_81] : memref<1x8x16x16xf32, #tpu.memory_space<vmem>>, vector<1x8x16x16xf32>
    %118 = vector.shape_cast %117 : vector<1x8x16x16xf32> to vector<8x16x16xf32>
    %119 = vector.shape_cast %116 : vector<128x16xf32> to vector<8x16x16xf32>
    %120 = arith.addf %118, %119 : vector<8x16x16xf32>
    %c0_82 = arith.constant 0 : index
    %c0_83 = arith.constant 0 : index
    %c0_84 = arith.constant 0 : index
    %c0_85 = arith.constant 0 : index
    %121 = vector.load %arg14[%c0_82, %c0_83, %c0_84, %c0_85] : memref<1x8x16x16xf32, #tpu.memory_space<vmem>>, vector<1x8x16x16xf32>
    %122 = vector.shape_cast %121 : vector<1x8x16x16xf32> to vector<8x16x16xf32>
    %123 = vector.shape_cast %120 : vector<8x16x16xf32> to vector<1x8x16x16xf32>
    tpu.vector_store %arg14[%c0_82, %c0_83, %c0_84, %c0_85], %123 {strides = array<i32>} : memref<1x8x16x16xf32, #tpu.memory_space<vmem>>, vector<1x8x16x16xf32>,
    return
  }
  func.func @transform_0(%arg0: i32, %arg1: i32) -> (i32, i32, i32, i32) {
    %c0_i32 = arith.constant 0 : i32
    %c0_i32_0 = arith.constant 0 : i32
    %c0_i32_1 = arith.constant 0 : i32
    return %arg0, %arg1, %c0_i32, %c0_i32_0 : i32, i32, i32, i32
  }
  func.func @transform_1(%arg0: i32, %arg1: i32) -> (i32, i32, i32, i32) {
    %c0_i32 = arith.constant 0 : i32
    %c0_i32_0 = arith.constant 0 : i32
    %c0_i32_1 = arith.constant 0 : i32
    %c0_i32_2 = arith.constant 0 : i32
    return %arg0, %c0_i32, %c0_i32_0, %c0_i32_1 : i32, i32, i32, i32
  }
  func.func @transform_2(%arg0: i32, %arg1: i32) -> (i32, i32, i32) {
    %c0_i32 = arith.constant 0 : i32
    %c0_i32_0 = arith.constant 0 : i32
    %c0_i32_1 = arith.constant 0 : i32
    %c0_i32_2 = arith.constant 0 : i32
    return %c0_i32, %c0_i32_0, %c0_i32_1 : i32, i32, i32
  }
  func.func @transform_3(%arg0: i32, %arg1: i32) -> (i32, i32, i32) {
    %c0_i32 = arith.constant 0 : i32
    %c0_i32_0 = arith.constant 0 : i32
    %c0_i32_1 = arith.constant 0 : i32
    %c0_i32_2 = arith.constant 0 : i32
    return %c0_i32, %c0_i32_0, %c0_i32_1 : i32, i32, i32
  }
  func.func @transform_4(%arg0: i32, %arg1: i32) -> (i32, i32) {
    %c0_i32 = arith.constant 0 : i32
    %c0_i32_0 = arith.constant 0 : i32
    %c0_i32_1 = arith.constant 0 : i32
    return %c0_i32, %c0_i32_0 : i32, i32
  }
  func.func @transform_5(%arg0: i32, %arg1: i32) -> (i32, i32) {
    %c0_i32 = arith.constant 0 : i32
    %c0_i32_0 = arith.constant 0 : i32
    %c0_i32_1 = arith.constant 0 : i32
    return %c0_i32, %c0_i32_0 : i32, i32
  }
  func.func @transform_6(%arg0: i32, %arg1: i32) -> (i32, i32) {
    %c0_i32 = arith.constant 0 : i32
    %c0_i32_0 = arith.constant 0 : i32
    %c0_i32_1 = arith.constant 0 : i32
    return %c0_i32, %c0_i32_0 : i32, i32
  }
  func.func @transform_7(%arg0: i32, %arg1: i32) -> (i32, i32) {
    %c0_i32 = arith.constant 0 : i32
    %c0_i32_0 = arith.constant 0 : i32
    %c0_i32_1 = arith.constant 0 : i32
    return %c0_i32, %c0_i32_0 : i32, i32
  }
  func.func @transform_8(%arg0: i32, %arg1: i32) -> (i32, i32) {
    %c0_i32 = arith.constant 0 : i32
    %c0_i32_0 = arith.constant 0 : i32
    %c0_i32_1 = arith.constant 0 : i32
    return %c0_i32, %c0_i32_0 : i32, i32
  }
  func.func @transform_9(%arg0: i32, %arg1: i32) -> (i32, i32) {
    %c0_i32 = arith.constant 0 : i32
    %c0_i32_0 = arith.constant 0 : i32
    %c0_i32_1 = arith.constant 0 : i32
    return %c0_i32, %c0_i32_0 : i32, i32
  }
  func.func @transform_10(%arg0: i32, %arg1: i32) -> (i32, i32) {
    %c0_i32 = arith.constant 0 : i32
    %c0_i32_0 = arith.constant 0 : i32
    %c0_i32_1 = arith.constant 0 : i32
    return %c0_i32, %c0_i32_0 : i32, i32
  }
  func.func @transform_11(%arg0: i32, %arg1: i32) -> (i32, i32) {
    %c0_i32 = arith.constant 0 : i32
    %c0_i32_0 = arith.constant 0 : i32
    %c0_i32_1 = arith.constant 0 : i32
    return %c0_i32, %c0_i32_0 : i32, i32
  }
  func.func @transform_12(%arg0: i32, %arg1: i32) -> (i32, i32, i32, i32) {
    %c0_i32 = arith.constant 0 : i32
    %c0_i32_0 = arith.constant 0 : i32
    %c0_i32_1 = arith.constant 0 : i32
    return %arg0, %arg1, %c0_i32, %c0_i32_0 : i32, i32, i32, i32
  }
}

</mosaic_0001>

<bundles_post_ra>
// kernel: block2_forward.1
= control target key start
LH: loop header
LB: loop body
LE: loop exit
PB: predicated region body
PF: predicated region fallthrough
CT: control target
= control target key end

     0   :  { %s5807_s21 = smov 0   ;;  %s5809_s22 = smov 0   ;;  %s8368_s0 = inlined_call_operand.vmem [shape: f32[2,16,16,16], index: 0, kind: input, shape index: {}]   ;;  %s8369_s1 = inlined_call_operand.vmem [shape: bf16[2,24,16,16], index: 1, kind: input, shape index: {}]   ;;  %s8370_s2 = inlined_call_operand.vmem [shape: bf16[5,80,32], index: 2, kind: input, shape index: {}]   ;;  %s8371_s3 = inlined_call_operand.vmem [shape: bf16[5,80,16], index: 3, kind: input, shape index: {}]   ;;  %s8372_s4 = inlined_call_operand.vmem [shape: f32[1,32], index: 4, kind: input, shape index: {}]   ;;  %s8373_s5 = inlined_call_operand.vmem [shape: f32[1,16], index: 5, kind: input, shape index: {}]   ;;  %s8374_s6 = inlined_call_operand.vmem [shape: f32[1,16], index: 6, kind: input, shape index: {}]   ;;  %s8375_s7 = inlined_call_operand.vmem [shape: bf16[16,32], index: 7, kind: input, shape index: {}]   ;;  %s8376_s8 = inlined_call_operand.vmem [shape: f32[1,32], index: 8, kind: input, shape index: {}]   ;;  %s8377_s9 = inlined_call_operand.vmem [shape: bf16[32,16], index: 9, kind: input, shape index: {}]   ;;  %s8378_s10 = inlined_call_operand.vmem [shape: f32[1,16], index: 10, kind: input, shape index: {}]   ;;  %s8379_s11 = inlined_call_operand.vmem [shape: f32[1,16], index: 11, kind: input, shape index: {}]   ;;  %s8380_s12 = inlined_call_operand.vmem [shape: f32[2,16,16,16], index: 12, kind: output, shape index: {}]  }
   0x1   :  { %s5811_s23 = smov 0   ;;  %s5813_s24 = smov 0  }
   0x2   :  { %s5815_s25 = smov 0  }
   0x3 LB: > { %s31_s26 = sadd.s32 1, %s5712_s23  ;;  %s34_s27 = sadd.s32 1, %s5716_s24  ;;  %s5720_s25 = sphi %s5815_s25, %s22_s25   ;;  %s5716_s24 = sphi %s5813_s24, %s8442_s24   ;;  %s5712_s23 = sphi %s5811_s23, %s8441_s23   ;;  %s5708_s22 = sphi %s5809_s22, %s8440_s22   ;;  %s5704_s21 = sphi %s5807_s21, %s8439_s21  }
   0x4   : > { %p32_p0 = scmp.ge.s32.totalorder %s31_s26, 2  ;;  %p5038_p1 = scmp.ge.s32.totalorder %s5720_s25, 1 }
   0x5   : > { %p394_p2 = scmp.lt.s32.totalorder %s5720_s25, 5 }
   0x6   : > { %s8444_s26 = smov (%p32_p0, %s31_s26), 0  ;;  %s8446_s27 = smov (!%p32_p0, %s34_s27), %s5716_s24 }
   0x7   : > { %p395_p3 = pnand %p5038_p1, %p394_p2  ;;  %p36_p4 = scmp.ge.s32.totalorder %s8446_s27, 2 }
   0x9   : > { %s8448_s27 = smov (%p36_p4, %s8446_s27), 0  ;;  %398 = sbr.rel (%p395_p3) target bundleno = 2007 (0x7d7), region = 68 }
   0xe   : > { %vm479_vm0 = vcmask 122880   ;;  %vm496_vm1 = vcmask 123905   ;;  %s5039_s28 = sshll.u32 %s5704_s21, 3  ;;  %p452_p5 = scmp.lt.s32.totalorder %s5708_s22, 1  ;;  %v5730_v0 = vmov 0   ;;  %vm769_vm2 = vcmask 261120  }
   0xf   : > { %480 = vst.msk [vmem:[#allocation2] sm:$0x1] %vm479_vm0, %v5730_v0  ;;  %481 = vst.msk [vmem:[#allocation2 + $0xc] sm:$0x1] %vm479_vm0, %v5730_v0  ;;  %p454_p6 = scmp.lt.s32.totalorder %s5039_s28, 15  ;;  %s5295_s29 = sshll.u32 %s5704_s21, 6 }
  0x10   : > { %482 = vst.msk [vmem:[#allocation2 + $0x18] sm:$0x1] %vm479_vm0, %v5730_v0  ;;  %483 = vst.msk [vmem:[#allocation2 + $0x24] sm:$0x1] %vm479_vm0, %v5730_v0  ;;  %s8450_s22 = smov (!%p452_p5, %s5708_s22), 1  ;;  %vm712_vm3 = vcmask 125953  }
  0x11   : > { %484 = vst.msk [vmem:[#allocation2 + $0x30] sm:$0x1] %vm479_vm0, %v5730_v0  ;;  %485 = vst.msk [vmem:[#allocation2 + $0x3c] sm:$0x1] %vm479_vm0, %v5730_v0  ;;  %v5051_v1 = vld [vmem:[%s8372_s4] ss:$0 sm:$0xff] }
  0x12   : > { %486 = vst.msk [vmem:[#allocation2 + $0x48] sm:$0x1] %vm479_vm0, %v5730_v0  ;;  %487 = vst.msk [vmem:[#allocation2 + $0x54] sm:$0x1] %vm479_vm0, %v5730_v0  ;;  %s8452_s28 = smov (!%p454_p6, %s5039_s28), 15  ;;  %s5041_s14 = sshll.u32 %s8450_s22, 5 }
  0x13   : > { %488 = vst.msk [vmem:[#allocation2 + $0x60] sm:$0x1] %vm479_vm0, %v5730_v0  ;;  %489 = vst.msk [vmem:[#allocation2 + $0x6c] sm:$0x1] %vm479_vm0, %v5730_v0  ;;  %s5491_s15 = smul.u32 192, %s8450_s22  ;;  %s5040_s16 = sshll.u32 %s8452_s28, 1 }
  0x14   : > { %490 = vst.msk [vmem:[#allocation2 + $0x78] sm:$0x1] %vm479_vm0, %v5730_v0  ;;  %491 = vst.msk [vmem:[#allocation2 + $0x84] sm:$0x1] %vm479_vm0, %v5730_v0  ;;  %s458_s17 = sadd.s32 %s5041_s14, %s5040_s16  ;;  %vm581_vm4 = vcmask 1040384   ;;  %vm582_vm5 = vcmask 1044484  }
  0x15   : > { %492 = vst.msk [vmem:[#allocation2 + $0x90] sm:$0x1] %vm479_vm0, %v5730_v0  ;;  %493 = vst.msk [vmem:[#allocation2 + $0x9c] sm:$0x1] %vm479_vm0, %v5730_v0  ;;  %s466_s20 = scalar_lea.vmem %s8369_s1, %s5491_s15  ;;  %s5042_s30 = sshll.u32 %s458_s17, 3  ;;  %vm714_vm7 = vcmask 125952  }
  0x16   : > { %494 = vst.msk [vmem:[#allocation2 + $0xa8] sm:$0x1] %vm479_vm0, %v5730_v0  ;;  %495 = vst.msk [vmem:[#allocation2 + $0xb4] sm:$0x1] %vm479_vm0, %v5730_v0  ;;  %s5954_s13 = scalar_lea.vmem %s466_s20, %s5295_s29  ;;  %s5959_s14 = scalar_lea.vmem %s8368_s0, %s5042_s30 }
  0x17   : > { %497 = vst.msk [vmem:[#allocation2 + $0x8] sm:$0x2] %vm496_vm1, %v5730_v0  ;;  %498 = vst.msk [vmem:[#allocation2 + $0x14] sm:$0x2] %vm496_vm1, %v5730_v0  ;;  %s5964_s17 = scalar_lea.vmem %s8380_s12, %s5042_s30  ;;  %v517_v2 = vld [vmem:[%s5954_s13] sm:$0xf] }
  0x18   : > { %499 = vst.msk [vmem:[#allocation2 + $0x20] sm:$0x2] %vm496_vm1, %v5730_v0  ;;  %500 = vst.msk [vmem:[#allocation2 + $0x2c] sm:$0x2] %vm496_vm1, %v5730_v0  ;;  %v518_v3 = vld [vmem:[%s5954_s13 + $0x4] sm:$0xf] }
  0x19   : > { %501 = vst.msk [vmem:[#allocation2 + $0x38] sm:$0x2] %vm496_vm1, %v5730_v0  ;;  %502 = vst.msk [vmem:[#allocation2 + $0x44] sm:$0x2] %vm496_vm1, %v5730_v0  ;;  %v519_v4 = vld [vmem:[%s5954_s13 + $0x8] sm:$0xf] }
  0x1a   : > { %503 = vst.msk [vmem:[#allocation2 + $0x50] sm:$0x2] %vm496_vm1, %v5730_v0  ;;  %504 = vst.msk [vmem:[#allocation2 + $0x5c] sm:$0x2] %vm496_vm1, %v5730_v0  ;;  %v584_v5 = vrot.slane %v517_v2, 7  ;;  %v586_v6 = vrot.slane %v518_v3, 7 }
  0x1b   : > { %505 = vst.msk [vmem:[#allocation2 + $0x68] sm:$0x2] %vm496_vm1, %v5730_v0  ;;  %506 = vst.msk [vmem:[#allocation2 + $0x74] sm:$0x2] %vm496_vm1, %v5730_v0  ;;  %v589_v7 = vrot.slane %v519_v4, 7  ;;  %s6082_s29 = smov 0  }
  0x1c   : > { %507 = vst.msk [vmem:[#allocation2 + $0x80] sm:$0x2] %vm496_vm1, %v5730_v0  ;;  %508 = vst.msk [vmem:[#allocation2 + $0x8c] sm:$0x2] %vm496_vm1, %v5730_v0  ;;  %v520_v8 = vld [vmem:[%s5954_s13 + $0xc] sm:$0xf] }
  0x1d   : > { %509 = vst.msk [vmem:[#allocation2 + $0x98] sm:$0x2] %vm496_vm1, %v5730_v0  ;;  %510 = vst.msk [vmem:[#allocation2 + $0xa4] sm:$0x2] %vm496_vm1, %v5730_v0  ;;  %v591_v10 = vrot.slane %v520_v8, 7  ;;  %v585_v13 = vrot.slane %v584_v5, 4 }
  0x1e   : > { %511 = vst.msk [vmem:[#allocation2 + $0xb0] sm:$0x2] %vm496_vm1, %v5730_v0  ;;  %512 = vst.msk [vmem:[#allocation2 + $0xbc] sm:$0x2] %vm496_vm1, %v5730_v0  ;;  %v521_v11 = vld [vmem:[%s5954_s13 + $0x10] sm:$0xf] }
  0x1f   : > { %770 = vst.msk [vmem:[#allocation4] sm:$0xff] %vm769_vm2, %v5051_v1  ;;  %771 = vst.msk [vmem:[#allocation4 + $0x8] sm:$0xff] %vm769_vm2, %v5051_v1  ;;  %v522_v12 = vld [vmem:[%s5954_s13 + $0x14] sm:$0xf]  ;;  %v588_v14 = vrot.slane %v586_v6, 4  ;;  %v590_v15 = vrot.slane %v589_v7, 4 }
  0x20   : > { %772 = vst.msk [vmem:[#allocation4 + $0x10] sm:$0xff] %vm769_vm2, %v5051_v1  ;;  %773 = vst.msk [vmem:[#allocation4 + $0x18] sm:$0xff] %vm769_vm2, %v5051_v1  ;;  %v594_v16 = vrot.slane %v521_v11, 7  ;;  %v523_v17 = vld [vmem:[%s5954_s13 + $0x18] sm:$0xf]  ;;  %v593_v18 = vrot.slane %v591_v10, 4 }
  0x21   : > { %774 = vst.msk [vmem:[#allocation4 + $0x20] sm:$0xff] %vm769_vm2, %v5051_v1  ;;  %775 = vst.msk [vmem:[#allocation4 + $0x28] sm:$0xff] %vm769_vm2, %v5051_v1  ;;  %v596_v19 = vrot.slane %v522_v12, 7  ;;  %v599_v20 = vrot.slane %v523_v17, 7  ;;  %v524_v21 = vld [vmem:[%s5954_s13 + $0x1c] sm:$0xf] }
  0x22   : > { %776 = vst.msk [vmem:[#allocation4 + $0x30] sm:$0xff] %vm769_vm2, %v5051_v1  ;;  %777 = vst.msk [vmem:[#allocation4 + $0x38] sm:$0xff] %vm769_vm2, %v5051_v1  ;;  %v595_v24 = vrot.slane %v594_v16, 4  ;;  %v601_v25 = vrot.slane %v524_v21, 7  ;;  %v525_v26 = vld [vmem:[%s5954_s13 + $0x20] sm:$0xf] }
  0x23   : > { %778 = vst.msk [vmem:[#allocation4 + $0x40] sm:$0xff] %vm769_vm2, %v5051_v1  ;;  %779 = vst.msk [vmem:[#allocation4 + $0x48] sm:$0xff] %vm769_vm2, %v5051_v1  ;;  %v526_v27 = vld [vmem:[%s5954_s13 + $0x24] sm:$0xf]  ;;  %v598_v28 = vrot.slane %v596_v19, 4  ;;  %v600_v29 = vrot.slane %v599_v20, 4 }
  0x24   : > { %780 = vst.msk [vmem:[#allocation4 + $0x50] sm:$0xff] %vm769_vm2, %v5051_v1  ;;  %781 = vst.msk [vmem:[#allocation4 + $0x58] sm:$0xff] %vm769_vm2, %v5051_v1  ;;  %v604_v30 = vrot.slane %v525_v26, 7  ;;  %v606_v31 = vrot.slane %v526_v27, 7  ;;  %v527_v32 = vld [vmem:[%s5954_s13 + $0x28] sm:$0xf] }
  0x25   : > { %782 = vst.msk [vmem:[#allocation4 + $0x60] sm:$0xff] %vm769_vm2, %v5051_v1  ;;  %783 = vst.msk [vmem:[#allocation4 + $0x68] sm:$0xff] %vm769_vm2, %v5051_v1  ;;  %v603_v34 = vrot.slane %v601_v25, 4  ;;  %v609_v35 = vrot.slane %v527_v32, 7  ;;  %v528_v36 = vld [vmem:[%s5954_s13 + $0x2c] sm:$0xf] }
  0x26   : > { %784 = vst.msk [vmem:[#allocation4 + $0x70] sm:$0xff] %vm769_vm2, %v5051_v1  ;;  %785 = vst.msk [vmem:[#allocation4 + $0x78] sm:$0xff] %vm769_vm2, %v5051_v1  ;;  %v529_v37 = vld [vmem:[%s5954_s13 + $0x30] sm:$0xf]  ;;  %v605_v39 = vrot.slane %v604_v30, 4  ;;  %v608_v40 = vrot.slane %v606_v31, 4 }
  0x27   : > { %786 = vst.msk [vmem:[#allocation4 + $0x80] sm:$0xff] %vm769_vm2, %v5051_v1  ;;  %787 = vst.msk [vmem:[#allocation4 + $0x88] sm:$0xff] %vm769_vm2, %v5051_v1  ;;  %v611_v41 = vrot.slane %v528_v36, 7  ;;  %v530_v42 = vld [vmem:[%s5954_s13 + $0x34] sm:$0xf]  ;;  %v610_v43 = vrot.slane %v609_v35, 4 }
  0x28   : > { %788 = vst.msk [vmem:[#allocation4 + $0x90] sm:$0xff] %vm769_vm2, %v5051_v1  ;;  %789 = vst.msk [vmem:[#allocation4 + $0x98] sm:$0xff] %vm769_vm2, %v5051_v1  ;;  %v614_v44 = vrot.slane %v529_v37, 7  ;;  %v616_v45 = vrot.slane %v530_v42, 7  ;;  %v531_v46 = vld [vmem:[%s5954_s13 + $0x38] sm:$0xf] }
  0x29   : > { %790 = vst.msk [vmem:[#allocation4 + $0xa0] sm:$0xff] %vm769_vm2, %v5051_v1  ;;  %791 = vst.msk [vmem:[#allocation4 + $0xa8] sm:$0xff] %vm769_vm2, %v5051_v1  ;;  %v613_v48 = vrot.slane %v611_v41, 4  ;;  %v619_v49 = vrot.slane %v531_v46, 7  ;;  %v532_v50 = vld [vmem:[%s5954_s13 + $0x3c] sm:$0xf] }
  0x2a   : > { %792 = vst.msk [vmem:[#allocation4 + $0xb0] sm:$0xff] %vm769_vm2, %v5051_v1  ;;  %793 = vst.msk [vmem:[#allocation4 + $0xb8] sm:$0xff] %vm769_vm2, %v5051_v1  ;;  %v533_v51 = vld [vmem:[%s5954_s13 + $0x40] sm:$0xf]  ;;  %v615_v53 = vrot.slane %v614_v44, 4  ;;  %v618_v54 = vrot.slane %v616_v45, 4 }
  0x2b   : > { %vm5970_vm6 = vmor %vm581_vm4, %vm582_vm5  ;;  %713 = vst.msk [vmem:[#allocation2] sm:$0xe] %vm712_vm3, %v584_v5  ;;  %v621_v55 = vrot.slane %v532_v50, 7  ;;  %v534_v56 = vld [vmem:[%s5954_s13 + $0x44] sm:$0xf]  ;;  %v620_v57 = vrot.slane %v619_v49, 4 }
  0x2c   : > { %717 = vst.msk [vmem:[#allocation2 + $0xc] sm:$0xe] %vm712_vm3, %v589_v7  ;;  %v587_v22 = vsel %vm5970_vm6, %v585_v13, %v586_v6  ;;  %v592_v23 = vsel %vm5970_vm6, %v590_v15, %v591_v10  ;;  %720 = vst.msk [vmem:[#allocation2 + $0x18] sm:$0xe] %vm712_vm3, %v594_v16  ;;  %v597_v33 = vsel %vm5970_vm6, %v595_v24, %v596_v19  ;;  %v624_v58 = vrot.slane %v533_v51, 7 }
  0x2d   : > { %716 = vst.msk [vmem:[#allocation2 + $0x8] sm:$0x1] %vm479_vm0, %v588_v14  ;;  %719 = vst.msk [vmem:[#allocation2 + $0x14] sm:$0x1] %vm479_vm0, %v593_v18  ;;  %v602_v38 = vsel %vm5970_vm6, %v600_v29, %v601_v25  ;;  %v607_v47 = vsel %vm5970_vm6, %v605_v39, %v606_v31  ;;  %v612_v52 = vsel %vm5970_vm6, %v610_v43, %v611_v41  ;;  %v626_v59 = vrot.slane %v534_v56, 7 }
  0x2e   : > { %715 = vst.msk [vmem:[#allocation2 + $0x4] sm:$0xf] %vm714_vm7, %v587_v22  ;;  %718 = vst.msk [vmem:[#allocation2 + $0x10] sm:$0xf] %vm714_vm7, %v592_v23  ;;  %v535_v60 = vld [vmem:[%s5954_s13 + $0x48] sm:$0xf]  ;;  %v617_v61 = vsel %vm5970_vm6, %v615_v53, %v616_v45  ;;  %v622_v3 = vsel %vm5970_vm6, %v620_v57, %v621_v55 }
  0x2f   : > { %723 = vst.msk [vmem:[#allocation2 + $0x24] sm:$0xe] %vm712_vm3, %v599_v20  ;;  %726 = vst.msk [vmem:[#allocation2 + $0x30] sm:$0xe] %vm712_vm3, %v604_v30  ;;  %v623_v62 = vrot.slane %v621_v55, 4  ;;  %v629_v63 = vrot.slane %v535_v60, 7 }
  0x30   : > { %721 = vst.msk [vmem:[#allocation2 + $0x1c] sm:$0xf] %vm714_vm7, %v597_v33  ;;  %724 = vst.msk [vmem:[#allocation2 + $0x28] sm:$0xf] %vm714_vm7, %v602_v38  ;;  %v536_v1 = vld [vmem:[%s5954_s13 + $0x4c] sm:$0xf] }
  0x31   : > { %722 = vst.msk [vmem:[#allocation2 + $0x20] sm:$0x1] %vm479_vm0, %v598_v28  ;;  %725 = vst.msk [vmem:[#allocation2 + $0x2c] sm:$0x1] %vm479_vm0, %v603_v34  ;;  %v537_v2 = vld [vmem:[%s5954_s13 + $0x50] sm:$0xf] }
  0x32   : > { %729 = vst.msk [vmem:[#allocation2 + $0x3c] sm:$0xe] %vm712_vm3, %v609_v35  ;;  %732 = vst.msk [vmem:[#allocation2 + $0x48] sm:$0xe] %vm712_vm3, %v614_v44  ;;  %v625_v4 = vrot.slane %v624_v58, 4  ;;  %v628_v5 = vrot.slane %v626_v59, 4 }
  0x33   : > { %728 = vst.msk [vmem:[#allocation2 + $0x38] sm:$0x1] %vm479_vm0, %v608_v40  ;;  %731 = vst.msk [vmem:[#allocation2 + $0x44] sm:$0x1] %vm479_vm0, %v613_v48  ;;  %v631_v6 = vrot.slane %v536_v1, 7  ;;  %v630_v8 = vrot.slane %v629_v63, 4 }
  0x34   : > { %727 = vst.msk [vmem:[#allocation2 + $0x34] sm:$0xf] %vm714_vm7, %v607_v47  ;;  %730 = vst.msk [vmem:[#allocation2 + $0x40] sm:$0xf] %vm714_vm7, %v612_v52  ;;  %v538_v7 = vld [vmem:[%s5954_s13 + $0x54] sm:$0xf]  ;;  %v627_v13 = vsel %vm5970_vm6, %v625_v4, %v626_v59 }
  0x35   : > { %735 = vst.msk [vmem:[#allocation2 + $0x54] sm:$0xe] %vm712_vm3, %v619_v49  ;;  %738 = vst.msk [vmem:[#allocation2 + $0x60] sm:$0xe] %vm712_vm3, %v624_v58  ;;  %v634_v10 = vrot.slane %v537_v2, 7  ;;  %v636_v11 = vrot.slane %v538_v7, 7  ;;  %v632_v18 = vsel %vm5970_vm6, %v630_v8, %v631_v6 }
  0x36   : > { %734 = vst.msk [vmem:[#allocation2 + $0x50] sm:$0x1] %vm479_vm0, %v618_v54  ;;  %737 = vst.msk [vmem:[#allocation2 + $0x5c] sm:$0x1] %vm479_vm0, %v623_v62  ;;  %v539_v12 = vld [vmem:[%s5954_s13 + $0x58] sm:$0xf] }
  0x37   : > { %733 = vst.msk [vmem:[#allocation2 + $0x4c] sm:$0xf] %vm714_vm7, %v617_v61  ;;  %736 = vst.msk [vmem:[#allocation2 + $0x58] sm:$0xf] %vm714_vm7, %v622_v3  ;;  %v633_v14 = vrot.slane %v631_v6, 4  ;;  %v639_v15 = vrot.slane %v539_v12, 7 }
  0x38   : > { %741 = vst.msk [vmem:[#allocation2 + $0x6c] sm:$0xe] %vm712_vm3, %v629_v63  ;;  %v540_v16 = vld [vmem:[%s5954_s13 + $0x5c] sm:$0xf]  ;;  %v541_v17 = vld [vmem:[%s5954_s13 + $0x60] sm:$0xf] }
  0x39   : > { %740 = vst.msk [vmem:[#allocation2 + $0x68] sm:$0x1] %vm479_vm0, %v628_v5  ;;  %v635_v19 = vrot.slane %v634_v10, 4  ;;  %v638_v20 = vrot.slane %v636_v11, 4  ;;  %v641_v21 = vrot.slane %v540_v16, 7  ;;  %v640_v23 = vrot.slane %v639_v15, 4 }
  0x3a   : > { %739 = vst.msk [vmem:[#allocation2 + $0x64] sm:$0xf] %vm714_vm7, %v627_v13  ;;  %v542_v22 = vld [vmem:[%s5954_s13 + $0x64] sm:$0xf]  ;;  %742 = vst.msk [vmem:[#allocation2 + $0x70] sm:$0xf] %vm714_vm7, %v632_v18 }
  0x3b   : > { %744 = vst.msk [vmem:[#allocation2 + $0x78] sm:$0xe] %vm712_vm3, %v634_v10  ;;  %747 = vst.msk [vmem:[#allocation2 + $0x84] sm:$0xe] %vm712_vm3, %v639_v15  ;;  %v644_v24 = vrot.slane %v541_v17, 7  ;;  %v646_v25 = vrot.slane %v542_v22, 7  ;;  %v637_v27 = vsel %vm5970_vm6, %v635_v19, %v636_v11  ;;  %v642_v32 = vsel %vm5970_vm6, %v640_v23, %v641_v21 }
  0x3c   : > { %743 = vst.msk [vmem:[#allocation2 + $0x74] sm:$0x1] %vm479_vm0, %v633_v14  ;;  %v543_v26 = vld [vmem:[%s5954_s13 + $0x68] sm:$0xf]  ;;  %746 = vst.msk [vmem:[#allocation2 + $0x80] sm:$0x1] %vm479_vm0, %v638_v20 }
  0x3d   : > { %v643_v28 = vrot.slane %v641_v21, 4  ;;  %v649_v29 = vrot.slane %v543_v26, 7  ;;  %v544_v30 = vld [vmem:[%s5954_s13 + $0x6c] sm:$0xf]  ;;  %v545_v31 = vld [vmem:[%s5954_s13 + $0x70] sm:$0xf] }
  0x3e   : > { %745 = vst.msk [vmem:[#allocation2 + $0x7c] sm:$0xf] %vm714_vm7, %v637_v27  ;;  %v645_v33 = vrot.slane %v644_v24, 4  ;;  %v648_v34 = vrot.slane %v646_v25, 4  ;;  %v651_v35 = vrot.slane %v544_v30, 7  ;;  %v654_v38 = vrot.slane %v545_v31, 7 }
  0x3f   : > { %750 = vst.msk [vmem:[#allocation2 + $0x90] sm:$0xe] %vm712_vm3, %v644_v24  ;;  %v546_v36 = vld [vmem:[%s5954_s13 + $0x74] sm:$0xf]  ;;  %v650_v37 = vrot.slane %v649_v29, 4 }
  0x40   : > { %748 = vst.msk [vmem:[#allocation2 + $0x88] sm:$0xf] %vm714_vm7, %v642_v32  ;;  %v656_v39 = vrot.slane %v546_v36, 7  ;;  %v547_v40 = vld [vmem:[%s5954_s13 + $0x78] sm:$0xf]  ;;  %v647_v41 = vsel %vm5970_vm6, %v645_v33, %v646_v25  ;;  %v653_v42 = vrot.slane %v651_v35, 4 }
  0x41   : > { %749 = vst.msk [vmem:[#allocation2 + $0x8c] sm:$0x1] %vm479_vm0, %v643_v28  ;;  %752 = vst.msk [vmem:[#allocation2 + $0x98] sm:$0x1] %vm479_vm0, %v648_v34  ;;  %v659_v43 = vrot.slane %v547_v40, 7  ;;  %v652_v45 = vsel %vm5970_vm6, %v650_v37, %v651_v35  ;;  %v655_v46 = vrot.slane %v654_v38, 4 }
  0x42   : > { %753 = vst.msk [vmem:[#allocation2 + $0x9c] sm:$0xe] %vm712_vm3, %v649_v29  ;;  %v548_v44 = vld [vmem:[%s5954_s13 + $0x7c] sm:$0xf]  ;;  %756 = vst.msk [vmem:[#allocation2 + $0xa8] sm:$0xe] %vm712_vm3, %v654_v38 }
  0x43   : > { %751 = vst.msk [vmem:[#allocation2 + $0x94] sm:$0xf] %vm714_vm7, %v647_v41  ;;  %v658_v47 = vrot.slane %v656_v39, 4  ;;  %v661_v48 = vrot.slane %v548_v44, 7  ;;  %754 = vst.msk [vmem:[#allocation2 + $0xa0] sm:$0xf] %vm714_vm7, %v652_v45  ;;  %v657_v50 = vsel %vm5970_vm6, %v655_v46, %v656_v39 }
  0x44   : > { %755 = vst.msk [vmem:[#allocation2 + $0xa4] sm:$0x1] %vm479_vm0, %v653_v42  ;;  %v660_v49 = vrot.slane %v659_v43, 4 }
  0x45   : > { %759 = vst.msk [vmem:[#allocation2 + $0xb4] sm:$0xe] %vm712_vm3, %v659_v43  ;;  %v663_v51 = vrot.slane %v661_v48, 4 }
  0x46   : > { %758 = vst.msk [vmem:[#allocation2 + $0xb0] sm:$0x1] %vm479_vm0, %v658_v47  ;;  %v662_v52 = vsel %vm5970_vm6, %v660_v49, %v661_v48 }
  0x47   : > { %757 = vst.msk [vmem:[#allocation2 + $0xac] sm:$0xf] %vm714_vm7, %v657_v50  ;;  %760 = vst.msk [vmem:[#allocation2 + $0xb8] sm:$0xf] %vm714_vm7, %v662_v52 }
  0x48   : > { %761 = vst.msk [vmem:[#allocation2 + $0xbc] sm:$0x1] %vm479_vm0, %v663_v51 }
  0x49 LB: >> { %vm1178_vm8 = vcmask 1042432   ;;  %vm1179_vm9 = vcmask 1046532   ;;  %s5296_s18 = smul.u32 12, %s5724_s29  ;;  %vm839_vm11 = vsmask.f32 3328  ;;  %s5731_s20 = smov 32   ;;  %s5724_s29 = sphi %s6082_s29, %s799_s29  }
  0x4a   : >> { %vm6088_vm10 = vmor %vm1178_vm8, %vm1179_vm9  ;;  %vm840_vm12 = vsmask.f32 7440  ;;  %vm1277_vm14 = vsmask.f32 2304  ;;  %vm1278_vm15 = vsmask.f32 6416 }
  0x4b   : >> { %s6092_s19 = scalar_lea.vmem [#allocation2], %s5296_s18  ;;  %vm6173_vm13 = vmor %vm839_vm11, %vm840_vm12  ;;  %s5732_s30 = smov 16   ;;  %vm1592_vm5 = vcmask 1041408   ;;  %vm1593_vm8 = vcmask 1045508   ;;  %vm1967_vm11 = vcmask 130048   ;;  %vm2028_vm12 = vcmask 392192  }
  0x4c   : >> { %vm6222_vm4 = vmor %vm1277_vm14, %vm1278_vm15  ;;  %s5297_s13 = smul.u32 40, %s5724_s29  ;;  %s5733_s15 = smov 48   ;;  %vm2053_vm14 = vcmask 523264   ;;  %vm2145_vm15 = vcmask 654336  }
  0x4d   : >> { %vm6291_vm9 = vmor %vm1592_vm5, %vm1593_vm8  ;;  %s5734_s18 = smov 64   ;;  %s799_s29 = sadd.s32 1, %s5724_s29  }
  0x4e   : >> { %s6243_s16 = scalar_lea.vmem %s8370_s2, %s5297_s13  ;;  %p796_p7 = scmp.ge.s32.totalorder %s799_s29, 5  }
  0x4f   : >> { %v6095_v54 = vld [vmem:[%s6092_s19 + $0x4c] sm:$0xf]  ;;  %v6098_v55 = vld [vmem:[%s6092_s19 + $0x50] sm:$0x1]  ;;  %v6101_v56 = vld [vmem:[%s6092_s19 + $0x48] sm:$0xe] }
  0x50   : >> { %v1006_v57 = vshll.u32 %v6098_v55, 16  ;;  %v5059_v58 = vrot.slane %v6101_v56, 9  ;;  %v1225_v59 = vrot.slane %v6095_v54, 5  ;;  %v1228_v60 = vrot.slane %v6098_v55, 5  ;;  %v6108_v61 = vld [vmem:[%s6092_s19 + $0x4] sm:$0xf] }
  0x51   : >> { %v1419_v62 = vshrl.u32 %v6101_v56, 16  ;;  %v1422_v63 = vshll.u32 %v6101_v56, 16  ;;  %v6113_v1 = vld [vmem:[%s6092_s19 + $0x8] sm:$0x1]  ;;  %v6116_v2 = vld [vmem:[%s6092_s19] sm:$0xe] }
  0x52   : >> { %v1226_v3 = vsel %vm6088_vm10, %v5059_v58, %v1225_v59  ;;  %v1227_v4 = vrot.slane %v1225_v59, 4  ;;  %v862_v5 = vshll.u32 %v6113_v1, 16  ;;  %v5053_v6 = vrot.slane %v6116_v2, 9  ;;  %v6123_v7 = vld [vmem:[%s6092_s19 + $0x58] sm:$0xf]  ;;  %p5179_p8 = scmp.ne.s32.totalorder (%p796_p7), %s5704_s21, 0 }
  0x53   : >> { %v1183_v8 = vrot.slane %v6108_v61, 5  ;;  %v1186_v10 = vrot.slane %v6113_v1, 5  ;;  %v1281_v11 = vshrl.u32 %v6116_v2, 16  ;;  %v1284_v12 = vshll.u32 %v6116_v2, 16  ;;  %v6130_v13 = vld [vmem:[%s6092_s19 + $0x5c] sm:$0x1] }
  0x54   : >> { %v1229_v14 = vsel %vm6088_vm10, %v1227_v4, %v1228_v60  ;;  %v6135_v15 = vld [vmem:[%s6092_s19 + $0x54] sm:$0xe]  ;;  %v1232_v16 = vrot.slane %v6123_v7, 5  ;;  %v1235_v17 = vrot.slane %v6130_v13, 5  ;;  %v6140_v18 = vld [vmem:[%s6092_s19 + $0x10] sm:$0xf] }
  0x55   : >> { %v5107_v19 = vcombine.low %v1226_v3, %v1229_v14  ;;  %v1184_v20 = vsel %vm6088_vm10, %v5053_v6, %v1183_v8  ;;  %v1185_v21 = vrot.slane %v1183_v8, 4  ;;  %v5060_v22 = vrot.slane %v6135_v15, 9  ;;  %v828_v23 = vld [vmem:[%s6092_s19 + $0x14] sm:$0x1]  ;;  %v6147_v24 = vld [vmem:[%s6092_s19 + $0xc] sm:$0xe] }
  0x56   : >> { %v1234_v25 = vrot.slane %v1232_v16, 4  ;;  %v5054_v26 = vrot.slane %v6147_v24, 9  ;;  %v1190_v27 = vrot.slane %v6140_v18, 5  ;;  %v1193_v28 = vrot.slane %v828_v23, 5  ;;  %v805_v29 = vld [vmem:[%s6092_s19 + $0xc] sm:$0xf] }
  0x57   : >> { %1835 = vrot.lane.b32.xlu1 %v5107_v19, %s5731_s20  ;;  %v1187_v30 = vsel %vm6088_vm10, %v1185_v21, %v1186_v10  ;;  %v1233_v31 = vsel %vm6088_vm10, %v5060_v22, %v1232_v16  ;;  %v867_v32 = vshrl.u32 %v805_v29, 16  ;;  %v870_v33 = vshll.u32 %v805_v29, 16  ;;  %v803_v34 = vld [vmem:[%s6092_s19] sm:$0xf]  ;;  %v817_v51 = vld [vmem:[%s6092_s19 + $0x54] sm:$0xf] }
  0x58   : >> { %v5101_v35 = vcombine.low %v1184_v20, %v1187_v30  ;;  %v1236_v36 = vsel %vm6088_vm10, %v1234_v25, %v1235_v17  ;;  %v1191_v37 = vsel %vm6088_vm10, %v5054_v26, %v1190_v27  ;;  %v1192_v38 = vrot.slane %v1190_v27, 4  ;;  %2347 = vst.msk [vmem:[#allocation3] sm:$0x1] (%p796_p7), %vm479_vm0, %v5730_v0  ;;  %2348 = vst.msk [vmem:[#allocation3 + $0xc] sm:$0x1] (%p796_p7), %vm479_vm0, %v5730_v0 }
  0x59   : >> { %v5108_v39 = vcombine.low %v1233_v31, %v1236_v36  ;;  %v869_v40 = vrot.slane %v867_v32, 4  ;;  %v872_v41 = vrot.slane %v870_v33, 5  ;;  %v876_v42 = vshll.u32 %v6140_v18, 16  ;;  %2349 = vst.msk [vmem:[#allocation3 + $0x18] sm:$0x1] (%p796_p7), %vm479_vm0, %v5730_v0 }
  0x5a   : >> { %1823 = vrot.lane.b32.xlu0 %v5101_v35, %s5731_s20  ;;  %v1194_v43 = vsel %vm6088_vm10, %v1192_v38, %v1193_v28  ;;  %v880_v44 = vshrl.u32 %v6140_v18, 16  ;;  %v886_v45 = vshll.u32 %v828_v23, 16  ;;  %v843_v46 = vshrl.u32 %v803_v34, 16  ;;  %v815_v23 = vld [vmem:[%s6092_s19 + $0x48] sm:$0xf] }
  0x5b   : >> { %1837 = vrot.lane.b32.xlu1 %v5108_v39, %s5731_s20  ;;  %v5102_v47 = vcombine.low %v1191_v37, %v1194_v43  ;;  %v873_v48 = vor.u32 %v872_v41, %v869_v40  ;;  %v878_v49 = vrot.slane %v876_v42, 5  ;;  %v846_v50 = vshll.u32 %v803_v34, 16  ;;  %2350 = vst.msk [vmem:[#allocation3 + $0x24] sm:$0x1] (%p796_p7), %vm479_vm0, %v5730_v0  ;;  %2351 = vst.msk [vmem:[#allocation3 + $0x30] sm:$0x1] (%p796_p7), %vm479_vm0, %v5730_v0 }
  0x5c   : >> { %v882_v58 = vrot.slane %v880_v44, 4  ;;  %v888_v59 = vrot.slane %v886_v45, 5  ;;  %v845_v60 = vrot.slane %v843_v46, 4  ;;  %v852_v1 = vshll.u32 %v6108_v61, 16  ;;  %2352 = vst.msk [vmem:[#allocation3 + $0x3c] sm:$0x1] (%p796_p7), %vm479_vm0, %v5730_v0 }
  0x5d   : >> { %v874_v3 = vrot.slane %v873_v48, 4  ;;  %v848_v4 = vrot.slane %v846_v50, 5  ;;  %v856_v6 = vshrl.u32 %v6108_v61, 16  ;;  %v864_v8 = vrot.slane %v862_v5, 5  ;;  %2353 = vst.msk [vmem:[#allocation3 + $0x48] sm:$0x1] (%p796_p7), %vm479_vm0, %v5730_v0 }
  0x5e   : >> { %1825 = vrot.lane.b32.xlu0 %v5102_v47, %s5731_s20  ;;  %v883_v10 = vor.u32 %v882_v58, %v878_v49  ;;  %v854_v14 = vrot.slane %v852_v1, 5  ;;  %v1011_v16 = vshrl.u32 %v817_v51, 16  ;;  %v1014_v17 = vshll.u32 %v817_v51, 16  ;;  %2354 = vst.msk [vmem:[#allocation3 + $0x54] sm:$0x1] (%p796_p7), %vm479_vm0, %v5730_v0 }
  0x5f   : >> { %v879_v19 = vsel %vm6173_vm13, %v874_v3, %v878_v49  ;;  %v849_v20 = vor.u32 %v848_v4, %v845_v60  ;;  %v858_v21 = vrot.slane %v856_v6, 4  ;;  %v1020_v22 = vshll.u32 %v6123_v7, 16  ;;  %2355 = vst.msk [vmem:[#allocation3 + $0x60] sm:$0x1] (%p796_p7), %vm479_vm0, %v5730_v0  ;;  %2356 = vst.msk [vmem:[#allocation3 + $0x6c] sm:$0x1] (%p796_p7), %vm479_vm0, %v5730_v0 }
  0x60   : >> { %v884_v5 = vrot.slane %v883_v10, 4  ;;  %v1013_v25 = vrot.slane %v1011_v16, 4  ;;  %v1016_v26 = vrot.slane %v1014_v17, 5  ;;  %v1024_v27 = vshrl.u32 %v6123_v7, 16  ;;  %2357 = vst.msk [vmem:[#allocation3 + $0x78] sm:$0x1] (%p796_p7), %vm479_vm0, %v5730_v0 }
  0x61   : >> { %v850_v28 = vrot.slane %v849_v20, 4  ;;  %v859_v29 = vor.u32 %v858_v21, %v854_v14  ;;  %v1022_v30 = vrot.slane %v1020_v22, 5  ;;  %v1030_v31 = vshll.u32 %v6130_v13, 16  ;;  %2358 = vst.msk [vmem:[#allocation3 + $0x84] sm:$0x1] (%p796_p7), %vm479_vm0, %v5730_v0 }
  0x62   : >> { %v889_v32 = vsel %vm6173_vm13, %v884_v5, %v888_v59  ;;  %v1017_v33 = vor.u32 %v1016_v26, %v1013_v25  ;;  %v1026_v34 = vrot.slane %v1024_v27, 4  ;;  %v987_v35 = vshrl.u32 %v815_v23, 16  ;;  %v6210_v59 = vld [vmem:[%s6092_s19 + $0x50] sm:$0x3]  ;;  %2359 = vst.msk [vmem:[#allocation3 + $0x8] sm:$0x2] (%p796_p7), %vm496_vm1, %v5730_v0 }
  0x63   : >> { %v5090_v36 = vcombine.low %v879_v19, %v889_v32  ;;  %v855_v37 = vsel %vm6173_vm13, %v850_v28, %v854_v14  ;;  %v860_v38 = vrot.slane %v859_v29, 4  ;;  %v1032_v39 = vrot.slane %v1030_v31, 5  ;;  %v6232_v28 = vld [vmem:[%s6092_s19 + $0x8] sm:$0x3]  ;;  %2360 = vst.msk [vmem:[#allocation3 + $0x14] sm:$0x2] (%p796_p7), %vm496_vm1, %v5730_v0 }
  0x64   : >> { %v1018_v40 = vrot.slane %v1017_v33, 4  ;;  %v1027_v41 = vor.u32 %v1026_v34, %v1022_v30  ;;  %v989_v43 = vrot.slane %v987_v35, 4  ;;  %v990_v45 = vshll.u32 %v815_v23, 16  ;;  %2361 = vst.msk [vmem:[#allocation3 + $0x20] sm:$0x2] (%p796_p7), %vm496_vm1, %v5730_v0 }
  0x65   : >> { %1765 = vrot.lane.b32.xlu1 %v5090_v36, %s5732_s30  ;;  %v865_v13 = vsel %vm6173_vm13, %v860_v38, %v864_v8  ;;  %v996_v46 = vshll.u32 %v6095_v54, 16  ;;  %v1000_v47 = vshrl.u32 %v6095_v54, 16  ;;  %v1008_v48 = vrot.slane %v1006_v57, 5  ;;  %2362 = vst.msk [vmem:[#allocation3 + $0x2c] sm:$0x2] (%p796_p7), %vm496_vm1, %v5730_v0 }
  0x66   : >> { %v5089_v49 = vcombine.low %v855_v37, %v865_v13  ;;  %v1023_v50 = vsel %vm6173_vm13, %v1018_v40, %v1022_v30  ;;  %v1028_v51 = vrot.slane %v1027_v41, 4  ;;  %v992_v58 = vrot.slane %v990_v45, 5  ;;  %v6255_v41 = vld [vmem:[%s6092_s19 + $0x5c] sm:$0x3]  ;;  %2363 = vst.msk [vmem:[#allocation3 + $0x38] sm:$0x2] (%p796_p7), %vm496_vm1, %v5730_v0 }
  0x67   : >> { %v998_v60 = vrot.slane %v996_v46, 5  ;;  %v1002_v3 = vrot.slane %v1000_v47, 4  ;;  %v1421_v4 = vrot.slane %v1419_v62, 5  ;;  %v1424_v8 = vrot.slane %v1422_v63, 6  ;;  %v5565_v13 = vld [vmem:[%s6243_s16 + $0x18] sm:$0xff]  }
  0x68   : >> { %1763 = vrot.lane.b32.xlu0 %v5089_v49, %s5732_s30  ;;  %v1033_v55 = vsel %vm6173_vm13, %v1028_v51, %v1032_v39  ;;  %v993_v57 = vor.u32 %v992_v58, %v989_v43  ;;  %v1427_v10 = vrot.slane %v1000_v47, 5  ;;  %v1428_v14 = vrot.slane %v996_v46, 6  ;;  %v5566_v58 = vld [vmem:[%s6243_s16 + $0x10] sm:$0xff]   ;;  %2364 = vst.msk [vmem:[#allocation3 + $0x44] sm:$0x2] (%p796_p7), %vm496_vm1, %v5730_v0 }
  0x69   : >> { %v5096_v16 = vcombine.low %v1023_v50, %v1033_v55  ;;  %v1003_v17 = vor.u32 %v1002_v3, %v998_v60  ;;  %v1425_v19 = vor.u32 %v1424_v8, %v1421_v4  ;;  %v1433_v20 = vshrl.u32 %v6210_v59, 16  ;;  %v6274_v55 = vld [vmem:[%s6092_s19 + $0x14] sm:$0x3]  ;;  %2365 = vst.msk [vmem:[#allocation3 + $0x50] sm:$0x2] (%p796_p7), %vm496_vm1, %v5730_v0 }
  0x6a   : >> { %v994_v21 = vrot.slane %v993_v57, 4  ;;  %v1429_v62 = vor.u32 %v1428_v14, %v1427_v10  ;;  %v1436_v63 = vshll.u32 %v6210_v59, 16  ;;  %v1283_v23 = vrot.slane %v1281_v11, 5  ;;  %2366 = vst.msk [vmem:[#allocation3 + $0x5c] sm:$0x2] (%p796_p7), %vm496_vm1, %v5730_v0 }
  0x6b   : >> { %1777 = vrot.lane.b32.xlu1 %v5096_v16, %s5732_s30  ;;  %v1004_v5 = vrot.slane %v1003_v17, 4  ;;  %v1426_v25 = vrot.slane %v1425_v19, 4  ;;  %v1435_v26 = vrot.slane %v1433_v20, 5  ;;  %v1286_v29 = vrot.slane %v1284_v12, 6  ;;  %v1562_v20 = vld [vmem:[%s6092_s19 + $0x48] sm:$0xc] }
  0x6c   : >> { %v999_v30 = vsel %vm6173_vm13, %v994_v21, %v998_v60  ;;  %v1431_v31 = vrot.slane %v1429_v62, 4  ;;  %v1438_v32 = vrot.slane %v1436_v63, 6  ;;  %v1289_v11 = vrot.slane %v856_v6, 5  ;;  %v5562_v6 = vld [vmem:[%s6243_s16 + $0x20] sm:$0xff]   ;;  %2367 = vst.msk [vmem:[#allocation3 + $0x68] sm:$0x2] (%p796_p7), %vm496_vm1, %v5730_v0 }
  0x6d   : >> { %v1009_v2 = vsel %vm6173_vm13, %v1004_v5, %v1008_v48  ;;  %v1430_v12 = vsel %vm6222_vm4, %v1426_v25, %v1429_v62  ;;  %v1287_v33 = vor.u32 %v1286_v29, %v1283_v23  ;;  %v1290_v34 = vrot.slane %v852_v1, 6  ;;  %5373 = vmatprep.subr.bf16.mxu0 %v5562_v6  ;;  %5471 = vmatprep.subr.bf16.mxu1 %v5562_v6  ;;  %v5567_v5 = vld [vmem:[%s6243_s16 + $0x8] sm:$0xff]  }
  0x6e   : >> { %v5095_v35 = vcombine.low %v999_v30, %v1009_v2  ;;  %v1439_v36 = vor.u32 %v1438_v32, %v1435_v26  ;;  %v1295_v37 = vshrl.u32 %v6232_v28, 16  ;;  %v1298_v38 = vshll.u32 %v6232_v28, 16  ;;  %5374 = vmatpush3.bf16.msra.mxu0 %v5562_v6  ;;  %5476 = vmatpush3.bf16.msra.mxu1 %v5562_v6  ;;  %2368 = vst.msk [vmem:[#allocation3 + $0x74] sm:$0x2] (%p796_p7), %vm496_vm1, %v5730_v0 }
  0x6f   : >> { %v1288_v39 = vrot.slane %v1287_v33, 4  ;;  %v1291_v40 = vor.u32 %v1290_v34, %v1289_v11  ;;  %v1442_v43 = vshrl.u32 %v6135_v15, 16  ;;  %v1445_v45 = vshll.u32 %v6135_v15, 16  ;;  %5375 = vmatprep.subr.bf16.mxu0 %v5565_v13  ;;  %5472 = vmatprep.subr.bf16.mxu1 %v5565_v13  ;;  %v1556_v34 = vld [vmem:[%s6092_s19] sm:$0xc] }
  0x70   : >> { %1775 = vrot.lane.b32.xlu0 %v5095_v35, %s5732_s30  ;;  %v1440_v1 = vsel %vm6222_vm4, %v1431_v31, %v1439_v36  ;;  %v1297_v46 = vrot.slane %v1295_v37, 5  ;;  %v1300_v47 = vrot.slane %v1298_v38, 6  ;;  %v1450_v48 = vrot.slane %v1024_v27, 5  ;;  %v1563_v38 = vld [vmem:[%s6092_s19 + $0x54] sm:$0xc] }
  0x71   : >> { %v5119_v49 = vcombine.low %v1430_v12, %v1440_v1  ;;  %v1292_v15 = vsel %vm6222_vm4, %v1288_v39, %v1291_v40  ;;  %v1293_v50 = vrot.slane %v1291_v40, 4  ;;  %v1444_v51 = vrot.slane %v1442_v43, 5  ;;  %v5568_v39 = vld [vmem:[%s6243_s16] sm:$0xff]   ;;  %2369 = vst.msk [vmem:[#allocation3 + $0x80] sm:$0x2] (%p796_p7), %vm496_vm1, %v5730_v0 }
  0x72   : >> { %v1301_v60 = vor.u32 %v1300_v47, %v1297_v46  ;;  %v1447_v3 = vrot.slane %v1445_v45, 6  ;;  %v1451_v4 = vrot.slane %v1020_v22, 6  ;;  %v1456_v8 = vshrl.u32 %v6255_v41, 16  ;;  %5376 = vmatpush3.bf16.msra.mxu0 %v5565_v13  ;;  %5477 = vmatpush3.bf16.msra.mxu1 %v5565_v13  ;;  %2370 = vst.msk [vmem:[#allocation3 + $0x8c] sm:$0x2] (%p796_p7), %vm496_vm1, %v5730_v0 }
  0x73   : >> { %1895 = vrot.lane.b32.xlu1 %v5119_v49, %s5733_s15  ;;  %v1459_v27 = vshll.u32 %v6255_v41, 16  ;;  %v1304_v57 = vshrl.u32 %v6147_v24, 16  ;;  %v1307_v10 = vshll.u32 %v6147_v24, 16  ;;  %v1312_v14 = vrot.slane %v880_v44, 5  ;;  %5377 = vmatprep.subr.bf16.mxu0 %v5566_v58 }
  0x74   : >> { %v1302_v22 = vsel %vm6222_vm4, %v1293_v50, %v1301_v60  ;;  %v1448_v16 = vor.u32 %v1447_v3, %v1444_v51  ;;  %v1452_v17 = vor.u32 %v1451_v4, %v1450_v48  ;;  %v1458_v19 = vrot.slane %v1456_v8, 5  ;;  %5473 = vmatprep.subr.bf16.mxu1 %v5566_v58  ;;  %v1557_v50 = vld [vmem:[%s6092_s19 + $0xc] sm:$0xc]  ;;  %v819_v3 = vld [vmem:[%s6092_s19 + $0x60] sm:$0xf] }
  0x75   : >> { %v5113_v21 = vcombine.low %v1292_v15, %v1302_v22  ;;  %v1461_v62 = vrot.slane %v1459_v27, 6  ;;  %v1306_v63 = vrot.slane %v1304_v57, 5  ;;  %v1309_v23 = vrot.slane %v1307_v10, 6  ;;  %v6321_v4 = vld [vmem:[%s6092_s19 + $0x64] sm:$0xf] }
  0x76   : >> { %v1449_v24 = vrot.slane %v1448_v16, 4  ;;  %v1454_v25 = vrot.slane %v1452_v17, 4  ;;  %v1313_v44 = vrot.slane %v876_v42, 6  ;;  %v1318_v26 = vshrl.u32 %v6274_v55, 16  ;;  %5378 = vmatpush3.bf16.msra.mxu0 %v5566_v58  ;;  %5478 = vmatpush3.bf16.msra.mxu1 %v5566_v58  ;;  %v6327_v57 = vld [vmem:[%s6092_s19 + $0x68] sm:$0x1] }
  0x77   : >> { %1883 = vrot.lane.b32.xlu0 %v5113_v21, %s5733_s15  ;;  %v1462_v29 = vor.u32 %v1461_v62, %v1458_v19  ;;  %v1310_v30 = vor.u32 %v1309_v23, %v1306_v63  ;;  %v1321_v31 = vshll.u32 %v6274_v55, 16  ;;  %v5071_v11 = vrot.slane %v1562_v20, 10  ;;  %5379 = vmatprep.subr.bf16.mxu0 %v5567_v5  ;;  %v807_v10 = vld [vmem:[%s6092_s19 + $0x18] sm:$0xf]  ;;  %v6339_v62 = vld [vmem:[%s6092_s19 + $0x1c] sm:$0xf] }
  0x78   : >> { %v1453_v42 = vsel %vm6222_vm4, %v1449_v24, %v1452_v17  ;;  %v1314_v2 = vor.u32 %v1313_v44, %v1312_v14  ;;  %v1320_v12 = vrot.slane %v1318_v26, 5  ;;  %v1639_v33 = vrot.slane %v6095_v54, 6  ;;  %5474 = vmatprep.subr.bf16.mxu1 %v5567_v5  ;;  %v821_v24 = vld [vmem:[%s6092_s19 + $0x6c] sm:$0xf] }
  0x79   : >> { %v1463_v6 = vsel %vm6222_vm4, %v1454_v25, %v1462_v29  ;;  %v1311_v35 = vrot.slane %v1310_v30, 4  ;;  %v1323_v36 = vrot.slane %v1321_v31, 6  ;;  %v1642_v37 = vrot.slane %v6210_v59, 6 }
  0x7a   : >> { %v5120_v40 = vcombine.low %v1453_v42, %v1463_v6  ;;  %v1316_v43 = vrot.slane %v1314_v2, 4  ;;  %v1640_v45 = vsel %vm6291_vm9, %v5071_v11, %v1639_v33  ;;  %v1641_v54 = vrot.slane %v1639_v33, 4  ;;  %5380 = vmatpush3.bf16.msra.mxu0 %v5567_v5  ;;  %5479 = vmatpush3.bf16.msra.mxu1 %v5567_v5  ;;  %v6345_v5 = vld [vmem:[%s6092_s19 + $0x20] sm:$0x1]  ;;  %v6359_v6 = vld [vmem:[%s6092_s19 + $0x70] sm:$0xf] }
  0x7b   : >> { %v1315_v13 = vsel %vm6222_vm4, %v1311_v35, %v1314_v2  ;;  %v1324_v1 = vor.u32 %v1323_v36, %v1320_v12  ;;  %v5065_v46 = vrot.slane %v1556_v34, 10  ;;  %v1597_v59 = vrot.slane %v6108_v61, 6  ;;  %5381 = vmatprep.subr.bf16.mxu0 %v5568_v39  ;;  %5475 = vmatprep.subr.bf16.mxu1 %v5568_v39 }
  0x7c   : >> { %1897 = vrot.lane.b32.xlu1 %v5120_v40, %s5733_s15  ;;  %v1643_v47 = vsel %vm6291_vm9, %v1641_v54, %v1642_v37  ;;  %v1600_v48 = vrot.slane %v6232_v28, 6  ;;  %v5072_v49 = vrot.slane %v1563_v38, 10  ;;  %v1646_v15 = vrot.slane %v6123_v7, 6 }
  0x7d   : >> { %v1325_v51 = vsel %vm6222_vm4, %v1316_v43, %v1324_v1  ;;  %v5131_v58 = vcombine.low %v1640_v45, %v1643_v47  ;;  %v1598_v61 = vsel %vm6291_vm9, %v5065_v46, %v1597_v59  ;;  %v1599_v60 = vrot.slane %v1597_v59, 4  ;;  %v6365_v45 = vld [vmem:[%s6092_s19 + $0x74] sm:$0x1]  ;;  %v6372_v47 = vld [vmem:[%s6092_s19 + $0x24] sm:$0xf] }
  0x7e   : >> { %v5114_v28 = vcombine.low %v1315_v13, %v1325_v51  ;;  %v1647_v7 = vsel %vm6291_vm9, %v5072_v49, %v1646_v15  ;;  %v1648_v8 = vrot.slane %v1646_v15, 4  ;;  %v1649_v27 = vrot.slane %v6255_v41, 6  ;;  %5382 = vmatpush3.bf16.msra.mxu0 %v5568_v39  ;;  %5480 = vmatpush3.bf16.msra.mxu1 %v5568_v39 }
  0x7f   : >> { %v1601_v14 = vsel %vm6291_vm9, %v1599_v60, %v1600_v48  ;;  %v5066_v22 = vrot.slane %v1557_v50, 10  ;;  %v1604_v16 = vrot.slane %v6140_v18, 6  ;;  %v1607_v17 = vrot.slane %v6274_v55, 6 }
  0x80   : >> { %1885 = vrot.lane.b32.xlu0 %v5114_v28, %s5733_s15  ;;  %1955 = vrot.lane.b32.xlu1 %v5131_v58, %s5734_s18  ;;  %v5125_v41 = vcombine.low %v1598_v61, %v1601_v14  ;;  %v1650_v19 = vsel %vm6291_vm9, %v1648_v8, %v1649_v27  ;;  %v1035_v20 = vshrl.u32 %v819_v3, 16  ;;  %v1038_v21 = vshll.u32 %v819_v3, 16  ;;  %v6383_v8 = vld [vmem:[%s6092_s19 + $0x28] sm:$0xf] }
  0x81   : >> { %v5132_v63 = vcombine.low %v1647_v7, %v1650_v19  ;;  %v1605_v23 = vsel %vm6291_vm9, %v5066_v22, %v1604_v16  ;;  %v1606_v18 = vrot.slane %v1604_v16, 4  ;;  %v1044_v55 = vshll.u32 %v6321_v4, 16 }
  0x82   : >> { %v1037_v25 = vrot.slane %v1035_v20, 4  ;;  %v1040_v44 = vrot.slane %v1038_v21, 5  ;;  %v1048_v26 = vshrl.u32 %v6321_v4, 16  ;;  %v1054_v29 = vshll.u32 %v6327_v57, 16 }
  0x83   : >> { %v1608_v30 = vsel %vm6291_vm9, %v1606_v18, %v1607_v17  ;;  %v1046_v31 = vrot.slane %v1044_v55, 5  ;;  %v891_v11 = vshrl.u32 %v807_v10, 16  ;;  %v894_v42 = vshll.u32 %v807_v10, 16  ;;  %v6389_v17 = vld [vmem:[%s6092_s19 + $0x2c] sm:$0x1] }
  0x84   : >> { %1943 = vrot.lane.b32.xlu0 %v5125_v41, %s5734_s18  ;;  %1957 = vrot.lane.b32.xlu1 %v5132_v63, %s5734_s18  ;;  %v5126_v2 = vcombine.low %v1605_v23, %v1608_v30  ;;  %v1041_v12 = vor.u32 %v1040_v44, %v1037_v25  ;;  %v1050_v33 = vrot.slane %v1048_v26, 4  ;;  %v1056_v34 = vrot.slane %v1054_v29, 5  ;;  %v6396_v63 = vld [vmem:[%s6092_s19 + $0x60] sm:$0xe] }
  0x85   : >> { %v893_v35 = vrot.slane %v891_v11, 4  ;;  %v896_v36 = vrot.slane %v894_v42, 5  ;;  %v900_v37 = vshll.u32 %v6339_v62, 16  ;;  %v904_v38 = vshrl.u32 %v6339_v62, 16  ;;  %v6406_v11 = vld [vmem:[%s6092_s19 + $0x18] sm:$0xe] }
  0x86   : >> { %v1042_v39 = vrot.slane %v1041_v12, 4  ;;  %v1051_v40 = vor.u32 %v1050_v33, %v1046_v31  ;;  %v910_v43 = vshll.u32 %v6345_v5, 16  ;;  %v1059_v54 = vshrl.u32 %v821_v24, 16 }
  0x87   : >> { %v897_v13 = vor.u32 %v896_v36, %v893_v35  ;;  %v902_v1 = vrot.slane %v900_v37, 5  ;;  %v906_v46 = vrot.slane %v904_v38, 4  ;;  %v1062_v59 = vshll.u32 %v821_v24, 16 }
  0x88   : >> { %1945 = vrot.lane.b32.xlu0 %v5126_v2, %s5734_s18  ;;  %v1047_v48 = vsel %vm6173_vm13, %v1042_v39, %v1046_v31  ;;  %v1052_v49 = vrot.slane %v1051_v40, 4  ;;  %v912_v15 = vrot.slane %v910_v43, 5  ;;  %v1061_v50 = vrot.slane %v1059_v54, 4 }
  0x89   : >> { %v898_v51 = vrot.slane %v897_v13, 4  ;;  %v907_v58 = vor.u32 %v906_v46, %v902_v1  ;;  %v1064_v61 = vrot.slane %v1062_v59, 5  ;;  %v1068_v60 = vshll.u32 %v6359_v6, 16 }
  0x8a   : >> { %v1057_v3 = vsel %vm6173_vm13, %v1052_v49, %v1056_v34  ;;  %v1072_v28 = vshrl.u32 %v6359_v6, 16  ;;  %v1078_v7 = vshll.u32 %v6365_v45, 16  ;;  %v915_v27 = vshrl.u32 %v6372_v47, 16 }
  0x8b   : >> { %v5097_v10 = vcombine.low %v1047_v48, %v1057_v3  ;;  %v903_v14 = vsel %vm6173_vm13, %v898_v51, %v902_v1  ;;  %v908_v22 = vrot.slane %v907_v58, 4  ;;  %v1065_v16 = vor.u32 %v1064_v61, %v1061_v50  ;;  %v6421_v1 = vld [vmem:[%s6092_s19 + $0x6c] sm:$0xe]  ;;  %v6430_v58 = vld [vmem:[%s6092_s19 + $0x24] sm:$0xe] }
  0x8c   : >> { %v1070_v41 = vrot.slane %v1068_v60, 5  ;;  %v1074_v19 = vrot.slane %v1072_v28, 4  ;;  %v1080_v20 = vrot.slane %v1078_v7, 5  ;;  %v917_v21 = vrot.slane %v915_v27, 4 }
  0x8d   : >> { %1779 = vrot.lane.b32.xlu1 %v5097_v10, %s5732_s30  ;;  %v913_v23 = vsel %vm6173_vm13, %v908_v22, %v912_v15  ;;  %v1066_v18 = vrot.slane %v1065_v16, 4  ;;  %v918_v24 = vshll.u32 %v6372_v47, 16  ;;  %v924_v25 = vshll.u32 %v6383_v8, 16 }
  0x8e   : >> { %v5091_v44 = vcombine.low %v903_v14, %v913_v23  ;;  %v1075_v29 = vor.u32 %v1074_v19, %v1070_v41  ;;  %v928_v30 = vshrl.u32 %v6383_v8, 16  ;;  %v934_v31 = vshll.u32 %v6389_v17, 16 }
  0x8f   : >> { %v1071_v42 = vsel %vm6173_vm13, %v1066_v18, %v1070_v41  ;;  %v920_v2 = vrot.slane %v918_v24, 5  ;;  %v926_v12 = vrot.slane %v924_v25, 5  ;;  %v5061_v33 = vrot.slane %v6396_v63, 9 }
  0x90   : >> { %1767 = vrot.lane.b32.xlu0 %v5091_v44, %s5732_s30  ;;  %v1076_v34 = vrot.slane %v1075_v29, 4  ;;  %v930_v35 = vrot.slane %v928_v30, 4  ;;  %v936_v36 = vrot.slane %v934_v31, 5  ;;  %v1239_v39 = vrot.slane %v6321_v4, 5  ;;  %v6450_v44 = vld [vmem:[%s6092_s19 + $0x68] sm:$0x3] }
  0x91   : >> { %v921_v40 = vor.u32 %v920_v2, %v917_v21  ;;  %v1242_v43 = vrot.slane %v6327_v57, 5  ;;  %v5055_v54 = vrot.slane %v6406_v11, 9  ;;  %v1197_v13 = vrot.slane %v6339_v62, 5 }
  0x92   : >> { %v1081_v46 = vsel %vm6173_vm13, %v1076_v34, %v1080_v20  ;;  %v931_v59 = vor.u32 %v930_v35, %v926_v12  ;;  %v1240_v48 = vsel %vm6088_vm10, %v5061_v33, %v1239_v39  ;;  %v1241_v49 = vrot.slane %v1239_v39, 4 }
  0x93   : >> { %v5098_v15 = vcombine.low %v1071_v42, %v1081_v46  ;;  %v922_v50 = vrot.slane %v921_v40, 4  ;;  %v1198_v51 = vsel %vm6088_vm10, %v5055_v54, %v1197_v13  ;;  %v1199_v57 = vrot.slane %v1197_v13, 4  ;;  %v6470_v46 = vld [vmem:[%s6092_s19 + $0x20] sm:$0x3] }
  0x94   : >> { %v932_v61 = vrot.slane %v931_v59, 4  ;;  %v1243_v3 = vsel %vm6088_vm10, %v1241_v49, %v1242_v43  ;;  %v1200_v7 = vrot.slane %v6345_v5, 5  ;;  %v5062_v27 = vrot.slane %v6421_v1, 9 }
  0x95   : >> { %1781 = vrot.lane.b32.xlu1 %v5098_v15, %s5732_s30  ;;  %v927_v10 = vsel %vm6173_vm13, %v922_v50, %v926_v12  ;;  %v5109_v14 = vcombine.low %v1240_v48, %v1243_v3  ;;  %v1246_v22 = vrot.slane %v6359_v6, 5  ;;  %v1249_v16 = vrot.slane %v6365_v45, 5 }
  0x96   : >> { %v937_v41 = vsel %vm6173_vm13, %v932_v61, %v936_v36  ;;  %v1201_v19 = vsel %vm6088_vm10, %v1199_v57, %v1200_v7  ;;  %v5056_v5 = vrot.slane %v6430_v58, 9  ;;  %v1204_v20 = vrot.slane %v6383_v8, 5 }
  0x97   : >> { %v5092_v21 = vcombine.low %v927_v10, %v937_v41  ;;  %v5103_v23 = vcombine.low %v1198_v51, %v1201_v19  ;;  %v1247_v18 = vsel %vm6088_vm10, %v5062_v27, %v1246_v22  ;;  %v1248_v24 = vrot.slane %v1246_v22, 4 }
  0x98   : >> { %v1205_v45 = vsel %vm6088_vm10, %v5056_v5, %v1204_v20  ;;  %v1206_v29 = vrot.slane %v1204_v20, 4  ;;  %v1207_v31 = vrot.slane %v6389_v17, 5  ;;  %v1465_v42 = vshrl.u32 %v6396_v63, 16 }
  0x99   : >> { %1769 = vrot.lane.b32.xlu0 %v5092_v21, %s5732_s30  ;;  %1839 = vrot.lane.b32.xlu1 %v5109_v14, %s5731_s20  ;;  %v1250_v2 = vsel %vm6088_vm10, %v1248_v24, %v1249_v16  ;;  %v1468_v12 = vshll.u32 %v6396_v63, 16  ;;  %v1473_v33 = vrot.slane %v1048_v26, 5  ;;  %v1474_v34 = vrot.slane %v1044_v55, 6  ;;  %v6484_v16 = vld [vmem:[%s6092_s19 + $0x74] sm:$0x3] }
  0x9a   : >> { %v5110_v35 = vcombine.low %v1247_v18, %v1250_v2  ;;  %v1208_v17 = vsel %vm6088_vm10, %v1206_v29, %v1207_v31  ;;  %v1467_v36 = vrot.slane %v1465_v42, 5  ;;  %v1479_v39 = vshrl.u32 %v6450_v44, 16 }
  0x9b   : >> { %v5104_v40 = vcombine.low %v1205_v45, %v1208_v17  ;;  %v1470_v43 = vrot.slane %v1468_v12, 6  ;;  %v1475_v54 = vor.u32 %v1474_v34, %v1473_v33  ;;  %v1482_v13 = vshll.u32 %v6450_v44, 16  ;;  %v6504_v33 = vld [vmem:[%s6092_s19 + $0x2c] sm:$0x3] }
  0x9c   : >> { %v1481_v63 = vrot.slane %v1479_v39, 5  ;;  %v1327_v26 = vshrl.u32 %v6406_v11, 16  ;;  %v1330_v59 = vshll.u32 %v6406_v11, 16  ;;  %v1335_v55 = vrot.slane %v904_v38, 5 }
  0x9d   : >> { %1827 = vrot.lane.b32.xlu0 %v5103_v23, %s5731_s20  ;;  %1841 = vrot.lane.b32.xlu1 %v5110_v35, %s5731_s20  ;;  %v1471_v48 = vor.u32 %v1470_v43, %v1467_v36  ;;  %v1477_v49 = vrot.slane %v1475_v54, 4  ;;  %v1484_v15 = vrot.slane %v1482_v13, 6  ;;  %v1336_v50 = vrot.slane %v900_v37, 6  ;;  %v1564_v36 = vld [vmem:[%s6092_s19 + $0x60] sm:$0xc] }
  0x9e   : >> { %v1329_v51 = vrot.slane %v1327_v26, 5  ;;  %v1332_v57 = vrot.slane %v1330_v59, 6  ;;  %v1341_v61 = vshrl.u32 %v6470_v46, 16  ;;  %v1344_v11 = vshll.u32 %v6470_v46, 16 }
  0x9f   : >> { %v1472_v3 = vrot.slane %v1471_v48, 4  ;;  %v1485_v7 = vor.u32 %v1484_v15, %v1481_v63  ;;  %v1337_v38 = vor.u32 %v1336_v50, %v1335_v55  ;;  %v1488_v27 = vshrl.u32 %v6421_v1, 16  ;;  %v1558_v15 = vld [vmem:[%s6092_s19 + $0x18] sm:$0xc] }
  0xa0   : >> { %v1333_v10 = vor.u32 %v1332_v57, %v1329_v51  ;;  %v1343_v14 = vrot.slane %v1341_v61, 5  ;;  %v1346_v22 = vrot.slane %v1344_v11, 6  ;;  %v1491_v41 = vshll.u32 %v6421_v1, 16 }
  0xa1   : >> { %1829 = vrot.lane.b32.xlu0 %v5104_v40, %s5731_s20  ;;  %v1476_v37 = vsel %vm6222_vm4, %v1472_v3, %v1475_v54  ;;  %v1486_v19 = vsel %vm6222_vm4, %v1477_v49, %v1485_v7  ;;  %v1339_v5 = vrot.slane %v1337_v38, 4  ;;  %v1490_v20 = vrot.slane %v1488_v27, 5  ;;  %v1565_v7 = vld [vmem:[%s6092_s19 + $0x6c] sm:$0xc] }
  0xa2   : >> { %v5121_v21 = vcombine.low %v1476_v37, %v1486_v19  ;;  %v1334_v23 = vrot.slane %v1333_v10, 4  ;;  %v1347_v18 = vor.u32 %v1346_v22, %v1343_v14  ;;  %v1493_v24 = vrot.slane %v1491_v41, 6  ;;  %v1559_v19 = vld [vmem:[%s6092_s19 + $0x24] sm:$0xc] }
  0xa3   : >> { %v1496_v45 = vrot.slane %v1072_v28, 5  ;;  %v1497_v1 = vrot.slane %v1068_v60, 6  ;;  %v1502_v29 = vshrl.u32 %v6484_v16, 16  ;;  %v1505_v31 = vshll.u32 %v6484_v16, 16 }
  0xa4   : >> { %1899 = vrot.lane.b32.xlu1 %v5121_v21, %s5733_s15  ;;  %v1338_v42 = vsel %vm6222_vm4, %v1334_v23, %v1337_v38  ;;  %v1348_v2 = vsel %vm6222_vm4, %v1339_v5, %v1347_v18  ;;  %v1494_v12 = vor.u32 %v1493_v24, %v1490_v20  ;;  %v1350_v28 = vshrl.u32 %v6430_v58, 16  ;;  %v6535_v23 = vld [vmem:[%s6092_s19 + $0x78] sm:$0xf] }
  0xa5   : >> { %v5115_v34 = vcombine.low %v1338_v42, %v1348_v2  ;;  %v1498_v35 = vor.u32 %v1497_v1, %v1496_v45  ;;  %v1504_v60 = vrot.slane %v1502_v29, 5  ;;  %v1507_v17 = vrot.slane %v1505_v31, 6  ;;  %v6544_v45 = vld [vmem:[%s6092_s19 + $0x7c] sm:$0xf] }
  0xa6   : >> { %v1495_v39 = vrot.slane %v1494_v12, 4  ;;  %v1352_v40 = vrot.slane %v1350_v28, 5  ;;  %v1353_v43 = vshll.u32 %v6430_v58, 16  ;;  %v1358_v54 = vrot.slane %v928_v30, 5 }
  0xa7   : >> { %1887 = vrot.lane.b32.xlu0 %v5115_v34, %s5733_s15  ;;  %v1500_v13 = vrot.slane %v1498_v35, 4  ;;  %v1508_v63 = vor.u32 %v1507_v17, %v1504_v60  ;;  %v1359_v26 = vrot.slane %v924_v25, 6  ;;  %v1364_v59 = vshrl.u32 %v6504_v33, 16 }
  0xa8   : >> { %v1499_v55 = vsel %vm6222_vm4, %v1495_v39, %v1498_v35  ;;  %v1355_v48 = vrot.slane %v1353_v43, 6  ;;  %v1367_v49 = vshll.u32 %v6504_v33, 16  ;;  %v5073_v58 = vrot.slane %v1564_v36, 10  ;;  %v6558_v35 = vld [vmem:[%s6092_s19 + $0x80] sm:$0x1] }
  0xa9   : >> { %v1509_v30 = vsel %vm6222_vm4, %v1500_v13, %v1508_v63  ;;  %v1360_v50 = vor.u32 %v1359_v26, %v1358_v54  ;;  %v1366_v51 = vrot.slane %v1364_v59, 5  ;;  %v1653_v57 = vrot.slane %v6321_v4, 6  ;;  %v6563_v36 = vld [vmem:[%s6092_s19 + $0x30] sm:$0xf]  ;;  %v6568_v54 = vld [vmem:[%s6092_s19 + $0x34] sm:$0xf] }
  0xaa   : >> { %v5122_v61 = vcombine.low %v1499_v55, %v1509_v30  ;;  %v1356_v25 = vor.u32 %v1355_v48, %v1352_v40  ;;  %v1369_v11 = vrot.slane %v1367_v49, 6  ;;  %v1656_v3 = vrot.slane %v6450_v44, 6  ;;  %v6578_v49 = vld [vmem:[%s6092_s19 + $0x38] sm:$0x1] }
  0xab   : >> { %v1362_v38 = vrot.slane %v1360_v50, 4  ;;  %v1654_v27 = vsel %vm6291_vm9, %v5073_v58, %v1653_v57  ;;  %v1655_v10 = vrot.slane %v1653_v57, 4  ;;  %v5067_v14 = vrot.slane %v1558_v15, 10 }
  0xac   : >> { %1901 = vrot.lane.b32.xlu1 %v5122_v61, %s5733_s15  ;;  %v1357_v22 = vrot.slane %v1356_v25, 4  ;;  %v1370_v41 = vor.u32 %v1369_v11, %v1366_v51  ;;  %v1611_v4 = vrot.slane %v6339_v62, 6  ;;  %v1614_v37 = vrot.slane %v6470_v46, 6  ;;  %v6587_v61 = vld [vmem:[%s6092_s19 + $0x84] sm:$0xf] }
  0xad   : >> { %v1657_v44 = vsel %vm6291_vm9, %v1655_v10, %v1656_v3  ;;  %v5074_v5 = vrot.slane %v1565_v7, 10  ;;  %v1660_v20 = vrot.slane %v6359_v6, 6  ;;  %v1663_v21 = vrot.slane %v6484_v16, 6 }
  0xae   : >> { %v1361_v18 = vsel %vm6222_vm4, %v1357_v22, %v1360_v50  ;;  %v1371_v24 = vsel %vm6222_vm4, %v1362_v38, %v1370_v41  ;;  %v5133_v62 = vcombine.low %v1654_v27, %v1657_v44  ;;  %v1612_v46 = vsel %vm6291_vm9, %v5067_v14, %v1611_v4  ;;  %v6591_v38 = vld [vmem:[%s6092_s19 + $0x88] sm:$0xf] }
  0xaf   : >> { %v5116_v1 = vcombine.low %v1361_v18, %v1371_v24  ;;  %v1613_v6 = vrot.slane %v1611_v4, 4  ;;  %v1661_v16 = vsel %vm6291_vm9, %v5074_v5, %v1660_v20  ;;  %v1662_v29 = vrot.slane %v1660_v20, 4 }
  0xb0   : >> { %1959 = vrot.lane.b32.xlu1 %v5133_v62, %s5734_s18  ;;  %v5068_v31 = vrot.slane %v1559_v19, 10  ;;  %v1618_v42 = vrot.slane %v6383_v8, 6  ;;  %v1621_v2 = vrot.slane %v6504_v33, 6  ;;  %v1083_v12 = vshrl.u32 %v6535_v23, 16 }
  0xb1   : >> { %1889 = vrot.lane.b32.xlu0 %v5116_v1, %s5733_s15  ;;  %v1615_v28 = vsel %vm6291_vm9, %v1613_v6, %v1614_v37  ;;  %v1664_v34 = vsel %vm6291_vm9, %v1662_v29, %v1663_v21  ;;  %v1086_v60 = vshll.u32 %v6535_v23, 16  ;;  %v1092_v17 = vshll.u32 %v6544_v45, 16  ;;  %v6599_v37 = vld [vmem:[%s6092_s19 + $0x8c] sm:$0x1]  ;;  %v6608_v6 = vld [vmem:[%s6092_s19 + $0x3c] sm:$0xf] }
  0xb2   : >> { %v5127_v33 = vcombine.low %v1612_v46, %v1615_v28  ;;  %v5134_v39 = vcombine.low %v1661_v16, %v1664_v34  ;;  %v1619_v40 = vsel %vm6291_vm9, %v5068_v31, %v1618_v42  ;;  %v1620_v43 = vrot.slane %v1618_v42, 4 }
  0xb3   : >> { %v1085_v13 = vrot.slane %v1083_v12, 4  ;;  %v1088_v63 = vrot.slane %v1086_v60, 5  ;;  %v1094_v26 = vrot.slane %v1092_v17, 5  ;;  %v1096_v59 = vshrl.u32 %v6544_v45, 16 }
  0xb4   : >> { %1961 = vrot.lane.b32.xlu1 %v5134_v39, %s5734_s18  ;;  %v1622_v55 = vsel %vm6291_vm9, %v1620_v43, %v1621_v2  ;;  %v1102_v48 = vshll.u32 %v6558_v35, 16  ;;  %v939_v58 = vshrl.u32 %v6563_v36, 16  ;;  %v942_v15 = vshll.u32 %v6563_v36, 16  ;;  %v6617_v2 = vld [vmem:[%s6092_s19 + $0x40] sm:$0xf] }
  0xb5   : >> { %1947 = vrot.lane.b32.xlu0 %v5127_v33, %s5734_s18  ;;  %v5128_v30 = vcombine.low %v1619_v40, %v1622_v55  ;;  %v1089_v50 = vor.u32 %v1088_v63, %v1085_v13  ;;  %v1098_v51 = vrot.slane %v1096_v59, 4  ;;  %v948_v57 = vshll.u32 %v6568_v54, 16  ;;  %v6624_v40 = vld [vmem:[%s6092_s19 + $0x44] sm:$0x1] }
  0xb6   : >> { %v1104_v25 = vrot.slane %v1102_v48, 5  ;;  %v941_v11 = vrot.slane %v939_v58, 4  ;;  %v944_v3 = vrot.slane %v942_v15, 5  ;;  %v952_v7 = vshrl.u32 %v6568_v54, 16  ;;  %v1140_v58 = vld [vmem:[%s6092_s19 + $0x78] sm:$0xe] }
  0xb7   : >> { %v1090_v27 = vrot.slane %v1089_v50, 4  ;;  %v1099_v10 = vor.u32 %v1098_v51, %v1094_v26  ;;  %v950_v14 = vrot.slane %v948_v57, 5  ;;  %v958_v22 = vshll.u32 %v6578_v49, 16 }
  0xb8   : >> { %v945_v41 = vor.u32 %v944_v3, %v941_v11  ;;  %v954_v4 = vrot.slane %v952_v7, 4  ;;  %v1107_v19 = vshrl.u32 %v6587_v61, 16  ;;  %v1110_v44 = vshll.u32 %v6587_v61, 16 }
  0xb9   : >> { %1949 = vrot.lane.b32.xlu0 %v5128_v30, %s5734_s18  ;;  %v1095_v5 = vsel %vm6173_vm13, %v1090_v27, %v1094_v26  ;;  %v1100_v20 = vrot.slane %v1099_v10, 4  ;;  %v960_v21 = vrot.slane %v958_v22, 5  ;;  %v1116_v18 = vshll.u32 %v6591_v38, 16 }
  0xba   : >> { %v946_v24 = vrot.slane %v945_v41, 4  ;;  %v955_v62 = vor.u32 %v954_v4, %v950_v14  ;;  %v1109_v46 = vrot.slane %v1107_v19, 4  ;;  %v1112_v1 = vrot.slane %v1110_v44, 5 }
  0xbb   : >> { %v1105_v16 = vsel %vm6173_vm13, %v1100_v20, %v1104_v25  ;;  %v1118_v29 = vrot.slane %v1116_v18, 5  ;;  %v1120_v31 = vshrl.u32 %v6591_v38, 16  ;;  %v1126_v42 = vshll.u32 %v6599_v37, 16  ;;  %v6635_v25 = vld [vmem:[%s6092_s19 + $0x30] sm:$0xe] }
  0xbc   : >> { %v5099_v12 = vcombine.low %v1095_v5, %v1105_v16  ;;  %v951_v28 = vsel %vm6173_vm13, %v946_v24, %v950_v14  ;;  %v956_v34 = vrot.slane %v955_v62, 4  ;;  %v1113_v60 = vor.u32 %v1112_v1, %v1109_v46 }
  0xbd   : >> { %v1122_v33 = vrot.slane %v1120_v31, 4  ;;  %v1128_v39 = vrot.slane %v1126_v42, 5  ;;  %v963_v43 = vshrl.u32 %v6608_v6, 16  ;;  %v966_v13 = vshll.u32 %v6608_v6, 16 }
  0xbe   : >> { %1783 = vrot.lane.b32.xlu1 %v5099_v12, %s5732_s30  ;;  %v961_v63 = vsel %vm6173_vm13, %v956_v34, %v960_v21  ;;  %v1114_v26 = vrot.slane %v1113_v60, 4  ;;  %v972_v55 = vshll.u32 %v6617_v2, 16  ;;  %v976_v48 = vshrl.u32 %v6617_v2, 16  ;;  %v6649_v21 = vld [vmem:[%s6092_s19 + $0x84] sm:$0xe] }
  0xbf   : >> { %v5093_v15 = vcombine.low %v951_v28, %v961_v63  ;;  %v1123_v30 = vor.u32 %v1122_v33, %v1118_v29  ;;  %v965_v50 = vrot.slane %v963_v43, 4  ;;  %v968_v51 = vrot.slane %v966_v13, 5  ;;  %v6664_v33 = vld [vmem:[%s6092_s19 + $0x3c] sm:$0xe] }
  0xc0   : >> { %v1119_v11 = vsel %vm6173_vm13, %v1114_v26, %v1118_v29  ;;  %v974_v3 = vrot.slane %v972_v55, 5  ;;  %v978_v27 = vrot.slane %v976_v48, 4  ;;  %v982_v10 = vshll.u32 %v6624_v40, 16 }
  0xc1   : >> { %1771 = vrot.lane.b32.xlu0 %v5093_v15, %s5732_s30  ;;  %v1124_v14 = vrot.slane %v1123_v30, 4  ;;  %v969_v22 = vor.u32 %v968_v51, %v965_v50  ;;  %v5063_v41 = vrot.slane %v1140_v58, 9  ;;  %v1253_v4 = vrot.slane %v6544_v45, 5 }
  0xc2   : >> { %v979_v19 = vor.u32 %v978_v27, %v974_v3  ;;  %v984_v44 = vrot.slane %v982_v10, 5  ;;  %v1256_v5 = vrot.slane %v6558_v35, 5  ;;  %v5057_v20 = vrot.slane %v6635_v25, 9  ;;  %v6680_v27 = vld [vmem:[%s6092_s19 + $0x80] sm:$0x3] }
  0xc3   : >> { %v1129_v24 = vsel %vm6173_vm13, %v1124_v14, %v1128_v39  ;;  %v970_v62 = vrot.slane %v969_v22, 4  ;;  %v1254_v46 = vsel %vm6088_vm10, %v5063_v41, %v1253_v4  ;;  %v1255_v1 = vrot.slane %v1253_v4, 4 }
  0xc4   : >> { %v5100_v16 = vcombine.low %v1119_v11, %v1129_v24  ;;  %v980_v29 = vrot.slane %v979_v19, 4  ;;  %v1211_v42 = vrot.slane %v6568_v54, 5  ;;  %v1214_v12 = vrot.slane %v6578_v49, 5 }
  0xc5   : >> { %v975_v35 = vsel %vm6173_vm13, %v970_v62, %v974_v3  ;;  %v1257_v28 = vsel %vm6088_vm10, %v1255_v1, %v1256_v5  ;;  %v5064_v34 = vrot.slane %v6649_v21, 9  ;;  %v1260_v60 = vrot.slane %v6591_v38, 5 }
  0xc6   : >> { %1785 = vrot.lane.b32.xlu1 %v5100_v16, %s5732_s30  ;;  %v985_v39 = vsel %vm6173_vm13, %v980_v29, %v984_v44  ;;  %v5111_v43 = vcombine.low %v1254_v46, %v1257_v28  ;;  %v1212_v49 = vsel %vm6088_vm10, %v5057_v20, %v1211_v42  ;;  %v1213_v13 = vrot.slane %v1211_v42, 4  ;;  %v6697_v46 = vld [vmem:[%s6092_s19 + $0x38] sm:$0x3] }
  0xc7   : >> { %v5094_v63 = vcombine.low %v975_v35, %v985_v39  ;;  %v1261_v26 = vsel %vm6088_vm10, %v5064_v34, %v1260_v60  ;;  %v1262_v15 = vrot.slane %v1260_v60, 4  ;;  %v1263_v30 = vrot.slane %v6599_v37, 5 }
  0xc8   : >> { %v1215_v50 = vsel %vm6088_vm10, %v1213_v13, %v1214_v12  ;;  %v5058_v51 = vrot.slane %v6664_v33, 9  ;;  %v1218_v11 = vrot.slane %v6617_v2, 5  ;;  %v1221_v3 = vrot.slane %v6624_v40, 5 }
  0xc9   : >> { %1773 = vrot.lane.b32.xlu0 %v5094_v63, %s5732_s30  ;;  %v5105_v10 = vcombine.low %v1212_v49, %v1215_v50  ;;  %v1264_v14 = vsel %vm6088_vm10, %v1262_v15, %v1263_v30  ;;  %v1511_v22 = vshrl.u32 %v1140_v58, 16  ;;  %v1514_v37 = vshll.u32 %v1140_v58, 16  ;;  %v6710_v15 = vpop.permute.xlu1 %1835 }
  0xca   : >> { %1843 = vrot.lane.b32.xlu1 %v5111_v43, %s5731_s20  ;;  %v5112_v41 = vcombine.low %v1261_v26, %v1264_v14  ;;  %v1219_v4 = vsel %vm6088_vm10, %v5058_v51, %v1218_v11  ;;  %v1220_v19 = vrot.slane %v1218_v11, 4  ;;  %v1519_v40 = vrot.slane %v1096_v59, 5  ;;  %v6716_v51 = vld [vmem:[%s6092_s19 + $0x8c] sm:$0x3] }
  0xcb   : >> { %v1513_v44 = vrot.slane %v1511_v22, 5  ;;  %v1516_v5 = vrot.slane %v1514_v37, 6  ;;  %v1520_v20 = vrot.slane %v1092_v17, 6  ;;  %v1525_v24 = vshrl.u32 %v6680_v27, 16 }
  0xcc   : >> { %v1222_v58 = vsel %vm6088_vm10, %v1220_v19, %v1221_v3  ;;  %v1528_v62 = vshll.u32 %v6680_v27, 16  ;;  %v1373_v1 = vshrl.u32 %v6635_v25, 16  ;;  %v1376_v16 = vshll.u32 %v6635_v25, 16 }
  0xcd   : >> { %1831 = vrot.lane.b32.xlu0 %v5105_v10, %s5731_s20  ;;  %v5106_v59 = vcombine.low %v1219_v4, %v1222_v58  ;;  %v1517_v29 = vor.u32 %v1516_v5, %v1513_v44  ;;  %v1521_v42 = vor.u32 %v1520_v20, %v1519_v40  ;;  %v1527_v12 = vrot.slane %v1525_v24, 5  ;;  %v6728_v5 = vpop.permute.xlu0 %1823  ;;  %v6733_v58 = vld [vmem:[%s6092_s19 + $0x44] sm:$0x3] }
  0xce   : >> { %1845 = vrot.lane.b32.xlu1 %v5112_v41, %s5731_s20  ;;  %v1530_v17 = vrot.slane %v1528_v62, 6  ;;  %v1375_v35 = vrot.slane %v1373_v1, 5  ;;  %v1378_v28 = vrot.slane %v1376_v16, 6  ;;  %v1381_v34 = vrot.slane %v952_v7, 5 }
  0xcf   : >> { %v1518_v60 = vrot.slane %v1517_v29, 4  ;;  %v1523_v39 = vrot.slane %v1521_v42, 4  ;;  %v1382_v25 = vrot.slane %v948_v57, 6  ;;  %v1387_v43 = vshrl.u32 %v6697_v46, 16  ;;  %v1566_v29 = vld [vmem:[%s6092_s19 + $0x78] sm:$0xc] }
  0xd0   : >> { %v1531_v49 = vor.u32 %v1530_v17, %v1527_v12  ;;  %v1379_v13 = vor.u32 %v1378_v28, %v1375_v35  ;;  %v1390_v63 = vshll.u32 %v6697_v46, 16  ;;  %v1534_v26 = vshrl.u32 %v6649_v21, 16 }
  0xd1   : >> { %1833 = vrot.lane.b32.xlu0 %v5106_v59, %s5731_s20  ;;  %v1522_v7 = vsel %vm6222_vm4, %v1518_v60, %v1521_v42  ;;  %v1383_v30 = vor.u32 %v1382_v25, %v1381_v34  ;;  %v1389_v50 = vrot.slane %v1387_v43, 5  ;;  %v1537_v57 = vshll.u32 %v6649_v21, 16  ;;  %v6742_v42 = vpop.permute.xlu1 %1837  ;;  %v1560_v25 = vld [vmem:[%s6092_s19 + $0x30] sm:$0xc] }
  0xd2   : >> { %v1532_v11 = vsel %vm6222_vm4, %v1523_v39, %v1531_v49  ;;  %v1380_v3 = vrot.slane %v1379_v13, 4  ;;  %v1392_v10 = vrot.slane %v1390_v63, 6  ;;  %v1536_v14 = vrot.slane %v1534_v26, 5 }
  0xd3   : >> { %v5123_v22 = vcombine.low %v1522_v7, %v1532_v11  ;;  %v1385_v37 = vrot.slane %v1383_v30, 4  ;;  %v1539_v41 = vrot.slane %v1537_v57, 6  ;;  %v1542_v4 = vrot.slane %v1120_v31, 5 }
  0xd4   : >> { %v1384_v19 = vsel %vm6222_vm4, %v1380_v3, %v1383_v30  ;;  %v1393_v40 = vor.u32 %v1392_v10, %v1389_v50  ;;  %v1543_v21 = vrot.slane %v1116_v18, 6  ;;  %v1548_v44 = vshrl.u32 %v6716_v51, 16  ;;  %v6753_v50 = vpop.permute.xlu0 %1825  ;;  %v1567_v10 = vld [vmem:[%s6092_s19 + $0x84] sm:$0xc] }
  0xd5   : >> { %1903 = vrot.lane.b32.xlu1 %v5123_v22, %s5733_s15  ;;  %v1540_v20 = vor.u32 %v1539_v41, %v1536_v14  ;;  %v1551_v24 = vshll.u32 %v6716_v51, 16  ;;  %v1396_v31 = vshrl.u32 %v6664_v33, 16  ;;  %v1399_v62 = vshll.u32 %v6664_v33, 16 }
  0xd6   : >> { %v1394_v1 = vsel %vm6222_vm4, %v1385_v37, %v1393_v40  ;;  %v1544_v18 = vor.u32 %v1543_v21, %v1542_v4  ;;  %v1550_v16 = vrot.slane %v1548_v44, 5  ;;  %v1404_v59 = vrot.slane %v976_v48, 5 }
  0xd7   : >> { %v5117_v12 = vcombine.low %v1384_v19, %v1394_v1  ;;  %v1541_v17 = vrot.slane %v1540_v20, 4  ;;  %v1553_v35 = vrot.slane %v1551_v24, 6  ;;  %v1398_v28 = vrot.slane %v1396_v31, 5  ;;  %v6761_v4 = vpop.permute.xlu1 %1765 }
  0xd8   : >> { %v1546_v34 = vrot.slane %v1544_v18, 4  ;;  %v1401_v60 = vrot.slane %v1399_v62, 6  ;;  %v1405_v33 = vrot.slane %v972_v55, 6  ;;  %v1410_v39 = vshrl.u32 %v6733_v58, 16  ;;  %v1561_v62 = vld [vmem:[%s6092_s19 + $0x3c] sm:$0xc] }
  0xd9   : >> { %1891 = vrot.lane.b32.xlu0 %v5117_v12, %s5733_s15  ;;  %v1545_v48 = vsel %vm6222_vm4, %v1541_v17, %v1544_v18  ;;  %v1554_v43 = vor.u32 %v1553_v35, %v1550_v16  ;;  %v1413_v49 = vshll.u32 %v6733_v58, 16  ;;  %v5075_v13 = vrot.slane %v1566_v29, 10 }
  0xda   : >> { %v1402_v63 = vor.u32 %v1401_v60, %v1398_v28  ;;  %v1406_v26 = vor.u32 %v1405_v33, %v1404_v59  ;;  %v1412_v7 = vrot.slane %v1410_v39, 5  ;;  %v1667_v30 = vrot.slane %v6544_v45, 6  ;;  %v1764_v35 = vpop.permute.xlu0 %1763 }
  0xdb   : >> { %v1555_v55 = vsel %vm6222_vm4, %v1546_v34, %v1554_v43  ;;  %v1415_v57 = vrot.slane %v1413_v49, 6  ;;  %v1670_v11 = vrot.slane %v6680_v27, 6  ;;  %v5069_v3 = vrot.slane %v1560_v25, 10 }
  0xdc   : >> { %v5124_v14 = vcombine.low %v1545_v48, %v1555_v55  ;;  %v1403_v22 = vrot.slane %v1402_v63, 4  ;;  %v1408_v37 = vrot.slane %v1406_v26, 4  ;;  %v1668_v41 = vsel %vm6291_vm9, %v5075_v13, %v1667_v30 }
  0xdd   : >> { %v1416_v19 = vor.u32 %v1415_v57, %v1412_v7  ;;  %v1669_v40 = vrot.slane %v1667_v30, 4  ;;  %v1625_v21 = vrot.slane %v6568_v54, 6  ;;  %v1628_v44 = vrot.slane %v6697_v46, 6  ;;  %v1778_v25 = vpop.permute.xlu1 %1777 }
  0xde   : >> { %1905 = vrot.lane.b32.xlu1 %v5124_v14, %s5733_s15  ;;  %v1407_v27 = vsel %vm6222_vm4, %v1403_v22, %v1406_v26  ;;  %v5076_v20 = vrot.slane %v1567_v10, 10  ;;  %v1674_v24 = vrot.slane %v6591_v38, 6  ;;  %v1677_v31 = vrot.slane %v6716_v51, 6  ;;  %v5579_v22 = vld [vmem:[%s6092_s19 + $0x4] sm:$0xf] }
  0xdf   : >> { %v1417_v1 = vsel %vm6222_vm4, %v1408_v37, %v1416_v19  ;;  %v1671_v18 = vsel %vm6291_vm9, %v1669_v40, %v1670_v11  ;;  %v1626_v46 = vsel %vm6291_vm9, %v5069_v3, %v1625_v21  ;;  %v1627_v16 = vrot.slane %v1625_v21, 4  ;;  %v5577_v11 = vld [vmem:[%s6092_s19 + $0x4c] sm:$0xf]  ;;  %v5578_v3 = vld [vmem:[%s6092_s19 + $0x48] sm:$0xf] }
  0xe0   : >> { %v5118_v59 = vcombine.low %v1407_v27, %v1417_v1  ;;  %v5135_v29 = vcombine.low %v1668_v41, %v1671_v18  ;;  %v1675_v12 = vsel %vm6291_vm9, %v5076_v20, %v1674_v24  ;;  %v1676_v17 = vrot.slane %v1674_v24, 4  ;;  %v5580_v37 = vld [vmem:[%s6092_s19] sm:$0xf]  ;;  %v5581_v19 = vld [vmem:[%s6092_s19 + $0x58] sm:$0xf] }
  0xe1   : >> { %v1629_v51 = vsel %vm6291_vm9, %v1627_v16, %v1628_v44  ;;  %v5070_v28 = vrot.slane %v1561_v62, 10  ;;  %v1632_v34 = vrot.slane %v6617_v2, 6  ;;  %v1635_v60 = vrot.slane %v6733_v58, 6  ;;  %v5582_v40 = vld [vmem:[%s6092_s19 + $0x54] sm:$0xf] }
  0xe2   : >> { %1893 = vrot.lane.b32.xlu0 %v5118_v59, %s5733_s15  ;;  %1963 = vrot.lane.b32.xlu1 %v5135_v29, %s5734_s18  ;;  %v5129_v33 = vcombine.low %v1626_v46, %v1629_v51  ;;  %v1678_v39 = vsel %vm6291_vm9, %v1676_v17, %v1677_v31  ;;  %v1776_v63 = vpop.permute.xlu0 %1775  ;;  %v5087_v7 = vcombine.low %v6535_v23, %v6544_v45  ;;  %v5583_v24 = vld [vmem:[%s6092_s19 + $0x10] sm:$0xf]  ;;  %v5584_v31 = vld [vmem:[%s6092_s19 + $0xc] sm:$0xf] }
  0xe3   : >> { %v5136_v48 = vcombine.low %v1675_v12, %v1678_v39  ;;  %v1633_v43 = vsel %vm6291_vm9, %v5070_v28, %v1632_v34  ;;  %v1634_v49 = vrot.slane %v1632_v34, 4  ;;  %v5081_v30 = vcombine.low %v6563_v36, %v6568_v54 }
  0xe4   : >> { %v5088_v55 = vcombine.low %v6587_v61, %v6591_v38  ;;  %v5082_v57 = vcombine.low %v6608_v6, %v6617_v2  ;;  %v5083_v10 = vcombine.low %v5578_v3, %v5577_v11  ;;  %v5077_v41 = vcombine.low %v5580_v37, %v5579_v22  ;;  %v5585_v11 = vld [vmem:[%s6092_s19 + $0x60] sm:$0xf]  ;;  %v5586_v3 = vld [vmem:[%s6092_s19 + $0x64] sm:$0xf] }
  0xe5   : >> { %v1636_v13 = vsel %vm6291_vm9, %v1634_v49, %v1635_v60  ;;  %v1896_v26 = vpop.permute.xlu1 %1895  ;;  %v5084_v21 = vcombine.low %v5582_v40, %v5581_v19  ;;  %v5078_v62 = vcombine.low %v5584_v31, %v5583_v24  ;;  %v5588_v19 = vld [vmem:[%s6092_s19 + $0x70] sm:$0xf]  ;;  %v2080_v6 = vld [vmem:[#allocation4 + $0x10] sm:$0xff] }
  0xe6   : >> { %1951 = vrot.lane.b32.xlu0 %v5129_v33, %s5734_s18  ;;  %1965 = vrot.lane.b32.xlu1 %v5136_v48, %s5734_s18  ;;  %v5130_v58 = vcombine.low %v1633_v43, %v1636_v13  ;;  %v1988_v44 = vsel %vm1967_vm11, %v5083_v10, %v1776_v63  ;;  %v1970_v1 = vsel %vm1967_vm11, %v5077_v41, %v1764_v35  ;;  %v5587_v41 = vld [vmem:[%s6092_s19 + $0x6c] sm:$0xf] }
  0xe7   : >> { %v2017_v20 = vsel %vm769_vm2, %v1988_v44, %v6710_v15  ;;  %v1991_v18 = vsel %vm1967_vm11, %v5084_v21, %v1778_v25  ;;  %v2005_v12 = vsel %vm769_vm2, %v1970_v1, %v6728_v5  ;;  %v1973_v17 = vsel %vm1967_vm11, %v5078_v62, %v6761_v4  ;;  %v5589_v44 = vld [vmem:[%s6092_s19 + $0x18] sm:$0xf] }
  0xe8   : >> { %v2042_v46 = vsel %vm2028_vm12, %v2017_v20, %v1896_v26  ;;  %v2019_v15 = vsel %vm769_vm2, %v1991_v18, %v6742_v42  ;;  %v2007_v5 = vsel %vm769_vm2, %v1973_v17, %v6753_v50  ;;  %v5085_v10 = vcombine.low %v5585_v11, %v5586_v3 }
  0xe9   : >> { %v1884_v14 = vpop.permute.xlu0 %1883  ;;  %v5086_v40 = vcombine.low %v5587_v41, %v5588_v19 }
  0xea   : >> { %1953 = vrot.lane.b32.xlu0 %v5130_v58, %s5734_s18  ;;  %v2030_v35 = vsel %vm2028_vm12, %v2005_v12, %v1884_v14 }
  0xee   : >> { %v1898_v27 = vpop.permute.xlu1 %1897 }
  0xef   : >> { %v2044_v51 = vsel %vm2028_vm12, %v2019_v15, %v1898_v27  ;;  %v5590_v27 = vld [vmem:[%s6092_s19 + $0x1c] sm:$0xf] }
  0xf0   : >> { %v5079_v20 = vcombine.low %v5589_v44, %v5590_v27  ;;  %v2092_v44 = vld [vmem:[#allocation4 + $0x70] sm:$0xff] }
  0xf2   : >> { %v1886_v16 = vpop.permute.xlu0 %1885  ;;  %v1956_v59 = vpop.permute.xlu1 %1955 }
  0xf3   : >> { %v2067_v29 = vsel %vm2053_vm14, %v2042_v46, %v1956_v59  ;;  %v2032_v42 = vsel %vm2028_vm12, %v2007_v5, %v1886_v16  ;;  %v5080_v59 = vcombine.low %v6372_v47, %v6383_v8 }
  0xf4   : >> { %5395 = vmatprep.mubr.msk.bf16.mxu1 %vm2145_vm15, %v2067_v29 }
  0xf6   : >> { %v1944_v28 = vpop.permute.xlu0 %1943  ;;  %v1958_v34 = vpop.permute.xlu1 %1957 }
  0xf7   : >> { %v2055_v60 = vsel %vm2053_vm14, %v2030_v35, %v1944_v28  ;;  %v2069_v33 = vsel %vm2053_vm14, %v2044_v51, %v1958_v34 }
  0xf8   : >> { %5383 = vmatprep.mubr.msk.bf16.mxu0 %vm2145_vm15, %v2055_v60  ;;  %5396 = vmatmul.mubr.msk.bf16.vlgmr.msra.gmra.mxu1 %vm2145_vm15, %v2069_v33 }
  0xfa   : >> { %v1946_v4 = vpop.permute.xlu0 %1945 }
  0xfb   : >> { %v2057_v39 = vsel %vm2053_vm14, %v2032_v42, %v1946_v4 }
  0xfc   : >> { %5384 = vmatmul.mubr.msk.bf16.vlgmr.msra.gmra.mxu0 %vm2145_vm15, %v2057_v39 }
  0xff   : >> { %v1780_v25 = vpop.permute.xlu1 %1779 }
 0x100   : >> { %v1994_v37 = vsel %vm1967_vm11, %v5085_v10, %v1780_v25 }
 0x102   : >> { %v1768_v48 = vpop.permute.xlu0 %1767 }
 0x103   : >> { %v1976_v46 = vsel %vm1967_vm11, %v5079_v20, %v1768_v48  ;;  %v2090_v20 = vld [vmem:[#allocation4 + $0x60] sm:$0xff] }
 0x107   : >> { %v1782_v43 = vpop.permute.xlu1 %1781 }
 0x108   : >> { %v1997_v18 = vsel %vm1967_vm11, %v5086_v40, %v1782_v43 }
 0x10b   : >> { %v1770_v49 = vpop.permute.xlu0 %1769  ;;  %v1840_v13 = vpop.permute.xlu1 %1839 }
 0x10c   : >> { %v2021_v21 = vsel %vm769_vm2, %v1994_v37, %v1840_v13  ;;  %v1979_v34 = vsel %vm1967_vm11, %v5080_v59, %v1770_v49 }
 0x10f   : >> { %v1828_v58 = vpop.permute.xlu0 %1827  ;;  %v1842_v63 = vpop.permute.xlu1 %1841 }
 0x110   : >> { %v2023_v16 = vsel %vm769_vm2, %v1997_v18, %v1842_v63  ;;  %v2009_v29 = vsel %vm769_vm2, %v1976_v46, %v1828_v58  ;;  %v2091_v46 = vld [vmem:[#allocation4 + $0x68] sm:$0xff] }
 0x113   : >> { %v1830_v26 = vpop.permute.xlu0 %1829 }
 0x114   : >> { %v2011_v47 = vsel %vm769_vm2, %v1979_v34, %v1830_v26 }
 0x116   : >> { %v1900_v50 = vpop.permute.xlu1 %1899 }
 0x117   : >> { %v2046_v24 = vsel %vm2028_vm12, %v2021_v21, %v1900_v50 }
 0x119   : >> { %v1888_v14 = vpop.permute.xlu0 %1887 }
 0x11a   : >> { %v2034_v17 = vsel %vm2028_vm12, %v2009_v29, %v1888_v14 }
 0x11e   : >> { %v1902_v22 = vpop.permute.xlu1 %1901 }
 0x11f   : >> { %v2048_v12 = vsel %vm2028_vm12, %v2023_v16, %v1902_v22 }
 0x122   : >> { %v1960_v31 = vpop.permute.xlu1 %1959 }
 0x123   : >> { %v1890_v62 = vpop.permute.xlu0 %1889  ;;  %v2071_v1 = vsel %vm2053_vm14, %v2046_v24, %v1960_v31 }
 0x124   : >> { %5399 = vmatprep.mubr.msk.bf16.mxu1 %vm2145_vm15, %v2071_v1  ;;  %v2036_v8 = vsel %vm2028_vm12, %v2011_v47, %v1890_v62  ;;  %v2078_v1 = vld [vmem:[#allocation4] sm:$0xff] }
 0x126   : >> { %v1962_v15 = vpop.permute.xlu1 %1961 }
 0x127   : >> { %v1948_v35 = vpop.permute.xlu0 %1947  ;;  %v2073_v51 = vsel %vm2053_vm14, %v2048_v12, %v1962_v15  ;;  %v2081_v12 = vld [vmem:[#allocation4 + $0x18] sm:$0xff] }
 0x128   : >> { %v2059_v28 = vsel %vm2053_vm14, %v2034_v17, %v1948_v35  ;;  %5400 = vmatmul.mubr.msk.bf16.gmra.mxu1 %vm2145_vm15, %v2073_v51 }
 0x129   : >> { %5387 = vmatprep.mubr.msk.bf16.mxu0 %vm2145_vm15, %v2059_v28  ;;  %v2079_v28 = vld [vmem:[#allocation4 + $0x8] sm:$0xff] }
 0x12b   : >> { %v1950_v60 = vpop.permute.xlu0 %1949 }
 0x12c   : >> { %v2061_v33 = vsel %vm2053_vm14, %v2036_v8, %v1950_v60  ;;  %v2096_v60 = vld [vmem:[#allocation4 + $0x90] sm:$0xff] }
 0x12d   : >> { %5388 = vmatmul.mubr.msk.bf16.gmra.mxu0 %vm2145_vm15, %v2061_v33 }
 0x130   : >> { %v1784_v5 = vpop.permute.xlu1 %1783 }
 0x131   : >> { %v2000_v26 = vsel %vm1967_vm11, %v5087_v7, %v1784_v5  ;;  %v2094_v5 = vld [vmem:[#allocation4 + $0x80] sm:$0xff] }
 0x133   : >> { %v1772_v42 = vpop.permute.xlu0 %1771 }
 0x134   : >> { %v1982_v22 = vsel %vm1967_vm11, %v5081_v30, %v1772_v42 }
 0x138   : >> { %v1786_v4 = vpop.permute.xlu1 %1785 }
 0x139   : >> { %v2003_v23 = vsel %vm1967_vm11, %v5088_v55, %v1786_v4 }
 0x13b   : >> { %v1774_v39 = vpop.permute.xlu0 %1773 }
 0x13c   : >> { %v1844_v25 = vpop.permute.xlu1 %1843  ;;  %v1985_v61 = vsel %vm1967_vm11, %v5082_v57, %v1774_v39  ;;  %v2093_v57 = vld [vmem:[#allocation4 + $0x78] sm:$0xff] }
 0x13d   : >> { %v2025_v50 = vsel %vm769_vm2, %v2000_v26, %v1844_v25  ;;  %v2097_v39 = vld [vmem:[#allocation4 + $0x98] sm:$0xff]  ;;  %v2084_v25 = vld [vmem:[#allocation4 + $0x30] sm:$0xff] }
 0x13f   : >> { %v1832_v48 = vpop.permute.xlu0 %1831 }
 0x140   : >> { %v1846_v43 = vpop.permute.xlu1 %1845  ;;  %v2013_v45 = vsel %vm769_vm2, %v1982_v22, %v1832_v48 }
 0x141   : >> { %v2027_v7 = vsel %vm769_vm2, %v2003_v23, %v1846_v43  ;;  %v2083_v23 = vld [vmem:[#allocation4 + $0x28] sm:$0xff] }
 0x143   : >> { %v1834_v13 = vpop.permute.xlu0 %1833 }
 0x144   : >> { %v2015_v38 = vsel %vm769_vm2, %v1985_v61, %v1834_v13  ;;  %v2095_v13 = vld [vmem:[#allocation4 + $0x88] sm:$0xff] }
 0x147   : >> { %v1904_v49 = vpop.permute.xlu1 %1903 }
 0x148   : >> { %v2050_v11 = vsel %vm2028_vm12, %v2025_v50, %v1904_v49 }
 0x14b   : >> { %v1892_v58 = vpop.permute.xlu0 %1891 }
 0x14c   : >> { %v2038_v37 = vsel %vm2028_vm12, %v2013_v45, %v1892_v58  ;;  %v2082_v58 = vld [vmem:[#allocation4 + $0x20] sm:$0xff] }
 0x150   : >> { %v1906_v63 = vpop.permute.xlu1 %1905 }
 0x151   : >> { %v2052_v41 = vsel %vm2028_vm12, %v2027_v7, %v1906_v63 }
 0x154   : >> { %v1894_v3 = vpop.permute.xlu0 %1893  ;;  %v1964_v10 = vpop.permute.xlu1 %1963 }
 0x155   : >> { %v2075_v14 = vsel %vm2053_vm14, %v2050_v11, %v1964_v10  ;;  %v2040_v30 = vsel %vm2028_vm12, %v2015_v38, %v1894_v3  ;;  %v2085_v3 = vld [vmem:[#allocation4 + $0x38] sm:$0xff] }
 0x156   : >> { %5403 = vmatprep.mubr.msk.bf16.mxu1 %vm2145_vm15, %v2075_v14  ;;  %v2101_v38 = vld [vmem:[#allocation4 + $0xb8] sm:$0xff] }
 0x158   : >> { %v1952_v19 = vpop.permute.xlu0 %1951  ;;  %v1966_v40 = vpop.permute.xlu1 %1965 }
 0x159   : >> { %v2063_v36 = vsel %vm2053_vm14, %v2038_v37, %v1952_v19  ;;  %v2077_v54 = vsel %vm2053_vm14, %v2052_v41, %v1966_v40  ;;  %v2100_v41 = vld [vmem:[#allocation4 + $0xb0] sm:$0xff]  ;;  %v2098_v40 = vld [vmem:[#allocation4 + $0xa0] sm:$0xff] }
 0x15a   : >> { %5391 = vmatprep.mubr.msk.bf16.mxu0 %vm2145_vm15, %v2063_v36  ;;  %5404 = vmatmul.mubr.msk.bf16.gmra.mxu1 %vm2145_vm15, %v2077_v54  ;;  %v2088_v54 = vld [vmem:[#allocation4 + $0x50] sm:$0xff] }
 0x15c   : >> { %v1954_v55 = vpop.permute.xlu0 %1953 }
 0x15d   : >> { %v2065_v21 = vsel %vm2053_vm14, %v2040_v30, %v1954_v55 }
 0x15e   : >> { %5392 = vmatmul.mubr.msk.bf16.gmra.mxu0 %vm2145_vm15, %v2065_v21  ;;  %v2086_v21 = vld [vmem:[#allocation4 + $0x40] sm:$0xff] }
 0x1b8   : >> { %v5397_v27 = vpop.f32.mrf.mxu1 }
 0x1b9   : >> { %v2313_v24 = vadd.f32 %v5397_v27, %v2092_v44  ;;  %v2099_v27 = vld [vmem:[#allocation4 + $0xa8] sm:$0xff] }
 0x1ba   : >> { %v2252_v2 = vpop.f32.mrf.mxu1 }
 0x1bb   : >> { %2337 = vst.msk [vmem:[#allocation4 + $0x70] sm:$0xff] %vm769_vm2, %v2313_v24  ;;  %v2311_v31 = vadd.f32 %v2252_v2, %v2090_v20  ;;  %v2089_v2 = vld [vmem:[#allocation4 + $0x58] sm:$0xff] }
 0x1bc   : >> { %v5385_v62 = vpop.f32.mrf.mxu0  ;;  %v5398_v18 = vpop.f32.mrf.mxu1 }
 0x1bd   : >> { %v2301_v16 = vadd.f32 %v5385_v62, %v2080_v6  ;;  %2335 = vst.msk [vmem:[#allocation4 + $0x60] sm:$0xff] %vm769_vm2, %v2311_v31  ;;  %v2314_v59 = vadd.f32 %v5398_v18, %v2093_v57  ;;  %v2087_v18 = vld [vmem:[#allocation4 + $0x48] sm:$0xff] }
 0x1be   : >> { %v2204_v29 = vpop.f32.mrf.mxu0  ;;  %v2255_v15 = vpop.f32.mrf.mxu1 }
 0x1bf   : >> { %2325 = vst.msk [vmem:[#allocation4 + $0x10] sm:$0xff] %vm769_vm2, %v2301_v16  ;;  %v2299_v17 = vadd.f32 %v2204_v29, %v2078_v1  ;;  %2338 = vst.msk [vmem:[#allocation4 + $0x78] sm:$0xff] %vm769_vm2, %v2314_v59  ;;  %v2312_v35 = vadd.f32 %v2255_v15, %v2091_v46 }
 0x1c0   : >> { %v5386_v51 = vpop.f32.mrf.mxu0 }
 0x1c1   : >> { %2323 = vst.msk [vmem:[#allocation4] sm:$0xff] %vm769_vm2, %v2299_v17  ;;  %v2302_v34 = vadd.f32 %v5386_v51, %v2081_v12  ;;  %2336 = vst.msk [vmem:[#allocation4 + $0x68] sm:$0xff] %vm769_vm2, %v2312_v35 }
 0x1c2   : >> { %v2207_v47 = vpop.f32.mrf.mxu0 }
 0x1c3   : >> { %2326 = vst.msk [vmem:[#allocation4 + $0x18] sm:$0xff] %vm769_vm2, %v2302_v34  ;;  %v2300_v8 = vadd.f32 %v2207_v47, %v2079_v28 }
 0x1c5   : >> { %2324 = vst.msk [vmem:[#allocation4 + $0x8] sm:$0xff] %vm769_vm2, %v2300_v8 }
 0x1c6   : > { %v2373_v15 = vld [vmem:[#allocation4 + $0x10] sm:$0xff] (%p796_p7) }
 0x1c7   : > { %v5300_v51 = vpack.c.bf16 (%p796_p7), %v2373_v15, %v2373_v15 }
 0x1c8   : > { %v2371_v29 = vld [vmem:[#allocation4] sm:$0xff] (%p796_p7) }
 0x1c9   : > { %v5298_v17 = vpack.c.bf16 (%p796_p7), %v2371_v29, %v2371_v29 }
 0x1ca   : > { %v2374_v28 = vld [vmem:[#allocation4 + $0x18] sm:$0xff] (%p796_p7) }
 0x1cb   : > { %v5301_v8 = vpack.c.bf16 (%p796_p7), %v2374_v28, %v2374_v28 }
 0x1cc   : > { %v2372_v12 = vld [vmem:[#allocation4 + $0x8] sm:$0xff] (%p796_p7) }
 0x1cd   : > { %v5299_v35 = vpack.c.bf16 (%p796_p7), %v2372_v12, %v2372_v12 }
 0x1e8   : >> { %v5401_v33 = vpop.f32.mrf.mxu1 }
 0x1e9   : >> { %v2317_v42 = vadd.f32 %v5401_v33, %v2096_v60 }
 0x1ea   : >> { %v2268_v4 = vpop.f32.mrf.mxu1 }
 0x1eb   : >> { %2341 = vst.msk [vmem:[#allocation4 + $0x90] sm:$0xff] %vm769_vm2, %v2317_v42  ;;  %v2315_v48 = vadd.f32 %v2268_v4, %v2094_v5  ;;  %v2467_v4 = vrot.slane (%p796_p7), %v5298_v17, 7 }
 0x1ec   : >> { %v5402_v43 = vpop.f32.mrf.mxu1 }
 0x1ed   : >> { %v5389_v49 = vpop.f32.mrf.mxu0  ;;  %2339 = vst.msk [vmem:[#allocation4 + $0x80] sm:$0xff] %vm769_vm2, %v2315_v48  ;;  %v2318_v63 = vadd.f32 %v5402_v43, %v2097_v39  ;;  %v2469_v39 = vrot.slane (%p796_p7), %v5299_v35, 7  ;;  %v2474_v43 = vrot.slane (%p796_p7), %v5301_v8, 7 }
 0x1ee   : >> { %v2305_v26 = vadd.f32 %v5389_v49, %v2084_v25  ;;  %v2271_v50 = vpop.f32.mrf.mxu1  ;;  %v2472_v25 = vrot.slane (%p796_p7), %v5300_v51, 7  ;;  %2563 = vst.msk [vmem:[#allocation3] sm:$0xe] (%p796_p7), %vm712_vm3, %v2467_v4 }
 0x1ef   : >> { %v2220_v11 = vpop.f32.mrf.mxu0  ;;  %2342 = vst.msk [vmem:[#allocation4 + $0x98] sm:$0xff] %vm769_vm2, %v2318_v63  ;;  %v2316_v10 = vadd.f32 %v2271_v50, %v2095_v13  ;;  %v2468_v63 = vrot.slane (%p796_p7), %v2467_v4, 4 }
 0x1f0   : >> { %2329 = vst.msk [vmem:[#allocation4 + $0x30] sm:$0xff] %vm769_vm2, %v2305_v26  ;;  %v2303_v14 = vadd.f32 %v2220_v11, %v2082_v58  ;;  %v2471_v26 = vrot.slane (%p796_p7), %v2469_v39, 4  ;;  %v2473_v50 = vrot.slane (%p796_p7), %v2472_v25, 4 }
 0x1f1   : >> { %v5390_v22 = vpop.f32.mrf.mxu0  ;;  %2340 = vst.msk [vmem:[#allocation4 + $0x88] sm:$0xff] %vm769_vm2, %v2316_v10 }
 0x1f2   : >> { %2327 = vst.msk [vmem:[#allocation4 + $0x20] sm:$0xff] %vm769_vm2, %v2303_v14  ;;  %v2306_v45 = vadd.f32 %v5390_v22, %v2085_v3  ;;  %v2476_v14 = vrot.slane (%p796_p7), %v2474_v43, 4  ;;  %v2389_v51 = vld [vmem:[#allocation4 + $0x90] sm:$0xff] (%p796_p7) }
 0x1f3   : >> { %v2223_v7 = vpop.f32.mrf.mxu0  ;;  %2566 = vst.msk [vmem:[#allocation3 + $0xc] sm:$0xe] (%p796_p7), %vm712_vm3, %v2472_v25 }
 0x1f4   : >> { %2330 = vst.msk [vmem:[#allocation4 + $0x38] sm:$0xff] %vm769_vm2, %v2306_v45  ;;  %v2304_v37 = vadd.f32 %v2223_v7, %v2083_v23 }
 0x1f5   : > { %2565 = vst.msk [vmem:[#allocation3 + $0x8] sm:$0x1] (%p796_p7), %vm479_vm0, %v2471_v26  ;;  %2568 = vst.msk [vmem:[#allocation3 + $0x14] sm:$0x1] (%p796_p7), %vm479_vm0, %v2476_v14 }
 0x1f6   : >> { %2328 = vst.msk [vmem:[#allocation4 + $0x28] sm:$0xff] %vm769_vm2, %v2304_v37  ;;  %v2383_v37 = vld [vmem:[#allocation4 + $0x60] sm:$0xff] (%p796_p7) }
 0x1f7   : > { %v2377_v5 = vld [vmem:[#allocation4 + $0x30] sm:$0xff] (%p796_p7) }
 0x1f8   : > { %v5304_v48 = vpack.c.bf16 (%p796_p7), %v2377_v5, %v2377_v5  ;;  %v2388_v35 = vld [vmem:[#allocation4 + $0x88] sm:$0xff] (%p796_p7) }
 0x1f9   : > { %v2375_v34 = vld [vmem:[#allocation4 + $0x20] sm:$0xff] (%p796_p7) }
 0x1fa   : > { %v5302_v60 = vpack.c.bf16 (%p796_p7), %v2375_v34, %v2375_v34  ;;  %v2482_v11 = vrot.slane (%p796_p7), %v5304_v48, 7 }
 0x1fb   : > { %v2378_v42 = vld [vmem:[#allocation4 + $0x38] sm:$0xff] (%p796_p7) }
 0x1fc   : > { %v2477_v0 = vrot.slane (%p796_p7), %v5302_v60, 7  ;;  %v5305_v49 = vpack.c.bf16 (%p796_p7), %v2378_v42, %v2378_v42  ;;  %2572 = vst.msk [vmem:[#allocation3 + $0x24] sm:$0xe] (%p796_p7), %vm712_vm3, %v2482_v11  ;;  %v2390_v60 = vld [vmem:[#allocation4 + $0x98] sm:$0xff] (%p796_p7) }
 0x1fd   : > { %v2376_v47 = vld [vmem:[#allocation4 + $0x28] sm:$0xff] (%p796_p7) }
 0x1fe   : > { %v5303_v33 = vpack.c.bf16 (%p796_p7), %v2376_v47, %v2376_v47  ;;  %2569 = vst.msk [vmem:[#allocation3 + $0x18] sm:$0xe] (%p796_p7), %vm712_vm3, %v2477_v0  ;;  %v2478_v22 = vrot.slane (%p796_p7), %v2477_v0, 4  ;;  %v2484_v45 = vrot.slane (%p796_p7), %v5305_v49, 7  ;;  %v5316_v49 = vpack.c.bf16 (%p796_p7), %v2389_v51, %v2389_v51 }
 0x200   : > { %v2479_v13 = vrot.slane (%p796_p7), %v5303_v33, 7 }
 0x202   : > { %v2481_v23 = vrot.slane (%p796_p7), %v2479_v13, 4 }
 0x204   : > { %2571 = vst.msk [vmem:[#allocation3 + $0x20] sm:$0x1] (%p796_p7), %vm479_vm0, %v2481_v23 }
 0x21a   : >> { %v5405_v19 = vpop.f32.mrf.mxu1 }
 0x21b   : >> { %v2321_v36 = vadd.f32 %v5405_v19, %v2100_v41  ;;  %v2470_v41 = vsel (%p796_p7), %vm5970_vm6, %v2468_v63, %v2469_v39  ;;  %v2475_v19 = vsel (%p796_p7), %vm5970_vm6, %v2473_v50, %v2474_v43  ;;  %v5317_v50 = vpack.c.bf16 (%p796_p7), %v2390_v60, %v2390_v60 }
 0x21c   : >> { %v2284_v61 = vpop.f32.mrf.mxu1  ;;  %2564 = vst.msk [vmem:[#allocation3 + $0x4] sm:$0xf] (%p796_p7), %vm714_vm7, %v2470_v41  ;;  %2567 = vst.msk [vmem:[#allocation3 + $0x10] sm:$0xf] (%p796_p7), %vm714_vm7, %v2475_v19 }
 0x21d   : >> { %2345 = vst.msk [vmem:[#allocation4 + $0xb0] sm:$0xff] %vm769_vm2, %v2321_v36  ;;  %v2319_v30 = vadd.f32 %v2284_v61, %v2098_v40  ;;  %v2483_v40 = vrot.slane (%p796_p7), %v2482_v11, 4  ;;  %v2385_v61 = vld [vmem:[#allocation4 + $0x70] sm:$0xff] (%p796_p7) }
 0x21e   : >> { %v5393_v55 = vpop.f32.mrf.mxu0  ;;  %v5406_v44 = vpop.f32.mrf.mxu1 }
 0x21f   : >> { %v2309_v20 = vadd.f32 %v5393_v55, %v2088_v54  ;;  %2343 = vst.msk [vmem:[#allocation4 + $0xa0] sm:$0xff] %vm769_vm2, %v2319_v30  ;;  %v2322_v24 = vadd.f32 %v5406_v44, %v2101_v38  ;;  %v2384_v54 = vld [vmem:[#allocation4 + $0x68] sm:$0xff] (%p796_p7)  ;;  %v2480_v38 = vsel (%p796_p7), %vm5970_vm6, %v2478_v22, %v2479_v13  ;;  %v2486_v30 = vrot.slane (%p796_p7), %v2484_v45, 4  ;;  %v2386_v44 = vld [vmem:[#allocation4 + $0x78] sm:$0xff] (%p796_p7) }
 0x220   : >> { %v2236_v6 = vpop.f32.mrf.mxu0  ;;  %v2287_v57 = vpop.f32.mrf.mxu1  ;;  %2570 = vst.msk [vmem:[#allocation3 + $0x1c] sm:$0xf] (%p796_p7), %vm714_vm7, %v2480_v38  ;;  %v5315_v13 = vpack.c.bf16 (%p796_p7), %v2388_v35, %v2388_v35 }
 0x221   : >> { %2333 = vst.msk [vmem:[#allocation4 + $0x50] sm:$0xff] %vm769_vm2, %v2309_v20  ;;  %v2307_v31 = vadd.f32 %v2236_v6, %v2086_v21  ;;  %2346 = vst.msk [vmem:[#allocation4 + $0xb8] sm:$0xff] %vm769_vm2, %v2322_v24  ;;  %v2320_v62 = vadd.f32 %v2287_v57, %v2099_v27  ;;  %v2485_v27 = vsel (%p796_p7), %vm5970_vm6, %v2483_v40, %v2484_v45  ;;  %v2514_v45 = vrot.slane (%p796_p7), %v5317_v50, 7 }
 0x222   : >> { %v5394_v1 = vpop.f32.mrf.mxu0  ;;  %v5310_v6 = vpack.c.bf16 (%p796_p7), %v2383_v37, %v2383_v37  ;;  %2573 = vst.msk [vmem:[#allocation3 + $0x28] sm:$0xf] (%p796_p7), %vm714_vm7, %v2485_v27 }
 0x223   : >> { %2331 = vst.msk [vmem:[#allocation4 + $0x40] sm:$0xff] %vm769_vm2, %v2307_v31  ;;  %v2310_v46 = vadd.f32 %v5394_v1, %v2089_v2  ;;  %2344 = vst.msk [vmem:[#allocation4 + $0xa8] sm:$0xff] %vm769_vm2, %v2320_v62  ;;  %798 = sbr.rel (!%p796_p7) target bundleno = 73 (0x49), region = 129  ;;  %v5311_v31 = vpack.c.bf16 (%p796_p7), %v2384_v54, %v2384_v54  ;;  %v5312_v62 = vpack.c.bf16 (%p796_p7), %v2385_v61, %v2385_v61  ;;  %v2516_v61 = vrot.slane (%p796_p7), %v2514_v45, 4 }
 0x224   : >> { %v2239_v16 = vpop.f32.mrf.mxu0  ;;  %2574 = vst.msk [vmem:[#allocation3 + $0x2c] sm:$0x1] (%p796_p7), %vm479_vm0, %v2486_v30  ;;  %v2393_v48 = vld [vmem:[#allocation4 + $0xb0] sm:$0xff] (%p796_p7) }
 0x225   : >> { %2334 = vst.msk [vmem:[#allocation4 + $0x58] sm:$0xff] %vm769_vm2, %v2310_v46  ;;  %v2308_v59 = vadd.f32 %v2239_v16, %v2087_v18  ;;  %v2497_v46 = vrot.slane (%p796_p7), %v5310_v6, 7  ;;  %v5313_v16 = vpack.c.bf16 (%p796_p7), %v2386_v44, %v2386_v44  ;;  %v2499_v15 = vrot.slane (%p796_p7), %v5311_v31, 7 }
 0x226   : > { %v2502_v17 = vrot.slane (%p796_p7), %v5312_v62, 7  ;;  %v2391_v33 = vld [vmem:[#allocation4 + $0xa0] sm:$0xff] (%p796_p7)  ;;  %v5320_v22 = vpack.c.bf16 (%p796_p7), %v2393_v48, %v2393_v48  ;;  %2592 = vst.msk [vmem:[#allocation3 + $0x74] sm:$0x1] (%p796_p7), %vm479_vm0, %v2516_v61 }
 0x227   : >> { %2332 = vst.msk [vmem:[#allocation4 + $0x48] sm:$0xff] %vm769_vm2, %v2308_v59  ;;  %v2387_v59 = vld [vmem:[#allocation4 + $0x80] sm:$0xff] (%p796_p7)  ;;  %v2498_v47 = vrot.slane (%p796_p7), %v2497_v46, 4  ;;  %v2504_v8 = vrot.slane (%p796_p7), %v5313_v16, 7  ;;  %v2501_v42 = vrot.slane (%p796_p7), %v2499_v15, 4  ;;  %v5318_v11 = vpack.c.bf16 (%p796_p7), %v2391_v33, %v2391_v33 }
 0x228   : > { %v2381_v10 = vld [vmem:[#allocation4 + $0x50] sm:$0xff]  ;;  %2581 = vst.msk [vmem:[#allocation3 + $0x48] sm:$0xe] %vm712_vm3, %v2497_v46  ;;  %2584 = vst.msk [vmem:[#allocation3 + $0x54] sm:$0xe] %vm712_vm3, %v2502_v17  ;;  %v2503_v4 = vrot.slane %v2502_v17, 4  ;;  %v5314_v39 = vpack.c.bf16 %v2387_v59, %v2387_v59 }
 0x229   : > { %v5308_v21 = vpack.c.bf16 %v2381_v10, %v2381_v10  ;;  %v2500_v43 = vsel %vm5970_vm6, %v2498_v47, %v2499_v15  ;;  %v2506_v0 = vrot.slane %v2504_v8, 4  ;;  %2583 = vst.msk [vmem:[#allocation3 + $0x50] sm:$0x1] %vm479_vm0, %v2501_v42  ;;  %v2512_v10 = vrot.slane %v5316_v49, 7 }
 0x22a   : > { %v2379_v58 = vld [vmem:[#allocation4 + $0x40] sm:$0xff]  ;;  %v2392_v25 = vld [vmem:[#allocation4 + $0xa8] sm:$0xff]  ;;  %2582 = vst.msk [vmem:[#allocation3 + $0x4c] sm:$0xf] %vm714_vm7, %v2500_v43  ;;  %v2505_v63 = vsel %vm5970_vm6, %v2503_v4, %v2504_v8  ;;  %v2507_v26 = vrot.slane %v5314_v39, 7 }
 0x22b   : > { %v5306_v36 = vpack.c.bf16 %v2379_v58, %v2379_v58  ;;  %v2492_v57 = vrot.slane %v5308_v21, 7  ;;  %v2394_v58 = vld [vmem:[#allocation4 + $0xb8] sm:$0xff]  ;;  %2585 = vst.msk [vmem:[#allocation3 + $0x58] sm:$0xf] %vm714_vm7, %v2505_v63  ;;  %v5319_v14 = vpack.c.bf16 %v2392_v25, %v2392_v25  ;;  %v2513_v19 = vrot.slane %v2512_v10, 4 }
 0x22c   : > { %v2382_v7 = vld [vmem:[#allocation4 + $0x58] sm:$0xff]  ;;  %2586 = vst.msk [vmem:[#allocation3 + $0x5c] sm:$0x1] %vm479_vm0, %v2506_v0  ;;  %v2508_v23 = vrot.slane %v2507_v26, 4  ;;  %v5321_v37 = vpack.c.bf16 %v2394_v58, %v2394_v58 }
 0x22d   : > { %v2487_v20 = vrot.slane %v5306_v36, 7  ;;  %v5309_v24 = vpack.c.bf16 %v2382_v7, %v2382_v7  ;;  %2578 = vst.msk [vmem:[#allocation3 + $0x3c] sm:$0xe] %vm712_vm3, %v2492_v57  ;;  %v2493_v12 = vrot.slane %v2492_v57, 4  ;;  %2587 = vst.msk [vmem:[#allocation3 + $0x60] sm:$0xe] %vm712_vm3, %v2507_v26 }
 0x22e   : > { %v2380_v3 = vld [vmem:[#allocation4 + $0x48] sm:$0xff]  ;;  %v2517_v7 = vrot.slane %v5318_v11, 7  ;;  %2590 = vst.msk [vmem:[#allocation3 + $0x6c] sm:$0xe] %vm712_vm3, %v2512_v10  ;;  %v2519_v40 = vrot.slane %v5319_v14, 7  ;;  %v2522_v36 = vrot.slane %v5320_v22, 7 }
 0x22f   : > { %v5307_v55 = vpack.c.bf16 %v2380_v3, %v2380_v3  ;;  %2575 = vst.msk [vmem:[#allocation3 + $0x30] sm:$0xe] %vm712_vm3, %v2487_v20  ;;  %v2488_v1 = vrot.slane %v2487_v20, 4  ;;  %v2494_v18 = vrot.slane %v5309_v24, 7  ;;  %v2509_v3 = vrot.slane %v5315_v13, 7 }
 0x230   : > { %2593 = vst.msk [vmem:[#allocation3 + $0x78] sm:$0xe] %vm712_vm3, %v2517_v7  ;;  %v2518_v38 = vrot.slane %v2517_v7, 4  ;;  %v2524_v30 = vrot.slane %v5321_v37, 7  ;;  %v2521_v21 = vrot.slane %v2519_v40, 4  ;;  %v2523_v44 = vrot.slane %v2522_v36, 4 }
 0x231   : > { %v2489_v2 = vrot.slane %v5307_v55, 7  ;;  %v2496_v34 = vrot.slane %v2494_v18, 4  ;;  %v2495_v5 = vsel %vm5970_vm6, %v2493_v12, %v2494_v18  ;;  %v2511_v41 = vrot.slane %v2509_v3, 4  ;;  %2596 = vst.msk [vmem:[#allocation3 + $0x84] sm:$0xe] %vm712_vm3, %v2522_v36 }
 0x232   : > { %2579 = vst.msk [vmem:[#allocation3 + $0x40] sm:$0xf] %vm714_vm7, %v2495_v5  ;;  %v2510_v54 = vsel %vm5970_vm6, %v2508_v23, %v2509_v3  ;;  %v2515_v55 = vsel %vm5970_vm6, %v2513_v19, %v2514_v45  ;;  %v2520_v27 = vsel %vm5970_vm6, %v2518_v38, %v2519_v40  ;;  %v2526_v20 = vrot.slane %v2524_v30, 4 }
 0x233   : > { %v2491_v29 = vrot.slane %v2489_v2, 4  ;;  %v2490_v28 = vsel %vm5970_vm6, %v2488_v1, %v2489_v2  ;;  %2580 = vst.msk [vmem:[#allocation3 + $0x44] sm:$0x1] %vm479_vm0, %v2496_v34  ;;  %2589 = vst.msk [vmem:[#allocation3 + $0x68] sm:$0x1] %vm479_vm0, %v2511_v41  ;;  %v2525_v24 = vsel %vm5970_vm6, %v2523_v44, %v2524_v30 }
 0x234   : > { %2576 = vst.msk [vmem:[#allocation3 + $0x34] sm:$0xf] %vm714_vm7, %v2490_v28  ;;  %2588 = vst.msk [vmem:[#allocation3 + $0x64] sm:$0xf] %vm714_vm7, %v2510_v54  ;;  %2602 = sbr.rel (%p5179_p8) target bundleno = 573 (0x23d), region = 79 }
 0x235   : > { %2577 = vst.msk [vmem:[#allocation3 + $0x38] sm:$0x1] %vm479_vm0, %v2491_v29  ;;  %2595 = vst.msk [vmem:[#allocation3 + $0x80] sm:$0x1] %vm479_vm0, %v2521_v21 }
 0x236   : > { %2591 = vst.msk [vmem:[#allocation3 + $0x70] sm:$0xf] %vm714_vm7, %v2515_v55  ;;  %2594 = vst.msk [vmem:[#allocation3 + $0x7c] sm:$0xf] %vm714_vm7, %v2520_v27 }
 0x237   : > { %2597 = vst.msk [vmem:[#allocation3 + $0x88] sm:$0xf] %vm714_vm7, %v2525_v24 }
 0x238   : > { %2598 = vst.msk [vmem:[#allocation3 + $0x8c] sm:$0x1] %vm479_vm0, %v2526_v20 }
 0x239   : > { %v5735_v6 = vmov 0  }
 0x23a   : > { %2603 = vst.msk [vmem:[#allocation3] sm:$0xe] %vm712_vm3, %v5735_v6  ;;  %2606 = vst.msk [vmem:[#allocation3 + $0xc] sm:$0xe] %vm712_vm3, %v5735_v6 }
 0x23b   : > { %2604 = vst.msk [vmem:[#allocation3 + $0x4] sm:$0xf] %vm714_vm7, %v5735_v6  ;;  %2607 = vst.msk [vmem:[#allocation3 + $0x10] sm:$0xf] %vm714_vm7, %v5735_v6 }
 0x23c   : > { %2605 = vst.msk [vmem:[#allocation3 + $0x8] sm:$0x1] %vm479_vm0, %v5735_v6  ;;  %2608 = vst.msk [vmem:[#allocation3 + $0x14] sm:$0x1] %vm479_vm0, %v5735_v6 }
 0x23d PF: > { %p5180_p9 = scmp.ne.s32.totalorder %s5704_s21, 1 }
 0x23f   : > { %2612 = sbr.rel (%p5180_p9) target bundleno = 584 (0x248), region = 83 }
 0x244   : > { %v5736_v9 = vmov 0  }
 0x245   : > { %2614 = vst.msk [vmem:[#allocation3 + $0x78] sm:$0xe] %vm712_vm3, %v5736_v9  ;;  %2617 = vst.msk [vmem:[#allocation3 + $0x84] sm:$0xe] %vm712_vm3, %v5736_v9 }
 0x246   : > { %2615 = vst.msk [vmem:[#allocation3 + $0x7c] sm:$0xf] %vm714_vm7, %v5736_v9  ;;  %2618 = vst.msk [vmem:[#allocation3 + $0x88] sm:$0xf] %vm714_vm7, %v5736_v9 }
 0x247   : > { %2616 = vst.msk [vmem:[#allocation3 + $0x80] sm:$0x1] %vm479_vm0, %v5736_v9  ;;  %2619 = vst.msk [vmem:[#allocation3 + $0x8c] sm:$0x1] %vm479_vm0, %v5736_v9 }
 0x248 PF: > { %v2622_v2 = vld [vmem:[#allocation4 + $0x30] sm:$0xff]  ;;  %v2620_v57 = vld [vmem:[#allocation4 + $0x20] sm:$0xff]  ;;  %s5737_s29 = smov 112   ;;  %v2623_v31 = vld [vmem:[#allocation4 + $0x38] sm:$0xff]  ;;  %s7060_s21 = smov 0  }
 0x249   : > { %2656 = vrot.lane.b32.xlu1 %v2622_v2, %s5737_s29  ;;  %2652 = vrot.lane.b32.xlu0 %v2620_v57, %s5737_s29  ;;  %v2621_v62 = vld [vmem:[#allocation4 + $0x28] sm:$0xff]  ;;  %v2624_v18 = vld [vmem:[#allocation4 + $0x40] sm:$0xff]  ;;  %v2627_v46 = vld [vmem:[#allocation4 + $0x58] sm:$0xff] }
 0x24a   : > { %v2625_v1 = vld [vmem:[#allocation4 + $0x48] sm:$0xff]  ;;  %v2626_v16 = vld [vmem:[#allocation4 + $0x50] sm:$0xff]  ;;  %v2628_v29 = vld [vmem:[#allocation4 + $0x60] sm:$0xff] }
 0x24b   : > { %v2629_v59 = vld [vmem:[#allocation4 + $0x68] sm:$0xff]  ;;  %v2631_v12 = vld [vmem:[#allocation4 + $0x78] sm:$0xff]  ;;  %v2630_v15 = vld [vmem:[#allocation4 + $0x70] sm:$0xff] }
 0x24c   : > { %v2633_v17 = vld [vmem:[#allocation4 + $0x88] sm:$0xff]  ;;  %v2632_v35 = vld [vmem:[#allocation4 + $0x80] sm:$0xff]  ;;  %v2635_v51 = vld [vmem:[#allocation4 + $0x98] sm:$0xff] }
 0x24d   : > { %2658 = vrot.lane.b32.xlu1 %v2623_v31, %s5737_s29  ;;  %2654 = vrot.lane.b32.xlu0 %v2621_v62, %s5737_s29  ;;  %v2634_v28 = vld [vmem:[#allocation4 + $0x90] sm:$0xff] }
 0x251   : > { %2662 = vrot.lane.b32.xlu1 %v2625_v1, %s5737_s29  ;;  %2660 = vrot.lane.b32.xlu0 %v2624_v18, %s5737_s29 }
 0x255   : > { %2666 = vrot.lane.b32.xlu1 %v2627_v46, %s5737_s29  ;;  %2664 = vrot.lane.b32.xlu0 %v2626_v16, %s5737_s29 }
 0x259   : > { %2670 = vrot.lane.b32.xlu1 %v2629_v59, %s5737_s29  ;;  %2668 = vrot.lane.b32.xlu0 %v2628_v29, %s5737_s29 }
 0x25d   : > { %2674 = vrot.lane.b32.xlu1 %v2631_v12, %s5737_s29  ;;  %2672 = vrot.lane.b32.xlu0 %v2630_v15, %s5737_s29 }
 0x261   : > { %2678 = vrot.lane.b32.xlu1 %v2633_v17, %s5737_s29  ;;  %2676 = vrot.lane.b32.xlu0 %v2632_v35, %s5737_s29 }
 0x265   : > { %2682 = vrot.lane.b32.xlu1 %v2635_v51, %s5737_s29  ;;  %2680 = vrot.lane.b32.xlu0 %v2634_v28, %s5737_s29 }
 0x2bb   : > { %v2657_v34 = vpop.permute.xlu1 %2656  ;;  %v2653_v47 = vpop.permute.xlu0 %2652 }
 0x2bc   : > { %2703 = vst.msk [vmem:[#allocation5 + $0x10] sm:$0xff] %vm1967_vm11, %v2657_v34  ;;  %2701 = vst.msk [vmem:[#allocation5] sm:$0xff] %vm1967_vm11, %v2653_v47 }
 0x2bf   : > { %v2659_v8 = vpop.permute.xlu1 %2658  ;;  %v2655_v60 = vpop.permute.xlu0 %2654 }
 0x2c0   : > { %2704 = vst.msk [vmem:[#allocation5 + $0x18] sm:$0xff] %vm1967_vm11, %v2659_v8  ;;  %2702 = vst.msk [vmem:[#allocation5 + $0x8] sm:$0xff] %vm1967_vm11, %v2655_v60 }
 0x2c3   : > { %v2663_v33 = vpop.permute.xlu1 %2662  ;;  %v2661_v5 = vpop.permute.xlu0 %2660 }
 0x2c4   : > { %2706 = vst.msk [vmem:[#allocation5 + $0x28] sm:$0xff] %vm1967_vm11, %v2663_v33  ;;  %2705 = vst.msk [vmem:[#allocation5 + $0x20] sm:$0xff] %vm1967_vm11, %v2661_v5 }
 0x2c7   : > { %v2667_v42 = vpop.permute.xlu1 %2666  ;;  %v2665_v4 = vpop.permute.xlu0 %2664 }
 0x2c8   : > { %2708 = vst.msk [vmem:[#allocation5 + $0x38] sm:$0xff] %vm1967_vm11, %v2667_v42  ;;  %2707 = vst.msk [vmem:[#allocation5 + $0x30] sm:$0xff] %vm1967_vm11, %v2665_v4 }
 0x2cb   : > { %v2671_v39 = vpop.permute.xlu1 %2670  ;;  %v2669_v25 = vpop.permute.xlu0 %2668 }
 0x2cc   : > { %2710 = vst.msk [vmem:[#allocation5 + $0x48] sm:$0xff] %vm1967_vm11, %v2671_v39  ;;  %2709 = vst.msk [vmem:[#allocation5 + $0x40] sm:$0xff] %vm1967_vm11, %v2669_v25 }
 0x2cf   : > { %v2675_v48 = vpop.permute.xlu1 %2674  ;;  %v2673_v43 = vpop.permute.xlu0 %2672 }
 0x2d0   : > { %2712 = vst.msk [vmem:[#allocation5 + $0x58] sm:$0xff] %vm1967_vm11, %v2675_v48  ;;  %2711 = vst.msk [vmem:[#allocation5 + $0x50] sm:$0xff] %vm1967_vm11, %v2673_v43 }
 0x2d3   : > { %v2679_v0 = vpop.permute.xlu1 %2678  ;;  %v2677_v13 = vpop.permute.xlu0 %2676 }
 0x2d4   : > { %2714 = vst.msk [vmem:[#allocation5 + $0x68] sm:$0xff] %vm1967_vm11, %v2679_v0  ;;  %2713 = vst.msk [vmem:[#allocation5 + $0x60] sm:$0xff] %vm1967_vm11, %v2677_v13 }
 0x2d7   : > { %v2683_v49 = vpop.permute.xlu1 %2682  ;;  %v2681_v58 = vpop.permute.xlu0 %2680 }
 0x2d8   : > { %2716 = vst.msk [vmem:[#allocation5 + $0x78] sm:$0xff] %vm1967_vm11, %v2683_v49  ;;  %2715 = vst.msk [vmem:[#allocation5 + $0x70] sm:$0xff] %vm1967_vm11, %v2681_v58 }
 0x2d9 LB: >> { %s5322_s19 = smul.u32 12, %s5728_s21  ;;  %s5738_s30 = smov 32   ;;  %s5728_s21 = sphi %s7060_s21, %s2722_s21  }
 0x2da   : >> { %s5323_s13 = smul.u32 40, %s5728_s21  ;;  %s5739_s15 = smov 16  }
 0x2db   : >> { %s7066_s20 = scalar_lea.vmem [#allocation3], %s5322_s19  ;;  %s5740_s18 = smov 48  }
 0x2dc   : >> { %v7069_v63 = vld [vmem:[%s7066_s20 + $0x34] sm:$0xf]  ;;  %v7072_v26 = vld [vmem:[%s7066_s20 + $0x38] sm:$0x1]  ;;  %v7075_v50 = vld [vmem:[%s7066_s20 + $0x30] sm:$0xe]  ;;  %s7173_s16 = scalar_lea.vmem %s8371_s3, %s5323_s13 }
 0x2dd   : >> { %v2869_v11 = vshll.u32 %v7072_v26, 16  ;;  %v5186_v3 = vrot.slane %v7075_v50, 9  ;;  %v3010_v10 = vrot.slane %v7069_v63, 5  ;;  %v3013_v14 = vrot.slane %v7072_v26, 5  ;;  %v7082_v22 = vld [vmem:[%s7066_s20 + $0x4] sm:$0xf] }
 0x2de   : >> { %v3140_v23 = vshrl.u32 %v7075_v50, 16  ;;  %v3143_v45 = vshll.u32 %v7075_v50, 16  ;;  %v2742_v7 = vld [vmem:[%s7066_s20 + $0x8] sm:$0x1]  ;;  %v7088_v37 = vld [vmem:[%s7066_s20] sm:$0xe] }
 0x2df   : >> { %v3011_v41 = vsel %vm6088_vm10, %v5186_v3, %v3010_v10  ;;  %v3012_v19 = vrot.slane %v3010_v10, 4  ;;  %v2773_v40 = vshll.u32 %v2742_v7, 16  ;;  %v5182_v36 = vrot.slane %v7088_v37, 9  ;;  %v7094_v54 = vld [vmem:[%s7066_s20 + $0x40] sm:$0xf]  ;;  %s5741_s29 = smov 64  }
 0x2e0   : >> { %v2982_v61 = vrot.slane %v7082_v22, 5  ;;  %v2985_v38 = vrot.slane %v2742_v7, 5  ;;  %v3048_v30 = vshrl.u32 %v7088_v37, 16  ;;  %v3051_v55 = vshll.u32 %v7088_v37, 16  ;;  %v7100_v21 = vld [vmem:[%s7066_s20 + $0x44] sm:$0x1] }
 0x2e1   : >> { %v3014_v44 = vsel %vm6088_vm10, %v3012_v19, %v3013_v14  ;;  %v7105_v27 = vld [vmem:[%s7066_s20 + $0x3c] sm:$0xe]  ;;  %v3017_v20 = vrot.slane %v7094_v54, 5  ;;  %v3020_v24 = vrot.slane %v7100_v21, 5  ;;  %v7110_v6 = vld [vmem:[%s7066_s20 + $0x10] sm:$0xf] }
 0x2e2   : >> { %v5218_v9 = vcombine.low %v3011_v41, %v3014_v44  ;;  %v2983_v2 = vsel %vm6088_vm10, %v5182_v36, %v2982_v61  ;;  %v2984_v57 = vrot.slane %v2982_v61, 4  ;;  %v5187_v31 = vrot.slane %v7105_v27, 9  ;;  %v2743_v62 = vld [vmem:[%s7066_s20 + $0x14] sm:$0x1]  ;;  %v7117_v1 = vld [vmem:[%s7066_s20 + $0xc] sm:$0xe] }
 0x2e3   : >> { %v3019_v18 = vrot.slane %v3017_v20, 4  ;;  %v5183_v46 = vrot.slane %v7117_v1, 9  ;;  %v2989_v16 = vrot.slane %v7110_v6, 5  ;;  %v2992_v59 = vrot.slane %v2743_v62, 5  ;;  %v7122_v29 = vld [vmem:[%s7066_s20 + $0xc] sm:$0xf] }
 0x2e4   : >> { %3418 = vrot.lane.b32.xlu1 %v5218_v9, %s5738_s30  ;;  %v2986_v12 = vsel %vm6088_vm10, %v2984_v57, %v2985_v38  ;;  %v3018_v15 = vsel %vm6088_vm10, %v5187_v31, %v3017_v20  ;;  %v2778_v17 = vshrl.u32 %v7122_v29, 16  ;;  %v2781_v35 = vshll.u32 %v7122_v29, 16  ;;  %v7132_v51 = vld [vmem:[%s7066_s20] sm:$0xf]  ;;  %v7149_v58 = vld [vmem:[%s7066_s20 + $0x3c] sm:$0xf] }
 0x2e5   : >> { %v5214_v28 = vcombine.low %v2983_v2, %v2986_v12  ;;  %v3021_v34 = vsel %vm6088_vm10, %v3019_v18, %v3020_v24  ;;  %v2990_v47 = vsel %vm6088_vm10, %v5183_v46, %v2989_v16  ;;  %v2991_v8 = vrot.slane %v2989_v16, 4  ;;  %v7167_v31 = vld [vmem:[%s7066_s20 + $0x30] sm:$0xf]  ;;  %s2722_s21 = sadd.s32 1, %s5728_s21  }
 0x2e6   : >> { %v5219_v60 = vcombine.low %v3018_v15, %v3021_v34  ;;  %v2780_v33 = vrot.slane %v2778_v17, 4  ;;  %v2783_v5 = vrot.slane %v2781_v35, 5  ;;  %v2787_v42 = vshll.u32 %v7110_v6, 16  ;;  %v5593_v35 = vld [vmem:[%s7173_s16 + $0x20] sm:$0xff]   ;;  %p2719_p10 = scmp.ge.s32.totalorder %s2722_s21, 5  }
 0x2e7   : >> { %3410 = vrot.lane.b32.xlu0 %v5214_v28, %s5738_s30  ;;  %v2993_v4 = vsel %vm6088_vm10, %v2991_v8, %v2992_v59  ;;  %v2791_v39 = vshrl.u32 %v7110_v6, 16  ;;  %v2797_v25 = vshll.u32 %v2743_v62, 16  ;;  %v2754_v48 = vshrl.u32 %v7132_v51, 16  ;;  %5407 = vmatprep.subr.bf16.mxu0 %v5593_v35 }
 0x2e8   : >> { %3420 = vrot.lane.b32.xlu1 %v5219_v60, %s5738_s30  ;;  %v5215_v43 = vcombine.low %v2990_v47, %v2993_v4  ;;  %v2784_v0 = vor.u32 %v2783_v5, %v2780_v33  ;;  %v2789_v13 = vrot.slane %v2787_v42, 5  ;;  %v2757_v49 = vshll.u32 %v7132_v51, 16  ;;  %5481 = vmatprep.subr.bf16.mxu1 %v5593_v35 }
 0x2e9   : >> { %v2793_v3 = vrot.slane %v2791_v39, 4  ;;  %v2799_v10 = vrot.slane %v2797_v25, 5  ;;  %v2756_v14 = vrot.slane %v2754_v48, 4  ;;  %v2763_v7 = vshll.u32 %v7082_v22, 16  ;;  %5408 = vmatpush3.bf16.msra.mxu0 %v5593_v35  ;;  %5486 = vmatpush3.bf16.msra.mxu1 %v5593_v35 }
 0x2ea   : >> { %v2785_v41 = vrot.slane %v2784_v0, 4  ;;  %v2759_v19 = vrot.slane %v2757_v49, 5  ;;  %v2767_v36 = vshrl.u32 %v7082_v22, 16  ;;  %v2775_v61 = vrot.slane %v2773_v40, 5  ;;  %v5596_v0 = vld [vmem:[%s7173_s16 + $0x18] sm:$0xff]  }
 0x2eb   : >> { %3412 = vrot.lane.b32.xlu0 %v5215_v43, %s5738_s30  ;;  %v2794_v38 = vor.u32 %v2793_v3, %v2789_v13  ;;  %v2765_v44 = vrot.slane %v2763_v7, 5  ;;  %v2874_v20 = vshrl.u32 %v7149_v58, 16  ;;  %v2877_v24 = vshll.u32 %v7149_v58, 16  ;;  %5409 = vmatprep.subr.bf16.mxu0 %v5596_v0 }
 0x2ec   : >> { %v2790_v9 = vsel %vm6173_vm13, %v2785_v41, %v2789_v13  ;;  %v2760_v2 = vor.u32 %v2759_v19, %v2756_v14  ;;  %v2769_v57 = vrot.slane %v2767_v36, 4  ;;  %v2883_v40 = vshll.u32 %v7094_v54, 16  ;;  %5482 = vmatprep.subr.bf16.mxu1 %v5596_v0 }
 0x2ed   : >> { %v2795_v62 = vrot.slane %v2794_v38, 4  ;;  %v2876_v18 = vrot.slane %v2874_v20, 4  ;;  %v2879_v46 = vrot.slane %v2877_v24, 5  ;;  %v2887_v16 = vshrl.u32 %v7094_v54, 16  ;;  %5410 = vmatpush3.bf16.msra.mxu0 %v5596_v0  ;;  %5487 = vmatpush3.bf16.msra.mxu1 %v5596_v0 }
 0x2ee   : >> { %v2761_v59 = vrot.slane %v2760_v2, 4  ;;  %v2770_v12 = vor.u32 %v2769_v57, %v2765_v44  ;;  %v2885_v15 = vrot.slane %v2883_v40, 5  ;;  %v2893_v17 = vshll.u32 %v7100_v21, 16 }
 0x2ef   : >> { %v2800_v28 = vsel %vm6173_vm13, %v2795_v62, %v2799_v10  ;;  %v2880_v34 = vor.u32 %v2879_v46, %v2876_v18  ;;  %v2889_v47 = vrot.slane %v2887_v16, 4  ;;  %v2850_v8 = vshrl.u32 %v7167_v31, 16 }
 0x2f0   : >> { %v5207_v60 = vcombine.low %v2790_v9, %v2800_v28  ;;  %v2766_v33 = vsel %vm6173_vm13, %v2761_v59, %v2765_v44  ;;  %v2771_v5 = vrot.slane %v2770_v12, 4  ;;  %v2895_v4 = vrot.slane %v2893_v17, 5  ;;  %v7198_v44 = vld [vmem:[%s7066_s20 + $0x38] sm:$0x3] }
 0x2f1   : >> { %v2881_v21 = vrot.slane %v2880_v34, 4  ;;  %v2890_v25 = vor.u32 %v2889_v47, %v2885_v15  ;;  %v2852_v48 = vrot.slane %v2850_v8, 4  ;;  %v2853_v43 = vshll.u32 %v7167_v31, 16  ;;  %v7214_v34 = vld [vmem:[%s7066_s20 + $0x8] sm:$0x3] }
 0x2f2   : >> { %3372 = vrot.lane.b32.xlu1 %v5207_v60, %s5739_s15  ;;  %v2776_v13 = vsel %vm6173_vm13, %v2771_v5, %v2775_v61  ;;  %v2859_v49 = vshll.u32 %v7069_v63, 16  ;;  %v2863_v3 = vshrl.u32 %v7069_v63, 16  ;;  %v2871_v10 = vrot.slane %v2869_v11, 5 }
 0x2f3   : >> { %v5206_v14 = vcombine.low %v2766_v33, %v2776_v13  ;;  %v2886_v41 = vsel %vm6173_vm13, %v2881_v21, %v2885_v15  ;;  %v2891_v19 = vrot.slane %v2890_v25, 4  ;;  %v2855_v38 = vrot.slane %v2853_v43, 5  ;;  %v5597_v15 = vld [vmem:[%s7173_s16 + $0x10] sm:$0xff]   ;;  %v7231_v43 = vld [vmem:[%s7066_s20 + $0x44] sm:$0x3] }
 0x2f4   : >> { %v2861_v20 = vrot.slane %v2859_v49, 5  ;;  %v2865_v24 = vrot.slane %v2863_v3, 4  ;;  %v3142_v61 = vrot.slane %v3140_v23, 5  ;;  %v3145_v9 = vrot.slane %v3143_v45, 6  ;;  %5411 = vmatprep.subr.bf16.mxu0 %v5597_v15  ;;  %5483 = vmatprep.subr.bf16.mxu1 %v5597_v15 }
 0x2f5   : >> { %3370 = vrot.lane.b32.xlu0 %v5206_v14, %s5739_s15  ;;  %v2896_v26 = vsel %vm6173_vm13, %v2891_v19, %v2895_v4  ;;  %v2856_v11 = vor.u32 %v2855_v38, %v2852_v48  ;;  %v3148_v2 = vrot.slane %v2863_v3, 5  ;;  %v3149_v57 = vrot.slane %v2859_v49, 6  ;;  %5412 = vmatpush3.bf16.msra.mxu0 %v5597_v15 }
 0x2f6   : >> { %v5211_v62 = vcombine.low %v2886_v41, %v2896_v26  ;;  %v2866_v18 = vor.u32 %v2865_v24, %v2861_v20  ;;  %v3146_v46 = vor.u32 %v3145_v9, %v3142_v61  ;;  %v3154_v59 = vshrl.u32 %v7198_v44, 16  ;;  %5488 = vmatpush3.bf16.msra.mxu1 %v5597_v15  ;;  %v7243_v61 = vld [vmem:[%s7066_s20 + $0x14] sm:$0x3] }
 0x2f7   : >> { %v2857_v23 = vrot.slane %v2856_v11, 4  ;;  %v3150_v50 = vor.u32 %v3149_v57, %v3148_v2  ;;  %v3157_v45 = vshll.u32 %v7198_v44, 16  ;;  %v3050_v12 = vrot.slane %v3048_v30, 5  ;;  %v3235_v2 = vld [vmem:[%s7066_s20 + $0x30] sm:$0xc] }
 0x2f8   : >> { %3380 = vrot.lane.b32.xlu1 %v5211_v62, %s5739_s15  ;;  %v2867_v17 = vrot.slane %v2866_v18, 4  ;;  %v3147_v35 = vrot.slane %v3146_v46, 4  ;;  %v3156_v28 = vrot.slane %v3154_v59, 5  ;;  %v3053_v47 = vrot.slane %v3051_v55, 6 }
 0x2f9   : >> { %v2862_v8 = vsel %vm6173_vm13, %v2857_v23, %v2861_v20  ;;  %v3152_v60 = vrot.slane %v3150_v50, 4  ;;  %v3159_v33 = vrot.slane %v3157_v45, 6  ;;  %v3056_v30 = vrot.slane %v2767_v36, 5 }
 0x2fa   : >> { %v2872_v5 = vsel %vm6173_vm13, %v2867_v17, %v2871_v10  ;;  %v3151_v4 = vsel %vm6222_vm4, %v3147_v35, %v3150_v50  ;;  %v3054_v21 = vor.u32 %v3053_v47, %v3050_v12  ;;  %v3057_v37 = vrot.slane %v2763_v7, 6  ;;  %v5598_v50 = vld [vmem:[%s7173_s16 + $0x8] sm:$0xff]  }
 0x2fb   : >> { %v5210_v55 = vcombine.low %v2862_v8, %v2872_v5  ;;  %v3160_v25 = vor.u32 %v3159_v33, %v3156_v28  ;;  %v3062_v48 = vshrl.u32 %v7214_v34, 16  ;;  %v3065_v36 = vshll.u32 %v7214_v34, 16  ;;  %5413 = vmatprep.subr.bf16.mxu0 %v5598_v50  ;;  %5484 = vmatprep.subr.bf16.mxu1 %v5598_v50 }
 0x2fc   : >> { %v3055_v0 = vrot.slane %v3054_v21, 4  ;;  %v3058_v13 = vor.u32 %v3057_v37, %v3056_v30  ;;  %v3163_v49 = vshrl.u32 %v7105_v27, 16  ;;  %v3166_v3 = vshll.u32 %v7105_v27, 16  ;;  %5414 = vmatpush3.bf16.msra.mxu0 %v5598_v50  ;;  %v5599_v30 = vld [vmem:[%s7173_s16] sm:$0xff]   ;;  %5489 = vmatpush3.bf16.msra.mxu1 %v5598_v50 }
 0x2fd   : >> { %3378 = vrot.lane.b32.xlu0 %v5210_v55, %s5739_s15  ;;  %v3161_v7 = vsel %vm6222_vm4, %v3152_v60, %v3160_v25  ;;  %v3064_v10 = vrot.slane %v3062_v48, 5  ;;  %v3067_v14 = vrot.slane %v3065_v36, 6  ;;  %v3171_v41 = vrot.slane %v2887_v16, 5  ;;  %v3231_v37 = vld [vmem:[%s7066_s20] sm:$0xc]  ;;  %5415 = vmatprep.subr.bf16.mxu0 %v5599_v30 }
 0x2fe   : >> { %v5226_v19 = vcombine.low %v3151_v4, %v3161_v7  ;;  %v3059_v38 = vsel %vm6222_vm4, %v3055_v0, %v3058_v13  ;;  %v3060_v20 = vrot.slane %v3058_v13, 4  ;;  %v3165_v24 = vrot.slane %v3163_v49, 5  ;;  %v3236_v0 = vld [vmem:[%s7066_s20 + $0x3c] sm:$0xc]  ;;  %5485 = vmatprep.subr.bf16.mxu1 %v5599_v30 }
 0x2ff   : >> { %v3068_v27 = vor.u32 %v3067_v14, %v3064_v10  ;;  %v3168_v9 = vrot.slane %v3166_v3, 6  ;;  %v3172_v26 = vrot.slane %v2883_v40, 6  ;;  %v3177_v11 = vshrl.u32 %v7231_v43, 16 }
 0x300   : >> { %3458 = vrot.lane.b32.xlu1 %v5226_v19, %s5740_s18  ;;  %v3180_v16 = vshll.u32 %v7231_v43, 16  ;;  %v3071_v57 = vshrl.u32 %v7117_v1, 16  ;;  %v3074_v62 = vshll.u32 %v7117_v1, 16  ;;  %v3079_v18 = vrot.slane %v2791_v39, 5  ;;  %5416 = vmatpush3.bf16.msra.mxu0 %v5599_v30 }
 0x301   : >> { %v3069_v46 = vsel %vm6222_vm4, %v3060_v20, %v3068_v27  ;;  %v3169_v59 = vor.u32 %v3168_v9, %v3165_v24  ;;  %v3173_v40 = vor.u32 %v3172_v26, %v3171_v41  ;;  %v3179_v23 = vrot.slane %v3177_v11, 5  ;;  %v3232_v24 = vld [vmem:[%s7066_s20 + $0xc] sm:$0xc]  ;;  %5490 = vmatpush3.bf16.msra.mxu1 %v5599_v30  ;;  %v7288_v11 = vld [vmem:[%s7066_s20 + $0x48] sm:$0xf] }
 0x302   : >> { %v5222_v45 = vcombine.low %v3059_v38, %v3069_v46  ;;  %v3182_v12 = vrot.slane %v3180_v16, 6  ;;  %v3073_v15 = vrot.slane %v3071_v57, 5  ;;  %v3076_v17 = vrot.slane %v3074_v62, 6  ;;  %v7294_v57 = vld [vmem:[%s7066_s20 + $0x4c] sm:$0xf] }
 0x303   : >> { %v3170_v35 = vrot.slane %v3169_v59, 4  ;;  %v3175_v28 = vrot.slane %v3173_v40, 4  ;;  %v3080_v1 = vrot.slane %v2787_v42, 6  ;;  %v3085_v39 = vshrl.u32 %v7243_v61, 16 }
 0x304   : >> { %3450 = vrot.lane.b32.xlu0 %v5222_v45, %s5740_s18  ;;  %v3183_v47 = vor.u32 %v3182_v12, %v3179_v23  ;;  %v3077_v8 = vor.u32 %v3076_v17, %v3073_v15  ;;  %v3088_v60 = vshll.u32 %v7243_v61, 16  ;;  %v5194_v33 = vrot.slane %v3235_v2, 10  ;;  %v7310_v12 = vld [vmem:[%s7066_s20 + $0x18] sm:$0xf] }
 0x305   : >> { %v3174_v5 = vsel %vm6222_vm4, %v3170_v35, %v3173_v40  ;;  %v3081_v4 = vor.u32 %v3080_v1, %v3079_v18  ;;  %v3087_v21 = vrot.slane %v3085_v39, 5  ;;  %v3288_v42 = vrot.slane %v7069_v63, 6  ;;  %v7301_v40 = vld [vmem:[%s7066_s20 + $0x50] sm:$0x1] }
 0x306   : >> { %v3184_v55 = vsel %vm6222_vm4, %v3175_v28, %v3183_v47  ;;  %v3078_v25 = vrot.slane %v3077_v8, 4  ;;  %v3090_v48 = vrot.slane %v3088_v60, 6  ;;  %v3291_v36 = vrot.slane %v7198_v44, 6  ;;  %v7316_v28 = vld [vmem:[%s7066_s20 + $0x1c] sm:$0xf] }
 0x307   : >> { %v5227_v13 = vcombine.low %v3174_v5, %v3184_v55  ;;  %v3083_v49 = vrot.slane %v3081_v4, 4  ;;  %v3289_v3 = vsel %vm6291_vm9, %v5194_v33, %v3288_v42  ;;  %v3290_v7 = vrot.slane %v3288_v42, 4  ;;  %v7321_v60 = vld [vmem:[%s7066_s20 + $0x20] sm:$0x1] }
 0x308   : >> { %v3082_v63 = vsel %vm6222_vm4, %v3078_v25, %v3081_v4  ;;  %v3091_v10 = vor.u32 %v3090_v48, %v3087_v21  ;;  %v5190_v14 = vrot.slane %v3231_v37, 10  ;;  %v3260_v41 = vrot.slane %v7082_v22, 6  ;;  %v7330_v21 = vld [vmem:[%s7066_s20 + $0x54] sm:$0xf] }
 0x309   : >> { %3460 = vrot.lane.b32.xlu1 %v5227_v13, %s5740_s18  ;;  %v3292_v44 = vsel %vm6291_vm9, %v3290_v7, %v3291_v36  ;;  %v3263_v19 = vrot.slane %v7214_v34, 6  ;;  %v5195_v38 = vrot.slane %v3236_v0, 10  ;;  %v3295_v20 = vrot.slane %v7094_v54, 6 }
 0x30a   : >> { %v3092_v27 = vsel %vm6222_vm4, %v3083_v49, %v3091_v10  ;;  %v5234_v9 = vcombine.low %v3289_v3, %v3292_v44  ;;  %v3261_v22 = vsel %vm6291_vm9, %v5190_v14, %v3260_v41  ;;  %v3262_v26 = vrot.slane %v3260_v41, 4  ;;  %v7339_v49 = vld [vmem:[%s7066_s20 + $0x58] sm:$0xf]  ;;  %v7343_v10 = vld [vmem:[%s7066_s20 + $0x5c] sm:$0x1] }
 0x30b   : >> { %v5223_v2 = vcombine.low %v3082_v63, %v3092_v27  ;;  %v3296_v34 = vsel %vm6291_vm9, %v5195_v38, %v3295_v20  ;;  %v3297_v16 = vrot.slane %v3295_v20, 4  ;;  %v3298_v54 = vrot.slane %v7231_v43, 6  ;;  %v7352_v20 = vld [vmem:[%s7066_s20 + $0x24] sm:$0xf] }
 0x30c   : >> { %v3264_v62 = vsel %vm6291_vm9, %v3262_v26, %v3263_v19  ;;  %v5191_v18 = vrot.slane %v3232_v24, 10  ;;  %v3267_v46 = vrot.slane %v7110_v6, 6  ;;  %v3270_v59 = vrot.slane %v7243_v61, 6 }
 0x30d   : >> { %3452 = vrot.lane.b32.xlu0 %v5223_v2, %s5740_s18  ;;  %3498 = vrot.lane.b32.xlu1 %v5234_v9, %s5741_s29  ;;  %v5230_v43 = vcombine.low %v3261_v22, %v3264_v62  ;;  %v3299_v23 = vsel %vm6291_vm9, %v3297_v16, %v3298_v54  ;;  %v2898_v50 = vshrl.u32 %v7288_v11, 16  ;;  %v2901_v45 = vshll.u32 %v7288_v11, 16 }
 0x30e   : >> { %v5235_v61 = vcombine.low %v3296_v34, %v3299_v23  ;;  %v3268_v15 = vsel %vm6291_vm9, %v5191_v18, %v3267_v46  ;;  %v3269_v17 = vrot.slane %v3267_v46, 4  ;;  %v2907_v35 = vshll.u32 %v7294_v57, 16  ;;  %v7363_v46 = vld [vmem:[%s7066_s20 + $0x28] sm:$0xf] }
 0x30f   : >> { %v2900_v1 = vrot.slane %v2898_v50, 4  ;;  %v2903_v39 = vrot.slane %v2901_v45, 5  ;;  %v2911_v47 = vshrl.u32 %v7294_v57, 16  ;;  %v2917_v8 = vshll.u32 %v7301_v40, 16 }
 0x310   : >> { %v3271_v33 = vsel %vm6291_vm9, %v3269_v17, %v3270_v59  ;;  %v2909_v30 = vrot.slane %v2907_v35, 5  ;;  %v2802_v5 = vshrl.u32 %v7310_v12, 16  ;;  %v2805_v4 = vshll.u32 %v7310_v12, 16 }
 0x311   : >> { %3490 = vrot.lane.b32.xlu0 %v5230_v43, %s5741_s29  ;;  %3500 = vrot.lane.b32.xlu1 %v5235_v61, %s5741_s29  ;;  %v5231_v42 = vcombine.low %v3268_v15, %v3271_v33  ;;  %v2904_v37 = vor.u32 %v2903_v39, %v2900_v1  ;;  %v2913_v55 = vrot.slane %v2911_v47, 4  ;;  %v2919_v25 = vrot.slane %v2917_v8, 5  ;;  %v7369_v61 = vld [vmem:[%s7066_s20 + $0x2c] sm:$0x1]  ;;  %v7376_v8 = vld [vmem:[%s7066_s20 + $0x48] sm:$0xe] }
 0x312   : >> { %v2804_v48 = vrot.slane %v2802_v5, 4  ;;  %v2807_v36 = vrot.slane %v2805_v4, 5  ;;  %v2811_v0 = vshll.u32 %v7316_v28, 16  ;;  %v2815_v13 = vshrl.u32 %v7316_v28, 16 }
 0x313   : >> { %v2905_v3 = vrot.slane %v2904_v37, 4  ;;  %v2914_v7 = vor.u32 %v2913_v55, %v2909_v30  ;;  %v2821_v63 = vshll.u32 %v7321_v60, 16  ;;  %v2922_v14 = vshrl.u32 %v7330_v21, 16 }
 0x314   : >> { %v2808_v41 = vor.u32 %v2807_v36, %v2804_v48  ;;  %v2813_v44 = vrot.slane %v2811_v0, 5  ;;  %v2817_v19 = vrot.slane %v2815_v13, 4  ;;  %v2925_v38 = vshll.u32 %v7330_v21, 16  ;;  %v7386_v48 = vld [vmem:[%s7066_s20 + $0x18] sm:$0xe] }
 0x315   : >> { %3492 = vrot.lane.b32.xlu0 %v5231_v42, %s5741_s29  ;;  %v2910_v24 = vsel %vm6173_vm13, %v2905_v3, %v2909_v30  ;;  %v2915_v27 = vrot.slane %v2914_v7, 4  ;;  %v2823_v9 = vrot.slane %v2821_v63, 5  ;;  %v2924_v22 = vrot.slane %v2922_v14, 4 }
 0x316   : >> { %v2809_v26 = vrot.slane %v2808_v41, 4  ;;  %v2818_v2 = vor.u32 %v2817_v19, %v2813_v44  ;;  %v2927_v34 = vrot.slane %v2925_v38, 5  ;;  %v2931_v16 = vshll.u32 %v7339_v49, 16 }
 0x317   : >> { %v2920_v54 = vsel %vm6173_vm13, %v2915_v27, %v2919_v25  ;;  %v2935_v62 = vshrl.u32 %v7339_v49, 16  ;;  %v2941_v18 = vshll.u32 %v7343_v10, 16  ;;  %v2826_v59 = vshrl.u32 %v7352_v20, 16 }
 0x318   : >> { %v5212_v43 = vcombine.low %v2910_v24, %v2920_v54  ;;  %v2814_v23 = vsel %vm6173_vm13, %v2809_v26, %v2813_v44  ;;  %v2819_v50 = vrot.slane %v2818_v2, 4  ;;  %v2928_v45 = vor.u32 %v2927_v34, %v2924_v22  ;;  %v7401_v22 = vld [vmem:[%s7066_s20 + $0x54] sm:$0xe] }
 0x319   : >> { %v2933_v15 = vrot.slane %v2931_v16, 5  ;;  %v2937_v17 = vrot.slane %v2935_v62, 4  ;;  %v2943_v1 = vrot.slane %v2941_v18, 5  ;;  %v2828_v39 = vrot.slane %v2826_v59, 4 }
 0x31a   : >> { %3382 = vrot.lane.b32.xlu1 %v5212_v43, %s5739_s15  ;;  %v2824_v33 = vsel %vm6173_vm13, %v2819_v50, %v2823_v9  ;;  %v2929_v30 = vrot.slane %v2928_v45, 4  ;;  %v2829_v5 = vshll.u32 %v7352_v20, 16  ;;  %v2835_v4 = vshll.u32 %v7363_v46, 16 }
 0x31b   : >> { %v5208_v42 = vcombine.low %v2814_v23, %v2824_v33  ;;  %v2938_v37 = vor.u32 %v2937_v17, %v2933_v15  ;;  %v2839_v55 = vshrl.u32 %v7363_v46, 16  ;;  %v2845_v25 = vshll.u32 %v7369_v61, 16  ;;  %v7410_v23 = vld [vmem:[%s7066_s20 + $0x24] sm:$0xe] }
 0x31c   : >> { %v2934_v36 = vsel %vm6173_vm13, %v2929_v30, %v2933_v15  ;;  %v2831_v3 = vrot.slane %v2829_v5, 5  ;;  %v2837_v7 = vrot.slane %v2835_v4, 5  ;;  %v5188_v63 = vrot.slane %v7376_v8, 9 }
 0x31d   : >> { %3374 = vrot.lane.b32.xlu0 %v5208_v42, %s5739_s15  ;;  %v2939_v14 = vrot.slane %v2938_v37, 4  ;;  %v2841_v41 = vrot.slane %v2839_v55, 4  ;;  %v2847_v44 = vrot.slane %v2845_v25, 5  ;;  %v3024_v19 = vrot.slane %v7294_v57, 5 }
 0x31e   : >> { %v2832_v38 = vor.u32 %v2831_v3, %v2828_v39  ;;  %v3027_v24 = vrot.slane %v7301_v40, 5  ;;  %v5184_v27 = vrot.slane %v7386_v48, 9  ;;  %v2996_v9 = vrot.slane %v7316_v28, 5 }
 0x31f   : >> { %v2944_v26 = vsel %vm6173_vm13, %v2939_v14, %v2943_v1  ;;  %v2842_v2 = vor.u32 %v2841_v41, %v2837_v7  ;;  %v3025_v34 = vsel %vm6088_vm10, %v5188_v63, %v3024_v19  ;;  %v3026_v54 = vrot.slane %v3024_v19, 4  ;;  %v7430_v63 = vld [vmem:[%s7066_s20 + $0x50] sm:$0x3] }
 0x320   : >> { %v5213_v18 = vcombine.low %v2934_v36, %v2944_v26  ;;  %v2833_v59 = vrot.slane %v2832_v38, 4  ;;  %v2997_v43 = vsel %vm6088_vm10, %v5184_v27, %v2996_v9  ;;  %v2998_v40 = vrot.slane %v2996_v9, 4 }
 0x321   : >> { %v2843_v50 = vrot.slane %v2842_v2, 4  ;;  %v3028_v45 = vsel %vm6088_vm10, %v3026_v54, %v3027_v24  ;;  %v2999_v15 = vrot.slane %v7321_v60, 5  ;;  %v5189_v17 = vrot.slane %v7401_v22, 9 }
 0x322   : >> { %3384 = vrot.lane.b32.xlu1 %v5213_v18, %s5739_s15  ;;  %v2838_v1 = vsel %vm6173_vm13, %v2833_v59, %v2837_v7  ;;  %v5220_v39 = vcombine.low %v3025_v34, %v3028_v45  ;;  %v3031_v33 = vrot.slane %v7339_v49, 5  ;;  %v3034_v30 = vrot.slane %v7343_v10, 5 }
 0x323   : >> { %v2848_v5 = vsel %vm6173_vm13, %v2843_v50, %v2847_v44  ;;  %v3000_v42 = vsel %vm6088_vm10, %v2998_v40, %v2999_v15  ;;  %v5185_v60 = vrot.slane %v7410_v23, 9  ;;  %v3003_v37 = vrot.slane %v7363_v46, 5 }
 0x324   : >> { %v5209_v25 = vcombine.low %v2838_v1, %v2848_v5  ;;  %v5216_v36 = vcombine.low %v2997_v43, %v3000_v42  ;;  %v3032_v3 = vsel %vm6088_vm10, %v5189_v17, %v3031_v33  ;;  %v3033_v7 = vrot.slane %v3031_v33, 4  ;;  %v7450_v43 = vld [vmem:[%s7066_s20 + $0x20] sm:$0x3] }
 0x325   : >> { %v3004_v10 = vsel %vm6088_vm10, %v5185_v60, %v3003_v37  ;;  %v3005_v14 = vrot.slane %v3003_v37, 4  ;;  %v3006_v41 = vrot.slane %v7369_v61, 5  ;;  %v3186_v44 = vshrl.u32 %v7376_v8, 16 }
 0x326   : >> { %3376 = vrot.lane.b32.xlu0 %v5209_v25, %s5739_s15  ;;  %3422 = vrot.lane.b32.xlu1 %v5220_v39, %s5738_s30  ;;  %v3035_v19 = vsel %vm6088_vm10, %v3033_v7, %v3034_v30  ;;  %v3189_v38 = vshll.u32 %v7376_v8, 16  ;;  %v3194_v24 = vrot.slane %v2911_v47, 5  ;;  %v3195_v27 = vrot.slane %v2907_v35, 6 }
 0x327   : >> { %v5221_v9 = vcombine.low %v3032_v3, %v3035_v19  ;;  %v3007_v61 = vsel %vm6088_vm10, %v3005_v14, %v3006_v41  ;;  %v3188_v26 = vrot.slane %v3186_v44, 5  ;;  %v3200_v2 = vshrl.u32 %v7430_v63, 16 }
 0x328   : >> { %v5217_v34 = vcombine.low %v3004_v10, %v3007_v61  ;;  %v3191_v54 = vrot.slane %v3189_v38, 6  ;;  %v3196_v18 = vor.u32 %v3195_v27, %v3194_v24  ;;  %v3203_v59 = vshll.u32 %v7430_v63, 16 }
 0x329   : >> { %v3202_v8 = vrot.slane %v3200_v2, 5  ;;  %v3094_v47 = vshrl.u32 %v7386_v48, 16  ;;  %v3097_v40 = vshll.u32 %v7386_v48, 16  ;;  %v3102_v35 = vrot.slane %v2815_v13, 5 }
 0x32a   : >> { %3414 = vrot.lane.b32.xlu0 %v5216_v36, %s5738_s30  ;;  %3424 = vrot.lane.b32.xlu1 %v5221_v9, %s5738_s30  ;;  %v3192_v50 = vor.u32 %v3191_v54, %v3188_v26  ;;  %v3198_v45 = vrot.slane %v3196_v18, 4  ;;  %v3205_v15 = vrot.slane %v3203_v59, 6  ;;  %v3103_v17 = vrot.slane %v2811_v0, 6  ;;  %v7464_v36 = vld [vmem:[%s7066_s20 + $0x5c] sm:$0x3] }
 0x32b   : >> { %v3096_v1 = vrot.slane %v3094_v47, 5  ;;  %v3099_v39 = vrot.slane %v3097_v40, 6  ;;  %v3108_v33 = vshrl.u32 %v7450_v43, 16  ;;  %v3111_v48 = vshll.u32 %v7450_v43, 16 }
 0x32c   : >> { %v3193_v30 = vrot.slane %v3192_v50, 4  ;;  %v3206_v5 = vor.u32 %v3205_v15, %v3202_v8  ;;  %v3104_v13 = vor.u32 %v3103_v17, %v3102_v35  ;;  %v3209_v42 = vshrl.u32 %v7401_v22, 16  ;;  %v3237_v8 = vld [vmem:[%s7066_s20 + $0x48] sm:$0xc] }
 0x32d   : >> { %v3100_v60 = vor.u32 %v3099_v39, %v3096_v1  ;;  %v3110_v37 = vrot.slane %v3108_v33, 5  ;;  %v3113_v25 = vrot.slane %v3111_v48, 6  ;;  %v3212_v3 = vshll.u32 %v7401_v22, 16 }
 0x32e   : >> { %3416 = vrot.lane.b32.xlu0 %v5217_v34, %s5738_s30  ;;  %v3197_v0 = vsel %vm6222_vm4, %v3193_v30, %v3196_v18  ;;  %v3207_v7 = vsel %vm6222_vm4, %v3198_v45, %v3206_v5  ;;  %v3106_v10 = vrot.slane %v3104_v13, 4  ;;  %v3211_v14 = vrot.slane %v3209_v42, 5  ;;  %v7484_v34 = vld [vmem:[%s7066_s20 + $0x2c] sm:$0x3]  ;;  %v3233_v30 = vld [vmem:[%s7066_s20 + $0x18] sm:$0xc] }
 0x32f   : >> { %v5228_v41 = vcombine.low %v3197_v0, %v3207_v7  ;;  %v3101_v44 = vrot.slane %v3100_v60, 4  ;;  %v3114_v19 = vor.u32 %v3113_v25, %v3110_v37  ;;  %v3214_v38 = vrot.slane %v3212_v3, 6  ;;  %v3238_v3 = vld [vmem:[%s7066_s20 + $0x54] sm:$0xc] }
 0x330   : >> { %v3217_v24 = vrot.slane %v2935_v62, 5  ;;  %v3218_v22 = vrot.slane %v2931_v16, 6  ;;  %v3223_v27 = vshrl.u32 %v7464_v36, 16  ;;  %v3226_v9 = vshll.u32 %v7464_v36, 16 }
 0x331   : >> { %3462 = vrot.lane.b32.xlu1 %v5228_v41, %s5740_s18  ;;  %v3105_v61 = vsel %vm6222_vm4, %v3101_v44, %v3104_v13  ;;  %v3115_v26 = vsel %vm6222_vm4, %v3106_v10, %v3114_v19  ;;  %v3215_v2 = vor.u32 %v3214_v38, %v3211_v14  ;;  %v3117_v62 = vshrl.u32 %v7410_v23, 16 }
 0x332   : >> { %v5224_v54 = vcombine.low %v3105_v61, %v3115_v26  ;;  %v3219_v18 = vor.u32 %v3218_v22, %v3217_v24  ;;  %v3225_v16 = vrot.slane %v3223_v27, 5  ;;  %v3228_v59 = vrot.slane %v3226_v9, 6  ;;  %v3234_v9 = vld [vmem:[%s7066_s20 + $0x24] sm:$0xc] }
 0x333   : >> { %v3216_v47 = vrot.slane %v3215_v2, 4  ;;  %v3119_v40 = vrot.slane %v3117_v62, 5  ;;  %v3120_v35 = vshll.u32 %v7410_v23, 16  ;;  %v3125_v50 = vrot.slane %v2839_v55, 5 }
 0x334   : >> { %3454 = vrot.lane.b32.xlu0 %v5224_v54, %s5740_s18  ;;  %v3221_v45 = vrot.slane %v3219_v18, 4  ;;  %v3229_v15 = vor.u32 %v3228_v59, %v3225_v16  ;;  %v3126_v17 = vrot.slane %v2835_v4, 6  ;;  %v3131_v1 = vshrl.u32 %v7484_v34, 16 }
 0x335   : >> { %v3220_v39 = vsel %vm6222_vm4, %v3216_v47, %v3219_v18  ;;  %v3122_v33 = vrot.slane %v3120_v35, 6  ;;  %v3134_v48 = vshll.u32 %v7484_v34, 16  ;;  %v5196_v23 = vrot.slane %v3237_v8, 10 }
 0x336   : >> { %v3230_v55 = vsel %vm6222_vm4, %v3221_v45, %v3229_v15  ;;  %v3127_v5 = vor.u32 %v3126_v17, %v3125_v50  ;;  %v3133_v13 = vrot.slane %v3131_v1, 5  ;;  %v3302_v42 = vrot.slane %v7294_v57, 6 }
 0x337   : >> { %v5229_v60 = vcombine.low %v3220_v39, %v3230_v55  ;;  %v3123_v37 = vor.u32 %v3122_v33, %v3119_v40  ;;  %v3136_v4 = vrot.slane %v3134_v48, 6  ;;  %v3305_v25 = vrot.slane %v7430_v63, 6 }
 0x338   : >> { %v3129_v0 = vrot.slane %v3127_v5, 4  ;;  %v3303_v7 = vsel %vm6291_vm9, %v5196_v23, %v3302_v42  ;;  %v3304_v10 = vrot.slane %v3302_v42, 4  ;;  %v5192_v14 = vrot.slane %v3233_v30, 10 }
 0x339   : >> { %3464 = vrot.lane.b32.xlu1 %v5229_v60, %s5740_s18  ;;  %v3124_v41 = vrot.slane %v3123_v37, 4  ;;  %v3137_v44 = vor.u32 %v3136_v4, %v3133_v13  ;;  %v3274_v19 = vrot.slane %v7316_v28, 6  ;;  %v3277_v38 = vrot.slane %v7450_v43, 6 }
 0x33a   : >> { %v3306_v24 = vsel %vm6291_vm9, %v3304_v10, %v3305_v25  ;;  %v5197_v22 = vrot.slane %v3238_v3, 10  ;;  %v3309_v63 = vrot.slane %v7339_v49, 6  ;;  %v3312_v27 = vrot.slane %v7464_v36, 6  ;;  %v5604_v25 = vld [vmem:[%s7066_s20 + $0x34] sm:$0xf] }
 0x33b   : >> { %v3128_v61 = vsel %vm6222_vm4, %v3124_v41, %v3127_v5  ;;  %v3138_v26 = vsel %vm6222_vm4, %v3129_v0, %v3137_v44  ;;  %v5236_v2 = vcombine.low %v3303_v7, %v3306_v24  ;;  %v3275_v62 = vsel %vm6291_vm9, %v5192_v14, %v3274_v19  ;;  %v5605_v7 = vld [vmem:[%s7066_s20 + $0x4] sm:$0xf]  ;;  %v5606_v14 = vld [vmem:[%s7066_s20 + $0x40] sm:$0xf] }
 0x33c   : >> { %v5225_v43 = vcombine.low %v3128_v61, %v3138_v26  ;;  %v3276_v54 = vrot.slane %v3274_v19, 4  ;;  %v3310_v18 = vsel %vm6291_vm9, %v5197_v22, %v3309_v63  ;;  %v3311_v16 = vrot.slane %v3309_v63, 4 }
 0x33d   : >> { %3502 = vrot.lane.b32.xlu1 %v5236_v2, %s5741_s29  ;;  %v5193_v36 = vrot.slane %v3234_v9, 10  ;;  %v3281_v59 = vrot.slane %v7363_v46, 6  ;;  %v3284_v8 = vrot.slane %v7484_v34, 6  ;;  %v5204_v17 = vcombine.low %v7288_v11, %v7294_v57 }
 0x33e   : >> { %3456 = vrot.lane.b32.xlu0 %v5225_v43, %s5740_s18  ;;  %v3278_v47 = vsel %vm6291_vm9, %v3276_v54, %v3277_v38  ;;  %v3313_v40 = vsel %vm6291_vm9, %v3311_v16, %v3312_v27  ;;  %v5200_v34 = vcombine.low %v7310_v12, %v7316_v28  ;;  %v5205_v1 = vcombine.low %v7330_v21, %v7339_v49 }
 0x33f   : >> { %v5232_v35 = vcombine.low %v3275_v62, %v3278_v47  ;;  %v5237_v50 = vcombine.low %v3310_v18, %v3313_v40  ;;  %v3282_v45 = vsel %vm6291_vm9, %v5193_v36, %v3281_v59  ;;  %v3283_v15 = vrot.slane %v3281_v59, 4 }
 0x340   : >> { %v5201_v33 = vcombine.low %v7352_v20, %v7363_v46  ;;  %v5202_v3 = vcombine.low %v7167_v31, %v5604_v25  ;;  %v5198_v10 = vcombine.low %v7132_v51, %v5605_v7  ;;  %v5203_v41 = vcombine.low %v7149_v58, %v5606_v14  ;;  %v3590_v14 = vld [vmem:[#allocation5 + $0x50] sm:$0xff]  ;;  %v3591_v20 = vld [vmem:[#allocation5 + $0x58] sm:$0xff] }
 0x341   : >> { %3504 = vrot.lane.b32.xlu1 %v5237_v50, %s5741_s29  ;;  %v3285_v39 = vsel %vm6291_vm9, %v3283_v15, %v3284_v8  ;;  %v5199_v24 = vcombine.low %v7122_v29, %v7110_v6 }
 0x342   : >> { %3494 = vrot.lane.b32.xlu0 %v5232_v35, %s5741_s29  ;;  %v5233_v48 = vcombine.low %v3282_v45, %v3285_v39 }
 0x346   : >> { %3496 = vrot.lane.b32.xlu0 %v5233_v48, %s5741_s29 }
 0x356   : >> { %v3419_v23 = vpop.permute.xlu1 %3418 }
 0x359   : >> { %v3411_v30 = vpop.permute.xlu0 %3410 }
 0x35a   : >> { %v3421_v55 = vpop.permute.xlu1 %3420 }
 0x35d   : >> { %v3413_v5 = vpop.permute.xlu0 %3412 }
 0x364   : >> { %v3373_v13 = vpop.permute.xlu1 %3372 }
 0x365   : >> { %v3511_v26 = vsel %vm1967_vm11, %v5199_v24, %v3373_v13 }
 0x366   : >> { %v3533_v18 = vsel %vm769_vm2, %v3511_v26, %v3413_v5 }
 0x367   : >> { %v3371_v42 = vpop.permute.xlu0 %3370 }
 0x368   : >> { %v3508_v22 = vsel %vm1967_vm11, %v5198_v10, %v3371_v42 }
 0x369   : >> { %v3531_v58 = vsel %vm769_vm2, %v3508_v22, %v3411_v30  ;;  %v3580_v22 = vld [vmem:[#allocation5] sm:$0xff] }
 0x36a   : >> { %v3381_v60 = vpop.permute.xlu1 %3380 }
 0x36b   : >> { %v3523_v63 = vsel %vm1967_vm11, %v5203_v41, %v3381_v60 }
 0x36c   : >> { %v3541_v61 = vsel %vm769_vm2, %v3523_v63, %v3421_v55 }
 0x36f   : >> { %v3379_v37 = vpop.permute.xlu0 %3378 }
 0x370   : >> { %v3520_v44 = vsel %vm1967_vm11, %v5202_v3, %v3379_v37 }
 0x371   : >> { %v3539_v38 = vsel %vm769_vm2, %v3520_v44, %v3419_v23  ;;  %v3588_v44 = vld [vmem:[#allocation5 + $0x40] sm:$0xff] }
 0x372   : >> { %v3459_v4 = vpop.permute.xlu1 %3458 }
 0x373   : >> { %v3556_v31 = vsel %vm2028_vm12, %v3539_v38, %v3459_v4  ;;  %v3582_v38 = vld [vmem:[#allocation5 + $0x10] sm:$0xff] }
 0x376   : >> { %v3451_v0 = vpop.permute.xlu0 %3450 }
 0x377   : >> { %v3548_v6 = vsel %vm2028_vm12, %v3531_v58, %v3451_v0  ;;  %v3583_v58 = vld [vmem:[#allocation5 + $0x18] sm:$0xff] }
 0x37b   : >> { %v3461_v19 = vpop.permute.xlu1 %3460 }
 0x37c   : >> { %v3558_v29 = vsel %vm2028_vm12, %v3541_v61, %v3461_v19 }
 0x37f   : >> { %v3453_v27 = vpop.permute.xlu0 %3452  ;;  %v3499_v9 = vpop.permute.xlu1 %3498 }
 0x380   : >> { %v3573_v51 = vsel %vm2053_vm14, %v3556_v31, %v3499_v9  ;;  %v3550_v16 = vsel %vm2028_vm12, %v3533_v18, %v3453_v27  ;;  %v3589_v31 = vld [vmem:[#allocation5 + $0x48] sm:$0xff]  ;;  %v3594_v18 = vld [vmem:[#allocation5 + $0x70] sm:$0xff] }
 0x381   : >> { %5425 = vmatprep.mubr.msk.bf16.mxu1 %vm2145_vm15, %v3573_v51 }
 0x383   : >> { %v3491_v2 = vpop.permute.xlu0 %3490  ;;  %v3501_v62 = vpop.permute.xlu1 %3500 }
 0x384   : >> { %v3565_v43 = vsel %vm2053_vm14, %v3548_v6, %v3491_v2  ;;  %v3575_v54 = vsel %vm2053_vm14, %v3558_v29, %v3501_v62  ;;  %v3581_v2 = vld [vmem:[#allocation5 + $0x8] sm:$0xff] }
 0x385   : >> { %5417 = vmatprep.mubr.msk.bf16.mxu0 %vm2145_vm15, %v3565_v43  ;;  %5426 = vmatmul.mubr.msk.bf16.vlgmr.msra.gmra.mxu1 %vm2145_vm15, %v3575_v54 }
 0x387   : >> { %v3493_v36 = vpop.permute.xlu0 %3492 }
 0x388   : >> { %v3567_v59 = vsel %vm2053_vm14, %v3550_v16, %v3493_v36  ;;  %v3592_v36 = vld [vmem:[#allocation5 + $0x60] sm:$0xff] }
 0x389   : >> { %5418 = vmatmul.mubr.msk.bf16.vlgmr.msra.gmra.mxu0 %vm2145_vm15, %v3567_v59 }
 0x38c   : >> { %v3383_v8 = vpop.permute.xlu1 %3382 }
 0x38d   : >> { %v3526_v55 = vsel %vm1967_vm11, %v5204_v17, %v3383_v8 }
 0x38f   : >> { %v3375_v47 = vpop.permute.xlu0 %3374 }
 0x390   : >> { %v3514_v11 = vsel %vm1967_vm11, %v5200_v34, %v3375_v47  ;;  %v3595_v47 = vld [vmem:[#allocation5 + $0x78] sm:$0xff] }
 0x394   : >> { %v3385_v40 = vpop.permute.xlu1 %3384 }
 0x395   : >> { %v3529_v4 = vsel %vm1967_vm11, %v5205_v1, %v3385_v40  ;;  %v3586_v40 = vld [vmem:[#allocation5 + $0x30] sm:$0xff] }
 0x398   : >> { %v3377_v35 = vpop.permute.xlu0 %3376  ;;  %v3423_v50 = vpop.permute.xlu1 %3422 }
 0x399   : >> { %v3543_v5 = vsel %vm769_vm2, %v3526_v55, %v3423_v50  ;;  %v3517_v12 = vsel %vm1967_vm11, %v5201_v33, %v3377_v35 }
 0x39c   : >> { %v3415_v45 = vpop.permute.xlu0 %3414  ;;  %v3425_v15 = vpop.permute.xlu1 %3424 }
 0x39d   : >> { %v3545_v57 = vsel %vm769_vm2, %v3529_v4, %v3425_v15  ;;  %v3535_v17 = vsel %vm769_vm2, %v3514_v11, %v3415_v45  ;;  %v3593_v45 = vld [vmem:[#allocation5 + $0x68] sm:$0xff] }
 0x3a0   : >> { %v3417_v39 = vpop.permute.xlu0 %3416 }
 0x3a1   : >> { %v3537_v28 = vsel %vm769_vm2, %v3517_v12, %v3417_v39  ;;  %v3584_v39 = vld [vmem:[#allocation5 + $0x20] sm:$0xff] }
 0x3a3   : >> { %v3463_v48 = vpop.permute.xlu1 %3462 }
 0x3a4   : >> { %v3560_v13 = vsel %vm2028_vm12, %v3543_v5, %v3463_v48  ;;  %v3587_v5 = vld [vmem:[#allocation5 + $0x38] sm:$0xff] }
 0x3a6   : >> { %v3455_v23 = vpop.permute.xlu0 %3454 }
 0x3a7   : >> { %v3552_v0 = vsel %vm2028_vm12, %v3535_v17, %v3455_v23 }
 0x3ab   : >> { %v3465_v30 = vpop.permute.xlu1 %3464 }
 0x3ac   : >> { %v3562_v25 = vsel %vm2028_vm12, %v3545_v57, %v3465_v30 }
 0x3af   : >> { %v3503_v42 = vpop.permute.xlu1 %3502 }
 0x3b0   : >> { %v3457_v60 = vpop.permute.xlu0 %3456  ;;  %v3577_v37 = vsel %vm2053_vm14, %v3560_v13, %v3503_v42 }
 0x3b1   : >> { %5429 = vmatprep.mubr.msk.bf16.mxu1 %vm2145_vm15, %v3577_v37  ;;  %v3554_v34 = vsel %vm2028_vm12, %v3537_v28, %v3457_v60  ;;  %v3585_v37 = vld [vmem:[#allocation5 + $0x28] sm:$0xff] }
 0x3b3   : >> { %v3505_v3 = vpop.permute.xlu1 %3504 }
 0x3b4   : >> { %v3495_v7 = vpop.permute.xlu0 %3494  ;;  %v3579_v21 = vsel %vm2053_vm14, %v3562_v25, %v3505_v3 }
 0x3b5   : >> { %v3569_v49 = vsel %vm2053_vm14, %v3552_v0, %v3495_v7  ;;  %5430 = vmatmul.mubr.msk.bf16.gmra.mxu1 %vm2145_vm15, %v3579_v21 }
 0x3b6   : >> { %5421 = vmatprep.mubr.msk.bf16.mxu0 %vm2145_vm15, %v3569_v49 }
 0x3b8   : >> { %v3497_v1 = vpop.permute.xlu0 %3496 }
 0x3b9   : >> { %v3571_v10 = vsel %vm2053_vm14, %v3554_v34, %v3497_v1 }
 0x3ba   : >> { %5422 = vmatmul.mubr.msk.bf16.gmra.mxu0 %vm2145_vm15, %v3571_v10 }
 0x445   : >> { %v5427_v41 = vpop.f32.mrf.mxu1 }
 0x446   : >> { %v3763_v19 = vadd.f32 %v5427_v41, %v3590_v14 }
 0x447   : >> { %v3722_v24 = vpop.f32.mrf.mxu1 }
 0x448   : >> { %3779 = vst.msk [vmem:[#allocation5 + $0x50] sm:$0xff] %vm1967_vm11, %v3763_v19  ;;  %v3761_v46 = vadd.f32 %v3722_v24, %v3588_v44 }
 0x449   : >> { %v5419_v33 = vpop.f32.mrf.mxu0  ;;  %v5428_v63 = vpop.f32.mrf.mxu1 }
 0x44a   : >> { %v3755_v27 = vadd.f32 %v5419_v33, %v3582_v38  ;;  %3777 = vst.msk [vmem:[#allocation5 + $0x40] sm:$0xff] %vm1967_vm11, %v3761_v46  ;;  %v3764_v9 = vadd.f32 %v5428_v63, %v3591_v20 }
 0x44b   : >> { %v3690_v51 = vpop.f32.mrf.mxu0  ;;  %v3725_v61 = vpop.f32.mrf.mxu1 }
 0x44c   : >> { %3771 = vst.msk [vmem:[#allocation5 + $0x10] sm:$0xff] %vm1967_vm11, %v3755_v27  ;;  %v3753_v26 = vadd.f32 %v3690_v51, %v3580_v22  ;;  %3780 = vst.msk [vmem:[#allocation5 + $0x58] sm:$0xff] %vm1967_vm11, %v3764_v9  ;;  %v3762_v6 = vadd.f32 %v3725_v61, %v3589_v31 }
 0x44d   : >> { %v5420_v29 = vpop.f32.mrf.mxu0 }
 0x44e   : >> { %3769 = vst.msk [vmem:[#allocation5] sm:$0xff] %vm1967_vm11, %v3753_v26  ;;  %v3756_v62 = vadd.f32 %v5420_v29, %v3583_v58  ;;  %3778 = vst.msk [vmem:[#allocation5 + $0x48] sm:$0xff] %vm1967_vm11, %v3762_v6 }
 0x44f   : >> { %v3693_v43 = vpop.f32.mrf.mxu0  ;;  %v7646_v38 = vld [vmem:[#allocation5 + $0x50] sm:$0xff] (%p2719_p10) }
 0x450   : >> { %3772 = vst.msk [vmem:[#allocation5 + $0x18] sm:$0xff] %vm1967_vm11, %v3756_v62  ;;  %v3754_v54 = vadd.f32 %v3693_v43, %v3581_v2  ;;  %v3831_v20 = vsel (%p2719_p10), %vm1967_vm11, %v7646_v38, 0.0 }
 0x451   : > { %v7638_v14 = vld [vmem:[#allocation5 + $0x40] sm:$0xff] (%p2719_p10) }
 0x452   : >> { %3770 = vst.msk [vmem:[#allocation5 + $0x8] sm:$0xff] %vm1967_vm11, %v3754_v54  ;;  %v3825_v44 = vsel (%p2719_p10), %vm1967_vm11, %v7638_v14, 0.0 }
 0x453   : > { %v3787_v25 = vld [vmem:[#allocation5 + $0x10] sm:$0xff] (%p2719_p10)  ;;  %v7648_v24 = vld [vmem:[#allocation5 + $0x58] sm:$0xff] (%p2719_p10) }
 0x454   : > { %v3807_v7 = vsel (%p2719_p10), %vm1967_vm11, %v3787_v25, 0.0  ;;  %v3834_v46 = vsel (%p2719_p10), %vm1967_vm11, %v7648_v24, 0.0 }
 0x455   : > { %v3785_v17 = vld [vmem:[#allocation5] sm:$0xff] (%p2719_p10)  ;;  %3808 = vadd.xlane.f32.xlu1 (%p2719_p10), %v3807_v7  ;;  %v7640_v41 = vld [vmem:[#allocation5 + $0x48] sm:$0xff] (%p2719_p10) }
 0x456   : > { %v3801_v0 = vsel (%p2719_p10), %vm1967_vm11, %v3785_v17, 0.0  ;;  %v3828_v19 = vsel (%p2719_p10), %vm1967_vm11, %v7640_v41, 0.0 }
 0x457   : > { %v3788_v21 = vld [vmem:[#allocation5 + $0x18] sm:$0xff] (%p2719_p10)  ;;  %3802 = vadd.xlane.f32.xlu0 (%p2719_p10), %v3801_v0 }
 0x458   : > { %v3810_v12 = vsel (%p2719_p10), %vm1967_vm11, %v3788_v21, 0.0 }
 0x459   : > { %v3786_v3 = vld [vmem:[#allocation5 + $0x8] sm:$0xff] (%p2719_p10)  ;;  %3811 = vadd.xlane.f32.xlu1 (%p2719_p10), %v3810_v12 }
 0x45a   : > { %v3804_v49 = vsel (%p2719_p10), %vm1967_vm11, %v3786_v3, 0.0 }
 0x45b   : > { %3805 = vadd.xlane.f32.xlu0 (%p2719_p10), %v3804_v49 }
 0x475   : >> { %v5431_v16 = vpop.f32.mrf.mxu1 }
 0x476   : >> { %v3767_v59 = vadd.f32 %v5431_v16, %v3594_v18 }
 0x477   : >> { %v3738_v8 = vpop.f32.mrf.mxu1 }
 0x478   : >> { %3783 = vst.msk [vmem:[#allocation5 + $0x70] sm:$0xff] %vm1967_vm11, %v3767_v59  ;;  %v3765_v35 = vadd.f32 %v3738_v8, %v3592_v36 }
 0x479   : >> { %v5432_v50 = vpop.f32.mrf.mxu1 }
 0x47a   : >> { %v5423_v15 = vpop.f32.mrf.mxu0  ;;  %3781 = vst.msk [vmem:[#allocation5 + $0x60] sm:$0xff] %vm1967_vm11, %v3765_v35  ;;  %v3768_v48 = vadd.f32 %v5432_v50, %v3595_v47 }
 0x47b   : >> { %v3759_v23 = vadd.f32 %v5423_v15, %v3586_v40  ;;  %v3741_v30 = vpop.f32.mrf.mxu1 }
 0x47c   : >> { %v3706_v55 = vpop.f32.mrf.mxu0  ;;  %3784 = vst.msk [vmem:[#allocation5 + $0x78] sm:$0xff] %vm1967_vm11, %v3768_v48  ;;  %v3766_v13 = vadd.f32 %v3741_v30, %v3593_v45 }
 0x47d   : >> { %3775 = vst.msk [vmem:[#allocation5 + $0x30] sm:$0xff] %vm1967_vm11, %v3759_v23  ;;  %v3757_v42 = vadd.f32 %v3706_v55, %v3584_v39 }
 0x47e   : >> { %v5424_v60 = vpop.f32.mrf.mxu0  ;;  %3782 = vst.msk [vmem:[#allocation5 + $0x68] sm:$0xff] %vm1967_vm11, %v3766_v13 }
 0x47f   : >> { %3773 = vst.msk [vmem:[#allocation5 + $0x20] sm:$0xff] %vm1967_vm11, %v3757_v42  ;;  %v3760_v4 = vadd.f32 %v5424_v60, %v3587_v5  ;;  %2721 = sbr.rel (!%p2719_p10) target bundleno = 729 (0x2d9), region = 140  ;;  %v7662_v27 = vld [vmem:[#allocation5 + $0x70] sm:$0xff] (%p2719_p10) }
 0x480   : >> { %v3709_v11 = vpop.f32.mrf.mxu0  ;;  %v3843_v51 = vsel (%p2719_p10), %vm1967_vm11, %v7662_v27, 0.0 }
 0x481   : >> { %3776 = vst.msk [vmem:[#allocation5 + $0x38] sm:$0xff] %vm1967_vm11, %v3760_v4  ;;  %v3758_v57 = vadd.f32 %v3709_v11, %v3585_v37  ;;  %v7654_v33 = vld [vmem:[#allocation5 + $0x60] sm:$0xff] (%p2719_p10) }
 0x482   : > { %v3837_v63 = vsel (%p2719_p10), %vm1967_vm11, %v7654_v33, 0.0 }
 0x483   : >> { %3774 = vst.msk [vmem:[#allocation5 + $0x28] sm:$0xff] %vm1967_vm11, %v3758_v57  ;;  %v7664_v9 = vld [vmem:[#allocation5 + $0x78] sm:$0xff] (%p2719_p10) }
 0x484   : > { %v7630_v52 = vld [vmem:[#allocation5 + $0x30] sm:$0xff]  ;;  %v3846_v58 = vsel %vm1967_vm11, %v7664_v9, 0.0 }
 0x485   : > { %v3819_v32 = vsel %vm1967_vm11, %v7630_v52, 0.0  ;;  %v7656_v22 = vld [vmem:[#allocation5 + $0x68] sm:$0xff] }
 0x486   : > { %v3789_v28 = vld [vmem:[#allocation5 + $0x20] sm:$0xff]  ;;  %v3840_v31 = vsel %vm1967_vm11, %v7656_v22, 0.0 }
 0x487   : > { %v3813_v1 = vsel %vm1967_vm11, %v3789_v28, 0.0 }
 0x488   : > { %v7632_v56 = vld [vmem:[#allocation5 + $0x38] sm:$0xff]  ;;  %3814 = vadd.xlane.f32.xlu0 %v3813_v1 }
 0x489   : > { %v3822_v10 = vsel %vm1967_vm11, %v7632_v56, 0.0 }
 0x48a   : > { %v3790_v34 = vld [vmem:[#allocation5 + $0x28] sm:$0xff] }
 0x48b   : > { %v3816_v53 = vsel %vm1967_vm11, %v3790_v34, 0.0 }
 0x48c   : > { %3817 = vadd.xlane.f32.xlu1 %v3816_v53  ;;  %3820 = vadd.xlane.f32.xlu0 %v3819_v32 }
 0x490   : > { %3823 = vadd.xlane.f32.xlu1 %v3822_v10  ;;  %3826 = vadd.xlane.f32.xlu0 %v3825_v44 }
 0x494   : > { %3829 = vadd.xlane.f32.xlu1 %v3828_v19  ;;  %3832 = vadd.xlane.f32.xlu0 %v3831_v20 }
 0x498   : > { %3835 = vadd.xlane.f32.xlu1 %v3834_v46  ;;  %3838 = vadd.xlane.f32.xlu0 %v3837_v63 }
 0x49c   : > { %3841 = vadd.xlane.f32.xlu1 %v3840_v31  ;;  %3844 = vadd.xlane.f32.xlu0 %v3843_v51 }
 0x4a0   : > { %3847 = vadd.xlane.f32.xlu1 %v3846_v58 }
 0x4de   : > { %v3809_v26 = vpop.xlane.xlu1 %3808 }
 0x4df   : > { %v3852_v29 = vmul.f32 0.0625, %v3809_v26 }
 0x4e0   : > { %v3803_v61 = vpop.xlane.xlu0 %3802 }
 0x4e1   : > { %v3850_v6 = vmul.f32 0.0625, %v3803_v61  ;;  %v7672_v62 = vsub.f32 %v3787_v25, %v3852_v29 }
 0x4e2   : > { %v3812_v54 = vpop.xlane.xlu1 %3811 }
 0x4e3   : > { %v7670_v2 = vsub.f32 %v3785_v17, %v3850_v6  ;;  %v3853_v16 = vmul.f32 0.0625, %v3812_v54  ;;  %v3884_v59 = vmul.f32 %v7672_v62, %v7672_v62 }
 0x4e4   : > { %v3806_v43 = vpop.xlane.xlu0 %3805 }
 0x4e5   : > { %v3851_v18 = vmul.f32 0.0625, %v3806_v43  ;;  %v3882_v36 = vmul.f32 %v7670_v2, %v7670_v2  ;;  %v7680_v47 = vsub.f32 %v3788_v21, %v3853_v16  ;;  %v3904_v45 = vsel %vm1967_vm11, %v3884_v59, 0.0 }
 0x4e7   : > { %v7678_v8 = vsub.f32 %v3786_v3, %v3851_v18  ;;  %v3898_v40 = vsel %vm1967_vm11, %v3882_v36, 0.0  ;;  %v3885_v23 = vmul.f32 %v7680_v47, %v7680_v47 }
 0x4e8   : > { %3899 = vadd.xlane.f32.xlu0 %v3898_v40 }
 0x4e9   : > { %v3883_v48 = vmul.f32 %v7678_v8, %v7678_v8  ;;  %v3907_v60 = vsel %vm1967_vm11, %v3885_v23, 0.0 }
 0x4eb   : > { %v3901_v5 = vsel %vm1967_vm11, %v3883_v48, 0.0 }
 0x4ec   : > { %3905 = vadd.xlane.f32.xlu0 %v3904_v45  ;;  %3902 = vadd.xlane.f32.xlu1 %v3901_v5 }
 0x4f0   : > { %3908 = vadd.xlane.f32.xlu1 %v3907_v60 }
 0x511   : > { %v3815_v35 = vpop.xlane.xlu0 %3814 }
 0x512   : > { %v3854_v15 = vmul.f32 0.0625, %v3815_v35 }
 0x514   : > { %v7688_v30 = vsub.f32 %v3789_v28, %v3854_v15 }
 0x515   : > { %v3818_v50 = vpop.xlane.xlu1 %3817  ;;  %v3821_v13 = vpop.xlane.xlu0 %3820 }
 0x516   : > { %v3855_v39 = vmul.f32 0.0625, %v3818_v50  ;;  %v3856_v37 = vmul.f32 0.0625, %v3821_v13  ;;  %v3886_v11 = vmul.f32 %v7688_v30, %v7688_v30 }
 0x518   : > { %v7690_v55 = vsub.f32 %v3790_v34, %v3855_v39  ;;  %v7699_v17 = vsub.f32 %v7630_v52, %v3856_v37  ;;  %v3910_v3 = vsel %vm1967_vm11, %v3886_v11, 0.0 }
 0x519   : > { %v3824_v42 = vpop.xlane.xlu1 %3823  ;;  %3911 = vadd.xlane.f32.xlu0 %v3910_v3  ;;  %v3827_v0 = vpop.xlane.xlu0 %3826 }
 0x51a   : > { %v3857_v4 = vmul.f32 0.0625, %v3824_v42  ;;  %v3887_v57 = vmul.f32 %v7690_v55, %v7690_v55  ;;  %v3858_v49 = vmul.f32 0.0625, %v3827_v0  ;;  %v3888_v28 = vmul.f32 %v7699_v17, %v7699_v17 }
 0x51c   : > { %v7702_v25 = vsub.f32 %v7632_v56, %v3857_v4  ;;  %v3913_v21 = vsel %vm1967_vm11, %v3887_v57, 0.0  ;;  %v7711_v1 = vsub.f32 %v7638_v14, %v3858_v49  ;;  %v3916_v52 = vsel %vm1967_vm11, %v3888_v28, 0.0 }
 0x51d   : > { %v3830_v7 = vpop.xlane.xlu1 %3829  ;;  %3914 = vadd.xlane.f32.xlu1 %v3913_v21  ;;  %3917 = vadd.xlane.f32.xlu0 %v3916_v52  ;;  %v3833_v56 = vpop.xlane.xlu0 %3832 }
 0x51e   : > { %v3859_v12 = vmul.f32 0.0625, %v3830_v7  ;;  %v3889_v34 = vmul.f32 %v7702_v25, %v7702_v25  ;;  %v3860_v44 = vmul.f32 0.0625, %v3833_v56  ;;  %v3890_v20 = vmul.f32 %v7711_v1, %v7711_v1 }
 0x520   : > { %v7714_v53 = vsub.f32 %v7640_v41, %v3859_v12  ;;  %v3919_v10 = vsel %vm1967_vm11, %v3889_v34, 0.0  ;;  %v7723_v46 = vsub.f32 %v7646_v38, %v3860_v44  ;;  %v3922_v63 = vsel %vm1967_vm11, %v3890_v20, 0.0 }
 0x521   : > { %v3836_v32 = vpop.xlane.xlu1 %3835  ;;  %3920 = vadd.xlane.f32.xlu1 %v3919_v10  ;;  %3923 = vadd.xlane.f32.xlu0 %v3922_v63  ;;  %v3839_v31 = vpop.xlane.xlu0 %3838 }
 0x522   : > { %v3861_v19 = vmul.f32 0.0625, %v3836_v32  ;;  %v3891_v14 = vmul.f32 %v7714_v53, %v7714_v53  ;;  %v3862_v61 = vmul.f32 0.0625, %v3839_v31  ;;  %v3892_v6 = vmul.f32 %v7723_v46, %v7723_v46 }
 0x524   : > { %v7726_v41 = vsub.f32 %v7648_v24, %v3861_v19  ;;  %v3925_v58 = vsel %vm1967_vm11, %v3891_v14, 0.0  ;;  %v7735_v29 = vsub.f32 %v7654_v33, %v3862_v61  ;;  %v3928_v43 = vsel %vm1967_vm11, %v3892_v6, 0.0  ;;  %v7767_v61 = vld [vmem:[%s8373_s5] ss:$0 sm:$0xff] }
 0x525   : > { %v3842_v51 = vpop.xlane.xlu1 %3841  ;;  %3926 = vadd.xlane.f32.xlu1 %v3925_v58  ;;  %3929 = vadd.xlane.f32.xlu0 %v3928_v43  ;;  %v3845_v54 = vpop.xlane.xlu0 %3844 }
 0x526   : > { %v3863_v26 = vmul.f32 0.0625, %v3842_v51  ;;  %v3893_v38 = vmul.f32 %v7726_v41, %v7726_v41  ;;  %v3864_v36 = vmul.f32 0.0625, %v3845_v54  ;;  %v3894_v40 = vmul.f32 %v7735_v29, %v7735_v29 }
 0x528   : > { %v7738_v24 = vsub.f32 %v7656_v22, %v3863_v26  ;;  %v3931_v16 = vsel %vm1967_vm11, %v3893_v38, 0.0  ;;  %v7747_v35 = vsub.f32 %v7662_v27, %v3864_v36  ;;  %v3934_v50 = vsel %vm1967_vm11, %v3894_v40, 0.0 }
 0x529   : > { %v3848_v18 = vpop.xlane.xlu1 %3847  ;;  %3932 = vadd.xlane.f32.xlu1 %v3931_v16  ;;  %3935 = vadd.xlane.f32.xlu0 %v3934_v50 }
 0x52a   : > { %v3865_v59 = vmul.f32 0.0625, %v3848_v18  ;;  %v3895_v33 = vmul.f32 %v7738_v24, %v7738_v24  ;;  %v3896_v15 = vmul.f32 %v7747_v35, %v7747_v35 }
 0x52c   : > { %v7750_v22 = vsub.f32 %v7664_v9, %v3865_v59  ;;  %v3937_v45 = vsel %vm1967_vm11, %v3895_v33, 0.0  ;;  %v3940_v48 = vsel %vm1967_vm11, %v3896_v15, 0.0  ;;  %v5607_v9 = vld [vmem:[%s8375_s7] sm:$0xff]  }
 0x52d   : > { %3938 = vadd.xlane.f32.xlu1 %v3937_v45  ;;  %3941 = vadd.xlane.f32.xlu0 %v3940_v48 }
 0x52e   : > { %v3897_v39 = vmul.f32 %v7750_v22, %v7750_v22  ;;  %5433 = vmatprep.subr.bf16.mxu0 %v5607_v9 }
 0x52f   : > { %5434 = vmatpush3.bf16.msra.mxu0 %v5607_v9 }
 0x530   : > { %v3943_v27 = vsel %vm1967_vm11, %v3897_v39, 0.0 }
 0x531   : > { %3944 = vadd.xlane.f32.xlu1 %v3943_v27 }
 0x571   : > { %v3900_v23 = vpop.xlane.xlu0 %3899 }
 0x572   : > { %v3946_v5 = vmul.f32 0.0625, %v3900_v23 }
 0x574   : > { %v3962_v13 = vadd.f32 1e-06, %v3946_v5 }
 0x575   : > { %v3903_v42 = vpop.xlane.xlu1 %3902  ;;  %v3906_v60 = vpop.xlane.xlu0 %3905 }
 0x576   : > { %5610 = vrsqrt.f32 %v3962_v13  ;;  %v3947_v37 = vmul.f32 0.0625, %v3903_v42  ;;  %v3948_v4 = vmul.f32 0.0625, %v3906_v60 }
 0x578   : > { %v3963_v11 = vadd.f32 1e-06, %v3947_v37  ;;  %v3964_v57 = vadd.f32 1e-06, %v3948_v4 }
 0x579   : > { %v3909_v3 = vpop.xlane.xlu1 %3908 }
 0x57a   : > { %5612 = vrsqrt.f32 %v3963_v11  ;;  %v3949_v7 = vmul.f32 0.0625, %v3909_v3 }
 0x57b   : > { %5614 = vrsqrt.f32 %v3964_v57 }
 0x57c   : > { %v3965_v49 = vadd.f32 1e-06, %v3949_v7 }
 0x57e   : > { %5616 = vrsqrt.f32 %v3965_v49 }
 0x583   : > { %v5611_v63 = vpop.eup %5610 }
 0x584   : > { %v3994_v58 = vmul.f32 %v5611_v63, %v7670_v2  ;;  %v7774_v2 = vld [vmem:[%s8374_s6] ss:$0 sm:$0xff] }
 0x586   : > { %v4017_v18 = vmul.f32 %v7767_v61, %v3994_v58 }
 0x587   : > { %v5613_v54 = vpop.eup %5612 }
 0x588   : > { %v5615_v16 = vpop.eup %5614  ;;  %v3995_v40 = vmul.f32 %v5613_v54, %v7678_v8  ;;  %v4040_v9 = vadd.f32 %v7774_v2, %v4017_v18 }
 0x589   : > { %v3996_v45 = vmul.f32 %v5615_v16, %v7672_v62 }
 0x58a   : > { %v4018_v48 = vmul.f32 %v7767_v61, %v3995_v40 }
 0x58b   : > { %v5617_v27 = vpop.eup %5616  ;;  %v4019_v62 = vmul.f32 %v7767_v61, %v3996_v45 }
 0x58c   : > { %v4041_v13 = vadd.f32 %v7774_v2, %v4018_v48  ;;  %v3997_v42 = vmul.f32 %v5617_v27, %v7680_v47 }
 0x58e   : > { %v4056_v3 = vpack.c.bf16 %v4041_v13, %v4040_v9  ;;  %v4020_v7 = vmul.f32 %v7767_v61, %v3997_v42 }
 0x590   : > { %5435 = vmatprep.mubr.msk.bf16.mxu0 %vm1967_vm11, %v4056_v3 }
 0x5a2   : > { %v3912_v0 = vpop.xlane.xlu0 %3911 }
 0x5a3   : > { %v3950_v21 = vmul.f32 0.0625, %v3912_v0 }
 0x5a5   : > { %v3966_v12 = vadd.f32 1e-06, %v3950_v21 }
 0x5a6   : > { %v3915_v28 = vpop.xlane.xlu1 %3914  ;;  %v3918_v34 = vpop.xlane.xlu0 %3917 }
 0x5a7   : > { %v3951_v52 = vmul.f32 0.0625, %v3915_v28  ;;  %v3952_v56 = vmul.f32 0.0625, %v3918_v34  ;;  %5618 = vrsqrt.f32 %v3966_v12 }
 0x5a9   : > { %v3967_v32 = vadd.f32 1e-06, %v3951_v52  ;;  %v3968_v10 = vadd.f32 1e-06, %v3952_v56  ;;  %v4043_v52 = vadd.f32 %v7774_v2, %v4020_v7 }
 0x5aa   : > { %v3921_v44 = vpop.xlane.xlu1 %3920  ;;  %v3924_v19 = vpop.xlane.xlu0 %3923 }
 0x5ab   : > { %5620 = vrsqrt.f32 %v3967_v32  ;;  %v3953_v20 = vmul.f32 0.0625, %v3921_v44  ;;  %v3954_v14 = vmul.f32 0.0625, %v3924_v19 }
 0x5ac   : > { %5622 = vrsqrt.f32 %v3968_v10 }
 0x5ad   : > { %v3969_v31 = vadd.f32 1e-06, %v3953_v20  ;;  %v3970_v51 = vadd.f32 1e-06, %v3954_v14 }
 0x5ae   : > { %v3927_v26 = vpop.xlane.xlu1 %3926  ;;  %v3930_v6 = vpop.xlane.xlu0 %3929 }
 0x5af   : > { %5624 = vrsqrt.f32 %v3969_v31  ;;  %v3955_v38 = vmul.f32 0.0625, %v3927_v26  ;;  %v3956_v43 = vmul.f32 0.0625, %v3930_v6 }
 0x5b0   : > { %5626 = vrsqrt.f32 %v3970_v51 }
 0x5b1   : > { %v3971_v36 = vadd.f32 1e-06, %v3955_v38  ;;  %v3972_v59 = vadd.f32 1e-06, %v3956_v43 }
 0x5b2   : > { %v3933_v33 = vpop.xlane.xlu1 %3932  ;;  %v3936_v50 = vpop.xlane.xlu0 %3935 }
 0x5b3   : > { %5628 = vrsqrt.f32 %v3971_v36  ;;  %v3957_v15 = vmul.f32 0.0625, %v3933_v33  ;;  %v3958_v39 = vmul.f32 0.0625, %v3936_v50 }
 0x5b4   : > { %5630 = vrsqrt.f32 %v3972_v59  ;;  %v5619_v23 = vpop.eup %5618 }
 0x5b5   : > { %v3973_v8 = vadd.f32 1e-06, %v3957_v15  ;;  %v3974_v5 = vadd.f32 1e-06, %v3958_v39  ;;  %v3998_v4 = vmul.f32 %v5619_v23, %v7688_v30  ;;  %v4042_v30 = vadd.f32 %v7774_v2, %v4019_v62 }
 0x5b6   : > { %v3939_v60 = vpop.xlane.xlu1 %3938  ;;  %v3942_v37 = vpop.xlane.xlu0 %3941 }
 0x5b7   : > { %5632 = vrsqrt.f32 %v3973_v8  ;;  %v3959_v11 = vmul.f32 0.0625, %v3939_v60  ;;  %v3960_v57 = vmul.f32 0.0625, %v3942_v37  ;;  %v4021_v21 = vmul.f32 %v7767_v61, %v3998_v4 }
 0x5b8   : > { %v5621_v0 = vpop.eup %5620  ;;  %5634 = vrsqrt.f32 %v3974_v5  ;;  %v4057_v19 = vpack.c.bf16 %v4043_v52, %v4042_v30 }
 0x5b9   : > { %v5623_v49 = vpop.eup %5622  ;;  %v3975_v12 = vadd.f32 1e-06, %v3959_v11  ;;  %v3976_v28 = vadd.f32 1e-06, %v3960_v57  ;;  %v3999_v47 = vmul.f32 %v5621_v0, %v7690_v55  ;;  %v4044_v20 = vadd.f32 %v7774_v2, %v4021_v21  ;;  %v5609_v0 = vld [vmem:[%s8377_s9] sm:$0xff]  }
 0x5ba   : > { %v3945_v34 = vpop.xlane.xlu1 %3944  ;;  %v4000_v56 = vmul.f32 %v5623_v49, %v7699_v17  ;;  %5436 = vmatmul.mubr.msk.bf16.vlgmr.msra.gmra.mxu0 %vm1967_vm11, %v4057_v19 }
 0x5bb   : > { %5636 = vrsqrt.f32 %v3975_v12  ;;  %v3961_v32 = vmul.f32 0.0625, %v3945_v34  ;;  %v4022_v10 = vmul.f32 %v7767_v61, %v3999_v47 }
 0x5bc   : > { %v5625_v44 = vpop.eup %5624  ;;  %5638 = vrsqrt.f32 %v3976_v28  ;;  %v4023_v51 = vmul.f32 %v7767_v61, %v4000_v56 }
 0x5bd   : > { %v5627_v14 = vpop.eup %5626  ;;  %v3977_v63 = vadd.f32 1e-06, %v3961_v32  ;;  %v4045_v55 = vadd.f32 %v7774_v2, %v4022_v10  ;;  %v4001_v31 = vmul.f32 %v5625_v44, %v7702_v25 }
 0x5be   : > { %v4002_v17 = vmul.f32 %v5627_v14, %v7711_v1  ;;  %v4046_v43 = vadd.f32 %v7774_v2, %v4023_v51 }
 0x5bf   : > { %5640 = vrsqrt.f32 %v3977_v63  ;;  %v4058_v58 = vpack.c.bf16 %v4045_v55, %v4044_v20  ;;  %v4024_v26 = vmul.f32 %v7767_v61, %v4001_v31 }
 0x5c0   : > { %v5629_v6 = vpop.eup %5628  ;;  %v4025_v18 = vmul.f32 %v7767_v61, %v4002_v17 }
 0x5c1   : > { %v5631_v38 = vpop.eup %5630  ;;  %5439 = vmatprep.mubr.msk.bf16.mxu0 %vm1967_vm11, %v4058_v58  ;;  %v4047_v54 = vadd.f32 %v7774_v2, %v4024_v26  ;;  %v4003_v25 = vmul.f32 %v5629_v6, %v7714_v53 }
 0x5c2   : > { %v4004_v16 = vmul.f32 %v5631_v38, %v7723_v46  ;;  %v4048_v33 = vadd.f32 %v7774_v2, %v4025_v18 }
 0x5c3   : > { %v4059_v36 = vpack.c.bf16 %v4047_v54, %v4046_v43  ;;  %v4026_v1 = vmul.f32 %v7767_v61, %v4003_v25 }
 0x5c4   : > { %v5633_v59 = vpop.eup %5632  ;;  %v4027_v15 = vmul.f32 %v7767_v61, %v4004_v16 }
 0x5c5   : > { %v5635_v40 = vpop.eup %5634  ;;  %v4049_v50 = vadd.f32 %v7774_v2, %v4026_v1  ;;  %v4005_v45 = vmul.f32 %v5633_v59, %v7726_v41  ;;  %5440 = vmatmul.mubr.msk.bf16.gmra.mxu0 %vm1967_vm11, %v4059_v36 }
 0x5c6   : > { %v4006_v53 = vmul.f32 %v5635_v40, %v7735_v29  ;;  %v4050_v9 = vadd.f32 %v7774_v2, %v4027_v15 }
 0x5c7   : > { %v4060_v39 = vpack.c.bf16 %v4049_v50, %v4048_v33  ;;  %v4028_v46 = vmul.f32 %v7767_v61, %v4005_v45 }
 0x5c8   : > { %v5637_v48 = vpop.eup %5636  ;;  %v4029_v41 = vmul.f32 %v7767_v61, %v4006_v53 }
 0x5c9   : > { %v5639_v27 = vpop.eup %5638  ;;  %5443 = vmatprep.mubr.msk.bf16.mxu0 %vm1967_vm11, %v4060_v39  ;;  %v4051_v23 = vadd.f32 %v7774_v2, %v4028_v46  ;;  %v4007_v8 = vmul.f32 %v5637_v48, %v7738_v24 }
 0x5ca   : > { %v4008_v5 = vmul.f32 %v5639_v27, %v7747_v35  ;;  %v4052_v60 = vadd.f32 %v7774_v2, %v4029_v41 }
 0x5cb   : > { %v4061_v13 = vpack.c.bf16 %v4051_v23, %v4050_v9  ;;  %v4030_v29 = vmul.f32 %v7767_v61, %v4007_v8 }
 0x5cc   : > { %v5641_v42 = vpop.eup %5640  ;;  %v4031_v4 = vmul.f32 %v7767_v61, %v4008_v5 }
 0x5cd   : > { %v4053_v37 = vadd.f32 %v7774_v2, %v4030_v29  ;;  %v4009_v62 = vmul.f32 %v5641_v42, %v7750_v22  ;;  %5444 = vmatmul.mubr.msk.bf16.gmra.mxu0 %vm1967_vm11, %v4061_v13  ;;  %v5608_v22 = vld [vmem:[%s8377_s9 + $0x8] sm:$0xff]  }
 0x5ce   : > { %v4054_v35 = vadd.f32 %v7774_v2, %v4031_v4  ;;  %5451 = vmatprep.subr.bf16.mxu1 %v5608_v22 }
 0x5cf   : > { %v4062_v11 = vpack.c.bf16 %v4053_v37, %v4052_v60  ;;  %v4032_v24 = vmul.f32 %v7767_v61, %v4009_v62  ;;  %5452 = vmatpush3.bf16.msra.mxu1 %v5608_v22 }
 0x5d0   : > { %5453 = vmatprep.subr.bf16.mxu1 %v5609_v0 }
 0x5d1   : > { %5447 = vmatprep.mubr.msk.bf16.mxu0 %vm1967_vm11, %v4062_v11  ;;  %v4055_v57 = vadd.f32 %v7774_v2, %v4032_v24  ;;  %v7838_v2 = vld [vmem:[%s8376_s8] ss:$0 sm:$0xff] }
 0x5d3   : > { %v4063_v3 = vpack.c.bf16 %v4055_v57, %v4054_v35  ;;  %5454 = vmatpush3.bf16.msra.mxu1 %v5609_v0 }
 0x5d5   : > { %5448 = vmatmul.mubr.msk.bf16.gmra.mxu0 %vm1967_vm11, %v4063_v3 }
 0x67a   : > { %v5437_v61 = vpop.f32.mrf.mxu0 }
 0x67b   : > { %v7841_v21 = vadd.f32 %v5437_v61, %v7838_v2 }
 0x67c   : > { %v4137_v7 = vpop.f32.mrf.mxu0 }
 0x67d   : > { %v4218_v12 = vmul.f32 0.70710677, %v7841_v21  ;;  %v7845_v28 = vadd.f32 %v7838_v2, %v4137_v7 }
 0x67e   : > { %v5438_v49 = vpop.f32.mrf.mxu0 }
 0x67f   : > { %v7848_v47 = vadd.f32 %v5438_v49, %v7838_v2  ;;  %v7850_v30 = vclamps-f32 %v4218_v12, 4.0  ;;  %v4216_v52 = vmul.f32 0.70710677, %v7845_v28 }
 0x680   : > { %v4140_v34 = vpop.f32.mrf.mxu0 }
 0x681   : > { %v4219_v56 = vmul.f32 0.70710677, %v7848_v47  ;;  %v7855_v32 = vadd.f32 %v7838_v2, %v4140_v34  ;;  %v7859_v44 = vmul.f32 %v7850_v30, %v7850_v30  ;;  %v7861_v19 = vclamps-f32 %v4216_v52, 4.0 }
 0x683   : > { %v7863_v20 = vclamps-f32 %v4219_v56, 4.0  ;;  %v4217_v14 = vmul.f32 0.70710677, %v7855_v32  ;;  %v4282_v31 = vmul.f32 -2.7261424e-10, %v7859_v44  ;;  %v7872_v51 = vmul.f32 %v7861_v19, %v7861_v19 }
 0x684   : > { %v4490_v59 = vmul.f32 -1.45660715e-05, %v7859_v44 }
 0x685   : > { %v5441_v10 = vpop.f32.mrf.mxu0  ;;  %v7876_v17 = vmul.f32 %v7863_v20, %v7863_v20  ;;  %v7878_v58 = vclamps-f32 %v4217_v14, 4.0  ;;  %v4298_v38 = vadd.f32 2.7706815e-08, %v4282_v31  ;;  %v4280_v43 = vmul.f32 -2.7261424e-10, %v7872_v51 }
 0x686   : > { %v7867_v63 = vadd.f32 %v5441_v10, %v7838_v2  ;;  %v4506_v48 = vadd.f32 -0.00021337405, %v4490_v59 }
 0x687   : > { %v4153_v55 = vpop.f32.mrf.mxu0  ;;  %v4283_v54 = vmul.f32 -2.7261424e-10, %v7876_v17  ;;  %v7888_v25 = vmul.f32 %v7878_v58, %v7878_v58  ;;  %v4314_v1 = vmul.f32 %v4298_v38, %v7859_v44  ;;  %v4296_v40 = vadd.f32 2.7706815e-08, %v4280_v43 }
 0x688   : > { %8407 = vst [vmem:[#allocation6_spill] sm:$0xff] %v7867_v63  ;;  %v4222_v26 = vmul.f32 0.70710677, %v7867_v63  ;;  %v7882_v6 = vadd.f32 %v7838_v2, %v4153_v55  ;;  %v4491_v50 = vmul.f32 -1.45660715e-05, %v7876_v17  ;;  %v4522_v42 = vmul.f32 %v4506_v48, %v7859_v44 }
 0x689   : > { %v5442_v36 = vpop.f32.mrf.mxu0  ;;  %v4299_v33 = vadd.f32 2.7706815e-08, %v4283_v54  ;;  %v4281_v45 = vmul.f32 -2.7261424e-10, %v7888_v25  ;;  %v4330_v46 = vadd.f32 -2.101024e-06, %v4314_v1  ;;  %v4312_v27 = vmul.f32 %v4296_v40, %v7872_v51 }
 0x68a   : > { %v7890_v18 = vclamps-f32 %v4222_v26, 4.0  ;;  %v4220_v16 = vmul.f32 0.70710677, %v7882_v6  ;;  %v4507_v23 = vadd.f32 -0.00021337405, %v4491_v50  ;;  %v7914_v29 = vadd.f32 %v5442_v36, %v7838_v2 }
 0x68b   : > { %v4156_v39 = vpop.f32.mrf.mxu0  ;;  %v4315_v9 = vmul.f32 %v4299_v33, %v7876_v17  ;;  %v4297_v8 = vadd.f32 2.7706815e-08, %v4281_v45  ;;  %v4328_v60 = vadd.f32 -2.101024e-06, %v4312_v27  ;;  %v4346_v62 = vmul.f32 %v4330_v46, %v7859_v44 }
 0x68c   : > { %v7899_v15 = vmul.f32 %v7890_v18, %v7890_v18  ;;  %v7901_v53 = vclamps-f32 %v4220_v16, 4.0  ;;  %v7911_v13 = vadd.f32 %v7838_v2, %v4156_v39  ;;  %8408 = vst [vmem:[#allocation7_spill] sm:$0xff] %v7914_v29  ;;  %v4523_v4 = vmul.f32 %v4507_v23, %v7876_v17 }
 0x68d   : > { %v4331_v37 = vadd.f32 -2.101024e-06, %v4315_v9  ;;  %v4313_v11 = vmul.f32 %v4297_v8, %v7888_v25  ;;  %v4223_v22 = vmul.f32 0.70710677, %v7914_v29  ;;  %v4538_v0 = vadd.f32 -0.001682827, %v4522_v42  ;;  %v5445_v27 = vpop.f32.mrf.mxu0 }
 0x68e   : > { %v4286_v41 = vmul.f32 -2.7261424e-10, %v7899_v15  ;;  %v7908_v5 = vmul.f32 %v7901_v53, %v7901_v53  ;;  %v4221_v57 = vmul.f32 0.70710677, %v7911_v13  ;;  %v4494_v3 = vmul.f32 -1.45660715e-05, %v7899_v15 }
 0x68f   : > { %v4344_v61 = vmul.f32 %v4328_v60, %v7872_v51  ;;  %v4347_v7 = vmul.f32 %v4331_v37, %v7876_v17  ;;  %v4362_v49 = vadd.f32 -5.6925062e-05, %v4346_v62  ;;  %v4539_v12 = vadd.f32 -0.001682827, %v4523_v4 }
 0x690   : > { %v4302_v24 = vadd.f32 2.7706815e-08, %v4286_v41  ;;  %v4284_v35 = vmul.f32 -2.7261424e-10, %v7908_v5  ;;  %v4329_v34 = vadd.f32 -2.101024e-06, %v4313_v11  ;;  %v4554_v26 = vmul.f32 %v4538_v0, %v7859_v44 }
 0x691   : > { %v4492_v10 = vmul.f32 -1.45660715e-05, %v7908_v5  ;;  %v7928_v14 = vclamps-f32 %v4221_v57, 4.0  ;;  %v4510_v55 = vadd.f32 -0.00021337405, %v4494_v3  ;;  %v7930_v31 = vclamps-f32 %v4223_v22, 4.0 }
 0x692   : > { %v4318_v52 = vmul.f32 %v4302_v24, %v7899_v15  ;;  %v4300_v56 = vadd.f32 2.7706815e-08, %v4284_v35  ;;  %v4360_v38 = vadd.f32 -5.6925062e-05, %v4344_v61  ;;  %v4363_v43 = vadd.f32 -5.6925062e-05, %v4347_v7 }
 0x693   : > { %v4378_v54 = vmul.f32 %v4362_v49, %v7859_v44  ;;  %v4345_v16 = vmul.f32 %v4329_v34, %v7888_v25  ;;  %v4555_v1 = vmul.f32 %v4539_v12, %v7876_v17  ;;  %v4508_v40 = vadd.f32 -0.00021337405, %v4492_v10  ;;  %v4169_v49 = vpop.f32.mrf.mxu0 }
 0x694   : > { %v4334_v36 = vadd.f32 -2.101024e-06, %v4318_v52  ;;  %v4316_v59 = vmul.f32 %v4300_v56, %v7908_v5  ;;  %v7939_v33 = vmul.f32 %v7928_v14, %v7928_v14  ;;  %v4526_v50 = vmul.f32 %v4510_v55, %v7899_v15 }
 0x695   : > { %v7944_v45 = vmul.f32 %v7930_v31, %v7930_v31  ;;  %v4570_v39 = vadd.f32 -0.0073733293, %v4554_v26  ;;  %v4376_v46 = vmul.f32 %v4360_v38, %v7872_v51  ;;  %v4379_v48 = vmul.f32 %v4363_v43, %v7876_v17 }
 0x696   : > { %v4394_v9 = vadd.f32 -0.00073499064, %v4378_v54  ;;  %v4361_v23 = vadd.f32 -5.6925062e-05, %v4345_v16  ;;  %v4350_v8 = vmul.f32 %v4334_v36, %v7899_v15  ;;  %v4571_v41 = vadd.f32 -0.0073733293, %v4555_v1 }
 0x697   : > { %v4332_v42 = vadd.f32 -2.101024e-06, %v4316_v59  ;;  %v4524_v60 = vmul.f32 %v4508_v40, %v7908_v5  ;;  %v4285_v37 = vmul.f32 -2.7261424e-10, %v7939_v33  ;;  %v4542_v62 = vadd.f32 -0.001682827, %v4526_v50 }
 0x698   : > { %v4287_v4 = vmul.f32 -2.7261424e-10, %v7944_v45  ;;  %v7953_v11 = vadd.f32 %v5445_v27, %v7838_v2  ;;  %v7956_v24 = vmul.f32 0.5, %v7841_v21  ;;  %v4586_v35 = vmul.f32 %v4570_v39, %v7859_v44 }
 0x699   : > { %v4392_v57 = vadd.f32 -0.00073499064, %v4376_v46  ;;  %v4395_v3 = vadd.f32 -0.00073499064, %v4379_v48  ;;  %v4410_v22 = vmul.f32 %v4394_v9, %v7859_v44  ;;  %v7961_v0 = vmul.f32 0.5, %v7845_v28 }
 0x69a   : > { %8409 = vst [vmem:[#allocation8_spill] sm:$0xff] %v7953_v11  ;;  %v4377_v61 = vmul.f32 %v4361_v23, %v7888_v25  ;;  %v4366_v7 = vadd.f32 -5.6925062e-05, %v4350_v8  ;;  %v4587_v12 = vmul.f32 %v4571_v41, %v7876_v17  ;;  %v4348_v34 = vmul.f32 %v4332_v42, %v7908_v5  ;;  %v5446_v8 = vpop.f32.mrf.mxu0 }
 0x69b   : > { %v4540_v52 = vadd.f32 -0.001682827, %v4524_v60  ;;  %v4301_v21 = vadd.f32 2.7706815e-08, %v4285_v37  ;;  %v4558_v56 = vmul.f32 %v4542_v62, %v7899_v15  ;;  %v4303_v10 = vadd.f32 2.7706815e-08, %v4287_v4 }
 0x69c   : > { %v4495_v55 = vmul.f32 -1.45660715e-05, %v7944_v45  ;;  %v4226_v26 = vmul.f32 0.70710677, %v7953_v11  ;;  %v4602_v38 = vadd.f32 -0.014264739, %v4586_v35  ;;  %v4408_v28 = vmul.f32 %v4392_v57, %v7872_v51 }
 0x69d   : > { %v4411_v43 = vmul.f32 %v4395_v3, %v7876_v17  ;;  %v7972_v54 = vadd.f32 %v7838_v2, %v4169_v49  ;;  %v4426_v16 = vadd.f32 -0.0029546, %v4410_v22  ;;  %v7975_v36 = vmul.f32 0.5, %v7848_v47 }
 0x69e   : > { %v4393_v1 = vadd.f32 -0.00073499064, %v4377_v61  ;;  %v4382_v59 = vmul.f32 %v4366_v7, %v7899_v15  ;;  %v4603_v40 = vadd.f32 -0.014264739, %v4587_v12  ;;  %v4364_v50 = vadd.f32 -5.6925062e-05, %v4348_v34 }
 0x69f   : > { %8410 = vst [vmem:[#allocation9_spill] sm:$0xff] %v7972_v54  ;;  %v4556_v39 = vmul.f32 %v4540_v52, %v7908_v5  ;;  %v4317_v46 = vmul.f32 %v4301_v21, %v7939_v33  ;;  %v4574_v48 = vadd.f32 -0.0073733293, %v4558_v56  ;;  %v4319_v27 = vmul.f32 %v4303_v10, %v7944_v45 }
 0x6a0   : > { %v4511_v9 = vadd.f32 -0.00021337405, %v4495_v55  ;;  %v7981_v23 = vclamps-f32 %v4226_v26, 4.0  ;;  %5642 = vrcp.f32 %v4602_v38  ;;  %v4424_v41 = vadd.f32 -0.0029546, %v4408_v28 }
 0x6a1   : > { %v4427_v47 = vadd.f32 -0.0029546, %v4411_v43  ;;  %v4224_v42 = vmul.f32 0.70710677, %v7972_v54  ;;  %v4442_v60 = vmul.f32 %v4426_v16, %v7859_v44  ;;  %v7986_v37 = vmul.f32 0.5, %v7855_v32  ;;  %v4172_v44 = vpop.f32.mrf.mxu0 }
 0x6a2   : > { %8411 = vst [vmem:[#allocation10_spill] sm:$0xff] %v7981_v23  ;;  %v4409_v62 = vmul.f32 %v4393_v1, %v7888_v25  ;;  %v4398_v4 = vadd.f32 -0.00073499064, %v4382_v59  ;;  %5644 = vrcp.f32 %v4603_v40  ;;  %v4380_v35 = vmul.f32 %v4364_v50, %v7908_v5 }
 0x6a3   : > { %v4572_v57 = vadd.f32 -0.0073733293, %v4556_v39  ;;  %v4333_v3 = vadd.f32 -2.101024e-06, %v4317_v46  ;;  %v4335_v22 = vadd.f32 -2.101024e-06, %v4319_v27  ;;  %v4527_v61 = vmul.f32 %v4511_v9, %v7944_v45 }
 0x6a4   : > { %v4493_v7 = vmul.f32 -1.45660715e-05, %v7939_v33  ;;  %v7994_v49 = vmul.f32 %v7981_v23, %v7981_v23  ;;  %v4440_v32 = vmul.f32 %v4424_v41, %v7872_v51  ;;  %v4443_v12 = vmul.f32 %v4427_v47, %v7876_v17 }
 0x6a5   : > { %v4590_v34 = vmul.f32 %v4574_v48, %v7899_v15  ;;  %v7999_v52 = vclamps-f32 %v4224_v42, 4.0  ;;  %v4458_v21 = vadd.f32 -0.016096033, %v4442_v60  ;;  %v4425_v56 = vadd.f32 -0.0029546, %v4409_v62  ;;  %v8023_v62 = vpop.f32.mrf.mxu0 }
 0x6a6   : > { %v4414_v10 = vmul.f32 %v4398_v4, %v7899_v15  ;;  %v8003_v55 = vmul.f32 0.5, %v7882_v6  ;;  %v4396_v26 = vadd.f32 -0.00073499064, %v4380_v35  ;;  %v4588_v38 = vmul.f32 %v4572_v57, %v7908_v5 }
 0x6a7   : > { %v4349_v28 = vmul.f32 %v4333_v3, %v7939_v33  ;;  %v8008_v43 = vadd.f32 %v7838_v2, %v4172_v44  ;;  %v4351_v17 = vmul.f32 %v4335_v22, %v7944_v45  ;;  %v4543_v16 = vadd.f32 -0.001682827, %v4527_v61 }
 0x6a8   : > { %v4509_v1 = vadd.f32 -0.00021337405, %v4493_v7  ;;  %v4290_v59 = vmul.f32 -2.7261424e-10, %v7994_v49  ;;  %v4456_v40 = vadd.f32 -0.016096033, %v4440_v32  ;;  %v8014_v6 = vmul.f32 %v7999_v52, %v7999_v52 }
 0x6a9   : > { %8412 = vst [vmem:[#allocation11_spill] sm:$0xff] %v8008_v43  ;;  %v4459_v50 = vadd.f32 -0.016096033, %v4443_v12  ;;  %v4606_v39 = vadd.f32 -0.014264739, %v4590_v34  ;;  %v4474_v46 = vmul.f32 %v7850_v30, %v4458_v21  ;;  %v4441_v48 = vmul.f32 %v4425_v56, %v7888_v25 }
 0x6aa   : > { %v4430_v27 = vadd.f32 -0.0029546, %v4414_v10  ;;  %v8019_v9 = vadd.f32 %v5446_v8, %v7838_v2  ;;  %v4412_v41 = vmul.f32 %v4396_v26, %v7908_v5  ;;  %v4604_v47 = vadd.f32 -0.014264739, %v4588_v38 }
 0x6ab   : > { %v4365_v42 = vadd.f32 -5.6925062e-05, %v4349_v28  ;;  %v4225_v60 = vmul.f32 0.70710677, %v8008_v43  ;;  %v4367_v4 = vadd.f32 -5.6925062e-05, %v4351_v17  ;;  %v4559_v35 = vmul.f32 %v4543_v16, %v7944_v45 }
 0x6ac   : > { %8413 = vst [vmem:[#allocation12_spill] sm:$0xff] %v8019_v9  ;;  %v4525_v57 = vmul.f32 %v4509_v1, %v7939_v33  ;;  %v4306_v30 = vadd.f32 2.7706815e-08, %v4290_v59  ;;  %v8028_v3 = vmul.f32 %v7861_v19, %v4456_v40  ;;  %v4475_v8 = vmul.f32 %v7863_v20, %v4459_v50  ;;  %v4185_v19 = vpop.f32.mrf.mxu0 }
 0x6ad   : > { %5646 = vrcp.f32 %v4606_v39  ;;  %v4288_v22 = vmul.f32 -2.7261424e-10, %v8014_v6  ;;  %v5643_v61 = vpop.eup %5642  ;;  %v4457_v7 = vadd.f32 -0.016096033, %v4441_v48  ;;  %v4446_v44 = vmul.f32 %v4430_v27, %v7899_v15 }
 0x6ae   : > { %v4498_v32 = vmul.f32 -1.45660715e-05, %v7994_v49  ;;  %v4227_v12 = vmul.f32 0.70710677, %v8019_v9  ;;  %v4428_v34 = vadd.f32 -0.0029546, %v4412_v41  ;;  %5648 = vrcp.f32 %v4604_v47 }
 0x6af   : > { %v4381_v21 = vmul.f32 %v4365_v42, %v7939_v33  ;;  %v8036_v56 = vclamps-f32 %v4225_v60, 4.0  ;;  %v5645_v10 = vpop.eup %5644  ;;  %v4383_v20 = vmul.f32 %v4367_v4, %v7944_v45  ;;  %v4575_v26 = vadd.f32 -0.0073733293, %v4559_v35 }
 0x6b0   : > { %v4541_v38 = vadd.f32 -0.001682827, %v4525_v57  ;;  %v4322_v28 = vmul.f32 %v4306_v30, %v7994_v49  ;;  %v4621_v17 = vmul.f32 %v5643_v61, %v4474_v46  ;;  %v8041_v15 = vmul.f32 0.5, %v7911_v13 }
 0x6b1   : > { %v4304_v16 = vadd.f32 2.7706815e-08, %v4288_v22  ;;  %v4496_v1 = vmul.f32 -1.45660715e-05, %v8014_v6  ;;  %v4462_v59 = vadd.f32 -0.016096033, %v4446_v44  ;;  %v8047_v39 = vadd.f32 %v7838_v2, %v4185_v19  ;;  %v5450_v44 = vpop.f32.mrf.mxu0 }
 0x6b2   : > { %v4514_v40 = vadd.f32 -0.00021337405, %v4498_v32  ;;  %v8044_v50 = vclamps-f32 %v4227_v12, 4.0  ;;  %v4623_v48 = vmul.f32 %v5645_v10, %v4475_v8  ;;  %v4444_v27 = vmul.f32 %v4428_v34, %v7908_v5 }
 0x6b3   : > { %8415 = vst [vmem:[#allocation14_spill] sm:$0xff] %v8047_v39  ;;  %v4397_v41 = vadd.f32 -0.00073499064, %v4381_v21  ;;  %v8052_v46 = vmul.f32 %v8036_v56, %v8036_v56  ;;  %v4399_v13 = vadd.f32 -0.00073499064, %v4383_v20  ;;  %v4591_v47 = vmul.f32 %v4575_v26, %v7944_v45 }
 0x6b4   : > { %8414 = vst [vmem:[#allocation13_spill] sm:$0xff] %v8044_v50  ;;  %v4557_v42 = vmul.f32 %v4541_v38, %v7939_v33  ;;  %v4338_v60 = vadd.f32 -2.101024e-06, %v4322_v28  ;;  %v8056_v4 = vadd.f32 1.0, %v4621_v17  ;;  %v8059_v35 = vmul.f32 %v7878_v58, %v4457_v7 }
 0x6b5   : > { %v4320_v57 = vmul.f32 %v4304_v16, %v8014_v6  ;;  %v4512_v30 = vadd.f32 -0.00021337405, %v4496_v1  ;;  %v8063_v5 = vmul.f32 %v7890_v18, %v4462_v59  ;;  %v4530_v8 = vmul.f32 %v4514_v40, %v7994_v49 }
 0x6b6   : > { %v8068_v22 = vmul.f32 %v8044_v50, %v8044_v50  ;;  %v4228_v61 = vmul.f32 0.70710677, %v8047_v39  ;;  %v8071_v32 = vadd.f32 1.0, %v4623_v48  ;;  %v4460_v12 = vadd.f32 -0.016096033, %v4444_v27 }
 0x6b7   : > { %v4413_v58 = vmul.f32 %v4397_v41, %v7939_v33  ;;  %v4289_v7 = vmul.f32 -2.7261424e-10, %v8052_v46  ;;  %v4415_v34 = vmul.f32 %v4399_v13, %v7944_v45  ;;  %v4607_v18 = vadd.f32 -0.014264739, %v4591_v47  ;;  %v4188_v13 = vpop.f32.mrf.mxu0 }
 0x6b8   : > { %v4573_v21 = vadd.f32 -0.0073733293, %v4557_v42  ;;  %v4354_v19 = vmul.f32 %v4338_v60, %v7994_v49  ;;  %v4336_v10 = vadd.f32 -2.101024e-06, %v4320_v57  ;;  %v4528_v20 = vmul.f32 %v4512_v30, %v8014_v6 }
 0x6b9   : > { %v4497_v26 = vmul.f32 -1.45660715e-05, %v8052_v46  ;;  %v8080_v38 = vadd.f32 %v5450_v44, %v7838_v2  ;;  %v4546_v17 = vadd.f32 -0.001682827, %v4530_v8  ;;  %v4291_v16 = vmul.f32 -2.7261424e-10, %v8068_v22 }
 0x6ba   : > { %v8082_v28 = vpop.eup %5646  ;;  %v8087_v1 = vadd.f32 %v8023_v62, %v7838_v2  ;;  %v8089_v59 = vclamps-f32 %v4228_v61, 4.0  ;;  %v4476_v40 = vmul.f32 %v7901_v53, %v4460_v12  ;;  %v4429_v48 = vadd.f32 -0.0029546, %v4413_v58 }
 0x6bb   : > { %8416 = vst [vmem:[#allocation15_spill] sm:$0xff] %v8080_v38  ;;  %v4499_v27 = vmul.f32 -1.45660715e-05, %v8068_v22  ;;  %v4305_v41 = vadd.f32 2.7706815e-08, %v4289_v7  ;;  %v5649_v47 = vpop.eup %5648  ;;  %5650 = vrcp.f32 %v4607_v18  ;;  %v4589_v60 = vmul.f32 %v4573_v21, %v7939_v33 }
 0x6bc   : > { %8417 = vst [vmem:[#allocation16_spill] sm:$0xff] %v8087_v1  ;;  %8418 = vst [vmem:[#allocation17_spill] sm:$0xff] %v8089_v59  ;;  %v4431_v42 = vadd.f32 -0.0029546, %v4415_v34  ;;  %v4370_v57 = vadd.f32 -5.6925062e-05, %v4354_v19  ;;  %v4352_v30 = vmul.f32 %v4336_v10, %v8014_v6  ;;  %v8099_v12 = vmul.f32 %v8089_v59, %v8089_v59 }
 0x6bd   : > { %v4544_v8 = vadd.f32 -0.001682827, %v4528_v20  ;;  %v4513_v62 = vadd.f32 -0.00021337405, %v4497_v26  ;;  %v4231_v61 = vmul.f32 0.70710677, %v8080_v38  ;;  %v8102_v58 = vadd.f32 %v7838_v2, %v4188_v13 }
 0x6be   : > { %v4307_v44 = vadd.f32 2.7706815e-08, %v4291_v16  ;;  %v4230_v53 = vmul.f32 0.70710677, %v8087_v1  ;;  %v4445_v7 = vmul.f32 %v4429_v48, %v7939_v33  ;;  %v4562_v34 = vmul.f32 %v4546_v17, %v7994_v49 }
 0x6bf   : > { %8419 = vst [vmem:[#allocation18_spill] sm:$0xff] %v8102_v58  ;;  %v4515_v18 = vadd.f32 -0.00021337405, %v4499_v27  ;;  %v4321_v21 = vmul.f32 %v4305_v41, %v8052_v46  ;;  %v4625_v19 = vmul.f32 %v5649_v47, %v4476_v40  ;;  %v8108_v10 = vmul.f32 %v4431_v42, %v7944_v45 }
 0x6c0   : > { %v4605_v20 = vadd.f32 -0.014264739, %v4589_v60  ;;  %v8111_v26 = vmul.f32 %v4370_v57, %v7994_v49  ;;  %v4368_v16 = vadd.f32 -5.6925062e-05, %v4352_v30  ;;  %v4560_v1 = vmul.f32 %v4544_v8, %v8014_v6 }
 0x6c1   : > { %v4529_v2 = vmul.f32 %v4513_v62, %v8052_v46  ;;  %v8115_v13 = vclamps-f32 %v4231_v61, 4.0  ;;  %v4323_v33 = vmul.f32 %v4307_v44, %v8068_v22  ;;  %v8118_v17 = vclamps-f32 %v4230_v53, 4.0 }
 0x6c2   : > { %v4292_v40 = vmul.f32 -2.7261424e-10, %v8099_v12  ;;  %v4229_v45 = vmul.f32 0.70710677, %v8102_v58  ;;  %v8122_v48 = vadd.f32 -0.016096033, %v4445_v7  ;;  %v4531_v41 = vmul.f32 %v4515_v18, %v8068_v22 }
 0x6c3   : > { %8420 = vst [vmem:[#allocation19_spill] sm:$0xff] %v8115_v13  ;;  %8421 = vst [vmem:[#allocation20_spill] sm:$0xff] %v8118_v17  ;;  %v8124_v27 = vadd.f32 -0.0073733293, %v4562_v34  ;;  %v4337_v47 = vadd.f32 -2.101024e-06, %v4321_v21  ;;  %v4384_v8 = vmul.f32 %v4368_v16, %v8014_v6  ;;  %v8136_v44 = vmul.f32 %v8115_v13, %v8115_v13 }
 0x6c4   : > { %v8127_v42 = vadd.f32 1.0, %v4625_v19  ;;  %v4500_v60 = vmul.f32 -1.45660715e-05, %v8099_v12  ;;  %v8130_v57 = vclamps-f32 %v4229_v45, 4.0  ;;  %v4488_v30 = vmul.f32 -1.45660715e-05, %v7872_v51 }
 0x6c5   : > { %v4576_v62 = vadd.f32 -0.0073733293, %v4560_v1  ;;  %v4545_v61 = vadd.f32 -0.001682827, %v4529_v2  ;;  %v4339_v53 = vadd.f32 -2.101024e-06, %v4323_v33  ;;  %v8140_v7 = vmul.f32 %v8118_v17, %v8118_v17 }
 0x6c6   : > { %8422 = vst [vmem:[#allocation21_spill] sm:$0xff] %v8130_v57  ;;  %v4308_v34 = vadd.f32 2.7706815e-08, %v4292_v40  ;;  %v8144_v18 = vmul.f32 %v8130_v57, %v8130_v57  ;;  %5652 = vrcp.f32 %v4605_v20  ;;  %v4547_v21 = vadd.f32 -0.001682827, %v4531_v41 }
 0x6c7   : > { %v4489_v19 = vmul.f32 -1.45660715e-05, %v7888_v25  ;;  %v4504_v1 = vadd.f32 -0.00021337405, %v4488_v30  ;;  %v4353_v16 = vmul.f32 %v4337_v47, %v8052_v46  ;;  %v4516_v2 = vadd.f32 -0.00021337405, %v4500_v60 }
 0x6c8   : > { %v4293_v45 = vmul.f32 -2.7261424e-10, %v8144_v18  ;;  %v4501_v33 = vmul.f32 -1.45660715e-05, %v8144_v18  ;;  %v8150_v38 = vpop.eup %5650  ;;  %v8152_v17 = vadd.f32 -0.00073499064, %v4384_v8  ;;  %v4561_v40 = vmul.f32 %v4545_v61, %v8052_v46 }
 0x6c9   : > { %v4295_v11 = vmul.f32 -2.7261424e-10, %v8136_v44  ;;  %v4520_v20 = vmul.f32 %v4504_v1, %v7872_v51  ;;  %v4294_v41 = vmul.f32 -2.7261424e-10, %v8140_v7  ;;  %v4324_v30 = vmul.f32 %v4308_v34, %v8099_v12 }
 0x6ca   : > { %v4309_v47 = vadd.f32 2.7706815e-08, %v4293_v45  ;;  %v4517_v60 = vadd.f32 -0.00021337405, %v4501_v33  ;;  %v4592_v39 = vmul.f32 %v4576_v62, %v8014_v6  ;;  %v4502_v13 = vmul.f32 -1.45660715e-05, %v8140_v7 }
 0x6cb   : > { %v4503_v9 = vmul.f32 -1.45660715e-05, %v8136_v44  ;;  %v4505_v8 = vadd.f32 -0.00021337405, %v4489_v19  ;;  %v4369_v58 = vadd.f32 -5.6925062e-05, %v4353_v16  ;;  %v4532_v61 = vmul.f32 %v4516_v2, %v8099_v12 }
 0x6cc   : > { %v4325_v23 = vmul.f32 %v4309_v47, %v8144_v18  ;;  %v4533_v1 = vmul.f32 %v4517_v60, %v8144_v18  ;;  %v4577_v59 = vadd.f32 -0.0073733293, %v4561_v40  ;;  %v4311_v54 = vadd.f32 2.7706815e-08, %v4295_v11 }
 0x6cd   : > { %v4521_v34 = vmul.f32 %v4505_v8, %v7888_v25  ;;  %v4536_v45 = vadd.f32 -0.001682827, %v4520_v20  ;;  %v4355_v33 = vmul.f32 %v4339_v53, %v8068_v22  ;;  %v4340_v62 = vadd.f32 -2.101024e-06, %v4324_v30 }
 0x6ce   : > { %v4341_v50 = vadd.f32 -2.101024e-06, %v4325_v23  ;;  %v4549_v29 = vadd.f32 -0.001682827, %v4533_v1  ;;  %v4310_v57 = vadd.f32 2.7706815e-08, %v4294_v41  ;;  %v4385_v2 = vmul.f32 %v4369_v58, %v8052_v46 }
 0x6cf   : > { %v4519_v43 = vadd.f32 -0.00021337405, %v4503_v9  ;;  %v4537_v19 = vadd.f32 -0.001682827, %v4521_v34  ;;  %v4552_v16 = vmul.f32 %v4536_v45, %v7872_v51  ;;  %v4518_v47 = vadd.f32 -0.00021337405, %v4502_v13 }
 0x6d0   : > { %v4548_v63 = vadd.f32 -0.001682827, %v4532_v61  ;;  %v4357_v40 = vmul.f32 %v4341_v50, %v8144_v18  ;;  %v4593_v11 = vmul.f32 %v4577_v59, %v8052_v46  ;;  %v4327_v20 = vmul.f32 %v4311_v54, %v8136_v44 }
 0x6d1   : > { %v4553_v53 = vmul.f32 %v4537_v19, %v7888_v25  ;;  %v4568_v30 = vadd.f32 -0.0073733293, %v4552_v16  ;;  %v4371_v23 = vadd.f32 -5.6925062e-05, %v4355_v33  ;;  %v4563_v41 = vmul.f32 %v4547_v21, %v8068_v22 }
 0x6d2   : > { %v4356_v9 = vmul.f32 %v4340_v62, %v8099_v12  ;;  %v4565_v60 = vmul.f32 %v4549_v29, %v8144_v18  ;;  %v4326_v58 = vmul.f32 %v4310_v57, %v8140_v7  ;;  %v4535_v13 = vmul.f32 %v4519_v43, %v8136_v44 }
 0x6d3   : > { %v4569_v8 = vadd.f32 -0.0073733293, %v4553_v53  ;;  %v4584_v50 = vmul.f32 %v4568_v30, %v7872_v51  ;;  %v5653_v59 = vpop.eup %5652  ;;  %v4401_v61 = vadd.f32 -0.00073499064, %v4385_v2  ;;  %v4534_v54 = vmul.f32 %v4518_v47, %v8140_v7 }
 0x6d4   : > { %v4564_v1 = vmul.f32 %v4548_v63, %v8099_v12  ;;  %v4373_v34 = vadd.f32 -5.6925062e-05, %v4357_v40  ;;  %v4609_v45 = vadd.f32 -0.014264739, %v4593_v11  ;;  %v4343_v21 = vadd.f32 -2.101024e-06, %v4327_v20 }
 0x6d5   : > { %v4585_v33 = vmul.f32 %v4569_v8, %v7888_v25  ;;  %v4600_v62 = vadd.f32 -0.014264739, %v4584_v50  ;;  %v4594_v29 = vmul.f32 %v8124_v27, %v7994_v49  ;;  %v4579_v57 = vadd.f32 -0.0073733293, %v4563_v41 }
 0x6d6   : > { %v4372_v43 = vadd.f32 -5.6925062e-05, %v4356_v9  ;;  %v4581_v19 = vadd.f32 -0.0073733293, %v4565_v60  ;;  %v4342_v16 = vadd.f32 -2.101024e-06, %v4326_v58  ;;  %v4417_v47 = vmul.f32 %v4401_v61, %v8052_v46 }
 0x6d7   : > { %v4551_v51 = vadd.f32 -0.001682827, %v4535_v13  ;;  %v4601_v53 = vadd.f32 -0.014264739, %v4585_v33  ;;  %5654 = vrcp.f32 %v4600_v62  ;;  %v4608_v2 = vadd.f32 -0.014264739, %v4592_v39 }
 0x6d8   : > { %v4580_v63 = vadd.f32 -0.0073733293, %v4564_v1  ;;  %v4389_v40 = vmul.f32 %v4373_v34, %v8144_v18  ;;  %v4387_v11 = vmul.f32 %v4371_v23, %v8068_v22  ;;  %5656 = vrcp.f32 %v4609_v45 }
 0x6d9   : > { %v4550_v25 = vadd.f32 -0.001682827, %v4534_v54  ;;  %v4359_v20 = vmul.f32 %v4343_v21, %v8136_v44  ;;  %v4416_v27 = vmul.f32 %v8152_v17, %v8014_v6  ;;  %v4388_v30 = vmul.f32 %v4372_v43, %v8099_v12 }
 0x6da   : > { %v4597_v41 = vmul.f32 %v4581_v19, %v8144_v18  ;;  %5658 = vrcp.f32 %v4601_v53  ;;  %v4402_v39 = vadd.f32 -0.00073499064, %v8111_v26  ;;  %v4595_v9 = vmul.f32 %v4579_v57, %v8068_v22 }
 0x6db   : > { %v4358_v60 = vmul.f32 %v4342_v16, %v8140_v7  ;;  %v4567_v23 = vmul.f32 %v4551_v51, %v8136_v44  ;;  %5660 = vrcp.f32 %v4608_v2  ;;  %v4433_v58 = vadd.f32 -0.0029546, %v4417_v47 }
 0x6dc   : > { %v4596_v13 = vmul.f32 %v4580_v63, %v8099_v12  ;;  %v4405_v8 = vadd.f32 -0.00073499064, %v4389_v40  ;;  %v4610_v50 = vadd.f32 -0.014264739, %v4594_v29  ;;  %v4403_v17 = vadd.f32 -0.00073499064, %v4387_v11 }
 0x6dd   : > { %v4566_v61 = vmul.f32 %v4550_v25, %v8140_v7  ;;  %v4375_v54 = vadd.f32 -5.6925062e-05, %v4359_v20  ;;  %v4477_v1 = vmul.f32 %v7928_v14, %v8122_v48  ;;  %v4432_v26 = vadd.f32 -0.0029546, %v4416_v27 }
 0x6de   : > { %v4404_v34 = vadd.f32 -0.00073499064, %v4388_v30  ;;  %v4613_v45 = vadd.f32 -0.014264739, %v4597_v41  ;;  %v8202_v21 = vmul.f32 %v8056_v4, %v7956_v24  ;;  %v4611_v33 = vadd.f32 -0.014264739, %v4595_v9 }
 0x6df   : > { %v4374_v62 = vadd.f32 -5.6925062e-05, %v4358_v60  ;;  %v4583_v57 = vadd.f32 -0.0073733293, %v4567_v23  ;;  %v4627_v43 = vmul.f32 %v5653_v59, %v4477_v1  ;;  %v4449_v29 = vmul.f32 %v4433_v58, %v8052_v46 }
 0x6e0   : > { %v4612_v19 = vadd.f32 -0.014264739, %v4596_v13  ;;  %v4421_v16 = vmul.f32 %v4405_v8, %v8144_v18  ;;  %5662 = vrcp.f32 %v4610_v50  ;;  %v4419_v51 = vmul.f32 %v4403_v17, %v8068_v22 }
 0x6e1   : > { %v4582_v14 = vadd.f32 -0.0073733293, %v4566_v61  ;;  %v4391_v48 = vmul.f32 %v4375_v54, %v8136_v44  ;;  %v4463_v53 = vadd.f32 -0.016096033, %v8108_v10  ;;  %v4448_v24 = vmul.f32 %v4432_v26, %v8014_v6 }
 0x6e2   : > { %v4420_v4 = vmul.f32 %v4404_v34, %v8099_v12  ;;  %5664 = vrcp.f32 %v4613_v45  ;;  %v4418_v59 = vmul.f32 %v4402_v39, %v7994_v49  ;;  %v4390_v46 = vmul.f32 %v4374_v62, %v8140_v7 }
 0x6e3   : > { %5666 = vrcp.f32 %v4611_v33  ;;  %v4599_v2 = vmul.f32 %v4583_v57, %v8136_v44  ;;  %v4653_v63 = vadd.f32 1.0, %v4627_v43  ;;  %v4465_v40 = vadd.f32 -0.016096033, %v4449_v29 }
 0x6e4   : > { %v5655_v47 = vpop.eup %5654  ;;  %5668 = vrcp.f32 %v4612_v19  ;;  %v4437_v11 = vadd.f32 -0.0029546, %v4421_v16  ;;  %v4435_v25 = vadd.f32 -0.0029546, %v4419_v51  ;;  %v4598_v10 = vmul.f32 %v4582_v14, %v8140_v7 }
 0x6e5   : > { %v4407_v20 = vadd.f32 -0.00073499064, %v4391_v48  ;;  %v4617_v6 = vmul.f32 %v5655_v47, %v8028_v3  ;;  %v5657_v27 = vpop.eup %5656  ;;  %v4667_v30 = vmul.f32 %v8071_v32, %v7975_v36  ;;  %v4668_v41 = vmul.f32 %v8127_v42, %v8003_v55  ;;  %v8426_v47 = vld [vmem:[#allocation7_spill] sm:$0xff] }
 0x6e6   : > { %v4464_v39 = vadd.f32 -0.016096033, %v4448_v24  ;;  %v4436_v9 = vadd.f32 -0.0029546, %v4420_v4  ;;  %v4479_v23 = vmul.f32 %v7930_v31, %v4463_v53  ;;  %v4434_v58 = vadd.f32 -0.0029546, %v4418_v59 }
 0x6e7   : > { %v5659_v60 = vpop.eup %5658  ;;  %v4406_v13 = vadd.f32 -0.00073499064, %v4390_v46  ;;  %v4615_v8 = vadd.f32 -0.014264739, %v4599_v2  ;;  %v4481_v50 = vmul.f32 %v8036_v56, %v4465_v40  ;;  %v4453_v17 = vmul.f32 %v4437_v11, %v8144_v18  ;;  %v8423_v53 = vld [vmem:[#allocation6_spill] sm:$0xff]  ;;  %v8424_v4 = vld [vmem:[#allocation11_spill] sm:$0xff] }
 0x6e8   : > { %v4619_v3 = vmul.f32 %v5659_v60, %v8059_v35  ;;  %v4648_v61 = vadd.f32 1.0, %v4617_v6  ;;  %v5661_v54 = vpop.eup %5660  ;;  %v4669_v36 = vmul.f32 %v4653_v63, %v8041_v15  ;;  %v4451_v55 = vmul.f32 %v4435_v25, %v8068_v22  ;;  %v8427_v40 = vld [vmem:[#allocation13_spill] sm:$0xff] }
 0x6e9   : > { %v4614_v32 = vadd.f32 -0.014264739, %v4598_v10  ;;  %v4423_v42 = vmul.f32 %v4407_v20, %v8136_v44  ;;  %v4480_v31 = vmul.f32 %v7999_v52, %v4464_v39  ;;  %v4635_v1 = vmul.f32 %v5657_v27, %v4481_v50  ;;  %v8429_v6 = vld [vmem:[#allocation17_spill] sm:$0xff]  ;;  %v8430_v39 = vld [vmem:[#allocation10_spill] sm:$0xff] }
 0x6ea   : > { %v4452_v26 = vmul.f32 %v4436_v9, %v8099_v12  ;;  %v4649_v34 = vadd.f32 1.0, %v4619_v3  ;;  %v4631_v56 = vmul.f32 %v8150_v38, %v4479_v23  ;;  %v4450_v18 = vmul.f32 %v4434_v58, %v7994_v49 }
 0x6eb   : > { %v4422_v35 = vmul.f32 %v4406_v13, %v8140_v7  ;;  %5670 = vrcp.f32 %v4615_v8  ;;  %v4633_v45 = vmul.f32 %v5661_v54, %v4480_v31  ;;  %v4469_v15 = vadd.f32 -0.016096033, %v4453_v17 }
 0x6ec   : > { %v4664_v22 = vmul.f32 %v4648_v61, %v7961_v0  ;;  %v4665_v33 = vmul.f32 %v4649_v34, %v7986_v37  ;;  %v4629_v52 = vmul.f32 %v8082_v28, %v8063_v5  ;;  %v4467_v62 = vadd.f32 -0.016096033, %v4451_v55  ;;  %v8425_v28 = vld [vmem:[#allocation21_spill] sm:$0xff] }
 0x6ed   : > { %5672 = vrcp.f32 %v4614_v32  ;;  %v4439_v12 = vadd.f32 -0.0029546, %v4423_v42  ;;  %v5663_v57 = vpop.eup %5662  ;;  %v4657_v43 = vadd.f32 1.0, %v4635_v1  ;;  %v4468_v38 = vadd.f32 -0.016096033, %v4452_v26  ;;  %v8431_v42 = vld [vmem:[#allocation18_spill] sm:$0xff] }
 0x6ee   : > { %v4680_v29 = vpack.c.bf16 %v4665_v33, %v4664_v22  ;;  %v4682_v49 = vpack.c.bf16 %v4669_v36, %v4668_v41  ;;  %v4655_v16 = vadd.f32 1.0, %v4631_v56  ;;  %v4466_v51 = vadd.f32 -0.016096033, %v4450_v18  ;;  %v8432_v26 = vld [vmem:[#allocation12_spill] sm:$0xff]  ;;  %v8433_v56 = vld [vmem:[#allocation19_spill] sm:$0xff] }
 0x6ef   : > { %v5665_v19 = vpop.eup %5664  ;;  %v4438_v14 = vadd.f32 -0.0029546, %v4422_v35  ;;  %v4681_v48 = vpack.c.bf16 %v4667_v30, %v8202_v21  ;;  %v4206_v37 = vmul.f32 0.5, %v8423_v53  ;;  %v4656_v24 = vadd.f32 1.0, %v4633_v45  ;;  %v8428_v21 = vld [vmem:[#allocation9_spill] sm:$0xff]  ;;  %v8434_v35 = vld [vmem:[#allocation14_spill] sm:$0xff] }
 0x6f0   : > { %v5667_v0 = vpop.eup %5666  ;;  %v4209_v5 = vmul.f32 0.5, %v8424_v4  ;;  %v4485_v59 = vmul.f32 %v8425_v28, %v4469_v15  ;;  %5455 = vmatprep.mubr.msk.bf16.mxu1 %vm769_vm2, %v4680_v29  ;;  %v4654_v2 = vadd.f32 1.0, %v4629_v52  ;;  %v4207_v63 = vmul.f32 0.5, %v8426_v47  ;;  %v8435_v22 = vld [vmem:[#allocation8_spill] sm:$0xff] }
 0x6f1   : > { %v5669_v46 = vpop.eup %5668  ;;  %v4483_v11 = vmul.f32 %v8427_v40, %v4467_v62  ;;  %v4455_v25 = vmul.f32 %v4439_v12, %v8136_v44  ;;  %5456 = vmatmul.mubr.msk.bf16.vlgmr.msra.gmra.mxu1 %vm769_vm2, %v4681_v48  ;;  %v4208_v10 = vmul.f32 0.5, %v8428_v21  ;;  %v4484_v27 = vmul.f32 %v8429_v6, %v4468_v38  ;;  %v8436_v62 = vld [vmem:[#allocation20_spill] sm:$0xff]  ;;  %v4858_v6 = vld [vmem:[%s5959_s14 + $0x18] sm:$0xff] }
 0x6f2   : > { %v4673_v20 = vmul.f32 %v4657_v43, %v4209_v5  ;;  %v4643_v30 = vmul.f32 %v5665_v19, %v4485_v59  ;;  %5459 = vmatprep.mubr.msk.bf16.mxu1 %vm769_vm2, %v4682_v49  ;;  %v4671_v41 = vmul.f32 %v4655_v16, %v4207_v63  ;;  %v4482_v9 = vmul.f32 %v8430_v39, %v4466_v51  ;;  %v8266_v5 = vld [vmem:[%s8378_s10] ss:$0 sm:$0xff] }
 0x6f3   : > { %v4639_v60 = vmul.f32 %v5667_v0, %v4483_v11  ;;  %v4454_v23 = vmul.f32 %v4438_v14, %v8140_v7  ;;  %v4672_v58 = vmul.f32 %v4656_v24, %v4208_v10  ;;  %v4641_v13 = vmul.f32 %v5669_v46, %v4484_v27  ;;  %v8437_v14 = vld [vmem:[#allocation15_spill] sm:$0xff]  ;;  %v8438_v0 = vld [vmem:[#allocation16_spill] sm:$0xff] }
 0x6f4   : > { %v4670_v8 = vmul.f32 %v4654_v2, %v4206_v37  ;;  %v4637_v44 = vmul.f32 %v5663_v57, %v4482_v9  ;;  %v4471_v50 = vadd.f32 -0.016096033, %v4455_v25  ;;  %v4661_v17 = vadd.f32 1.0, %v4643_v30  ;;  %v8271_v59 = vld [vmem:[%s8379_s11] ss:$0 sm:$0xff]  ;;  %v4857_v2 = vld [vmem:[%s5959_s14 + $0x10] sm:$0xff] }
 0x6f5   : > { %v4684_v3 = vpack.c.bf16 %v4673_v20, %v4672_v58  ;;  %v4659_v61 = vadd.f32 1.0, %v4639_v60  ;;  %v4470_v54 = vadd.f32 -0.016096033, %v4454_v23  ;;  %v4660_v32 = vadd.f32 1.0, %v4641_v13  ;;  %v4855_v11 = vld [vmem:[%s5959_s14] sm:$0xff]  ;;  %v4856_v9 = vld [vmem:[%s5959_s14 + $0x8] sm:$0xff] }
 0x6f6   : > { %v4683_v36 = vpack.c.bf16 %v4671_v41, %v4670_v8  ;;  %v4213_v31 = vmul.f32 0.5, %v8431_v42  ;;  %v4658_v1 = vadd.f32 1.0, %v4637_v44  ;;  %v4211_v34 = vmul.f32 0.5, %v8432_v26  ;;  %v4861_v8 = vld [vmem:[%s5959_s14 + $0x30] sm:$0xff]  ;;  %v4862_v42 = vld [vmem:[%s5959_s14 + $0x38] sm:$0xff] }
 0x6f7   : > { %v4487_v18 = vmul.f32 %v8433_v56, %v4471_v50  ;;  %v4212_v45 = vmul.f32 0.5, %v8434_v35  ;;  %v4210_v33 = vmul.f32 0.5, %v8435_v22  ;;  %v4486_v12 = vmul.f32 %v8436_v62, %v4470_v54  ;;  %v4860_v56 = vld [vmem:[%s5959_s14 + $0x28] sm:$0xff] }
 0x6f8   : > { %v5671_v55 = vpop.eup %5670  ;;  %v4677_v15 = vmul.f32 %v4661_v17, %v4213_v31  ;;  %v4675_v52 = vmul.f32 %v4659_v61, %v4211_v34  ;;  %v4215_v48 = vmul.f32 0.5, %v8437_v14  ;;  %v4214_v53 = vmul.f32 0.5, %v8438_v0  ;;  %v4859_v61 = vld [vmem:[%s5959_s14 + $0x20] sm:$0xff] }
 0x6f9   : > { %5460 = vmatmul.mubr.msk.bf16.gmra.mxu1 %vm769_vm2, %v4683_v36  ;;  %v4647_v57 = vmul.f32 %v5671_v55, %v4487_v18  ;;  %v4676_v43 = vmul.f32 %v4660_v32, %v4212_v45  ;;  %v4674_v38 = vmul.f32 %v4658_v1, %v4210_v33 }
 0x6fa   : > { %v5673_v7 = vpop.eup %5672  ;;  %5463 = vmatprep.mubr.msk.bf16.mxu1 %vm769_vm2, %v4684_v3 }
 0x6fb   : > { %v4645_v29 = vmul.f32 %v5673_v7, %v4486_v12  ;;  %v4686_v49 = vpack.c.bf16 %v4677_v15, %v4676_v43  ;;  %v4663_v19 = vadd.f32 1.0, %v4647_v57  ;;  %v4685_v16 = vpack.c.bf16 %v4675_v52, %v4674_v38  ;;  %v4865_v15 = vld [vmem:[%s5959_s14 + $0x50] sm:$0xff]  ;;  %v4863_v12 = vld [vmem:[%s5959_s14 + $0x40] sm:$0xff] }
 0x6fd   : > { %v4662_v51 = vadd.f32 1.0, %v4645_v29  ;;  %v4679_v37 = vmul.f32 %v4663_v19, %v4215_v48  ;;  %v4864_v48 = vld [vmem:[%s5959_s14 + $0x48] sm:$0xff] }
 0x6ff   : > { %v4678_v24 = vmul.f32 %v4662_v51, %v4214_v53 }
 0x701   : > { %5464 = vmatmul.mubr.msk.bf16.gmra.mxu1 %vm769_vm2, %v4685_v16  ;;  %v4687_v4 = vpack.c.bf16 %v4679_v37, %v4678_v24 }
 0x702   : > { %5467 = vmatprep.mubr.msk.bf16.mxu1 %vm769_vm2, %v4686_v49  ;;  %v4866_v49 = vld [vmem:[%s5959_s14 + $0x58] sm:$0xff] }
 0x709   : > { %5468 = vmatmul.mubr.msk.bf16.gmra.mxu1 %vm769_vm2, %v4687_v4  ;;  %v4869_v4 = vld [vmem:[%s5959_s14 + $0x70] sm:$0xff] }
 0x7b1   : > { %v5457_v28 = vpop.f32.mrf.mxu1 }
 0x7b2   : > { %v4778_v46 = vadd.f32 %v5457_v28, %v8266_v5 }
 0x7b3   : > { %v4769_v47 = vpop.f32.mrf.mxu1 }
 0x7b4   : > { %v4841_v63 = vmul.f32 %v8271_v59, %v4778_v46  ;;  %v4770_v40 = vadd.f32 %v8266_v5, %v4769_v47 }
 0x7b5   : > { %v5458_v25 = vpop.f32.mrf.mxu1 }
 0x7b6   : > { %v4873_v21 = vadd.f32 %v4857_v2, %v4841_v63  ;;  %v4839_v10 = vmul.f32 %v8271_v59, %v4770_v40  ;;  %v4781_v20 = vadd.f32 %v5458_v25, %v8266_v5  ;;  %v4867_v63 = vld [vmem:[%s5959_s14 + $0x60] sm:$0xff] }
 0x7b7   : > { %v4772_v27 = vpop.f32.mrf.mxu1 }
 0x7b8   : > { %4889 = vst.msk [vmem:[%s5964_s17 + $0x10] sm:$0xff] %vm1967_vm11, %v4873_v21  ;;  %v4871_v30 = vadd.f32 %v4855_v11, %v4839_v10  ;;  %v4842_v41 = vmul.f32 %v8271_v59, %v4781_v20  ;;  %v4773_v39 = vadd.f32 %v8266_v5, %v4772_v27  ;;  %v4870_v10 = vld [vmem:[%s5959_s14 + $0x78] sm:$0xff] }
 0x7b9   : > { %v5461_v60 = vpop.f32.mrf.mxu1 }
 0x7ba   : > { %4887 = vst.msk [vmem:[%s5964_s17] sm:$0xff] %vm1967_vm11, %v4871_v30  ;;  %v4874_v23 = vadd.f32 %v4858_v6, %v4842_v41  ;;  %v4840_v58 = vmul.f32 %v8271_v59, %v4773_v39  ;;  %v4794_v13 = vadd.f32 %v5461_v60, %v8266_v5  ;;  %v4868_v41 = vld [vmem:[%s5959_s14 + $0x68] sm:$0xff] }
 0x7bb   : > { %v4785_v44 = vpop.f32.mrf.mxu1 }
 0x7bc   : > { %4890 = vst.msk [vmem:[%s5964_s17 + $0x18] sm:$0xff] %vm1967_vm11, %v4874_v23  ;;  %v4872_v50 = vadd.f32 %v4856_v9, %v4840_v58  ;;  %v4845_v17 = vmul.f32 %v8271_v59, %v4794_v13  ;;  %v4786_v3 = vadd.f32 %v8266_v5, %v4785_v44 }
 0x7bd   : > { %v5462_v54 = vpop.f32.mrf.mxu1 }
 0x7be   : > { %4888 = vst.msk [vmem:[%s5964_s17 + $0x8] sm:$0xff] %vm1967_vm11, %v4872_v50  ;;  %v4877_v36 = vadd.f32 %v4861_v8, %v4845_v17  ;;  %v4843_v55 = vmul.f32 %v8271_v59, %v4786_v3  ;;  %v4797_v32 = vadd.f32 %v5462_v54, %v8266_v5 }
 0x7bf   : > { %v4788_v31 = vpop.f32.mrf.mxu1 }
 0x7c0   : > { %4893 = vst.msk [vmem:[%s5964_s17 + $0x30] sm:$0xff] %vm1967_vm11, %v4877_v36  ;;  %v4875_v1 = vadd.f32 %v4859_v61, %v4843_v55  ;;  %v4846_v26 = vmul.f32 %v8271_v59, %v4797_v32  ;;  %v4789_v34 = vadd.f32 %v8266_v5, %v4788_v31 }
 0x7c1   : > { %v5465_v18 = vpop.f32.mrf.mxu1 }
 0x7c2   : > { %4891 = vst.msk [vmem:[%s5964_s17 + $0x20] sm:$0xff] %vm1967_vm11, %v4875_v1  ;;  %v4878_v7 = vadd.f32 %v4862_v42, %v4846_v26  ;;  %v4844_v35 = vmul.f32 %v8271_v59, %v4789_v34  ;;  %v4810_v45 = vadd.f32 %v5465_v18, %v8266_v5 }
 0x7c3   : > { %v4801_v22 = vpop.f32.mrf.mxu1 }
 0x7c4   : > { %4894 = vst.msk [vmem:[%s5964_s17 + $0x38] sm:$0xff] %vm1967_vm11, %v4878_v7  ;;  %v4876_v33 = vadd.f32 %v4860_v56, %v4844_v35  ;;  %v4849_v52 = vmul.f32 %v8271_v59, %v4810_v45  ;;  %v4802_v62 = vadd.f32 %v8266_v5, %v4801_v22 }
 0x7c5   : > { %v5466_v57 = vpop.f32.mrf.mxu1 }
 0x7c6   : > { %4892 = vst.msk [vmem:[%s5964_s17 + $0x28] sm:$0xff] %vm1967_vm11, %v4876_v33  ;;  %v4881_v43 = vadd.f32 %v4865_v15, %v4849_v52  ;;  %v4847_v38 = vmul.f32 %v8271_v59, %v4802_v62  ;;  %v4813_v29 = vadd.f32 %v5466_v57, %v8266_v5 }
 0x7c7   : > { %v4804_v19 = vpop.f32.mrf.mxu1 }
 0x7c8   : > { %4897 = vst.msk [vmem:[%s5964_s17 + $0x50] sm:$0xff] %vm1967_vm11, %v4881_v43  ;;  %v4879_v16 = vadd.f32 %v4863_v12, %v4847_v38  ;;  %v4850_v51 = vmul.f32 %v8271_v59, %v4813_v29  ;;  %v4805_v14 = vadd.f32 %v8266_v5, %v4804_v19 }
 0x7c9   : > { %v5469_v0 = vpop.f32.mrf.mxu1 }
 0x7ca   : > { %4895 = vst.msk [vmem:[%s5964_s17 + $0x40] sm:$0xff] %vm1967_vm11, %v4879_v16  ;;  %v4882_v53 = vadd.f32 %v4866_v49, %v4850_v51  ;;  %v4848_v37 = vmul.f32 %v8271_v59, %v4805_v14  ;;  %v4826_v24 = vadd.f32 %v5469_v0, %v8266_v5 }
 0x7cb   : > { %v4817_v28 = vpop.f32.mrf.mxu1 }
 0x7cc   : > { %4898 = vst.msk [vmem:[%s5964_s17 + $0x58] sm:$0xff] %vm1967_vm11, %v4882_v53  ;;  %v4880_v46 = vadd.f32 %v4864_v48, %v4848_v37  ;;  %v4853_v2 = vmul.f32 %v8271_v59, %v4826_v24  ;;  %v4818_v47 = vadd.f32 %v8266_v5, %v4817_v28 }
 0x7cd   : > { %v5470_v40 = vpop.f32.mrf.mxu1 }
 0x7ce   : > { %4896 = vst.msk [vmem:[%s5964_s17 + $0x48] sm:$0xff] %vm1967_vm11, %v4880_v46  ;;  %v4885_v11 = vadd.f32 %v4869_v4, %v4853_v2  ;;  %v4851_v25 = vmul.f32 %v8271_v59, %v4818_v47  ;;  %v4829_v21 = vadd.f32 %v5470_v40, %v8266_v5 }
 0x7cf   : > { %v4820_v20 = vpop.f32.mrf.mxu1 }
 0x7d0   : > { %4901 = vst.msk [vmem:[%s5964_s17 + $0x70] sm:$0xff] %vm1967_vm11, %v4885_v11  ;;  %v4883_v6 = vadd.f32 %v4867_v63, %v4851_v25  ;;  %v4854_v27 = vmul.f32 %v8271_v59, %v4829_v21  ;;  %v4821_v30 = vadd.f32 %v8266_v5, %v4820_v20 }
 0x7d2   : > { %4899 = vst.msk [vmem:[%s5964_s17 + $0x60] sm:$0xff] %vm1967_vm11, %v4883_v6  ;;  %v4886_v39 = vadd.f32 %v4870_v10, %v4854_v27  ;;  %v4852_v9 = vmul.f32 %v8271_v59, %v4821_v30 }
 0x7d4   : > { %4902 = vst.msk [vmem:[%s5964_s17 + $0x78] sm:$0xff] %vm1967_vm11, %v4886_v39  ;;  %v4884_v60 = vadd.f32 %v4868_v41, %v4852_v9 }
 0x7d6   : > { %4900 = vst.msk [vmem:[%s5964_s17 + $0x68] sm:$0xff] %vm1967_vm11, %v4884_v60 }
 0x7d7 PF: > { %s22_s25 = sadd.s32 1, %s5720_s25   ;;  %s8439_s21 = smov %s5712_s23 }
 0x7d8   : > { %p19_p11 = scmp.ge.s32.totalorder %s22_s25, 6   ;;  %s8440_s22 = smov %s5716_s24 }
 0x7d9   : > { %s8441_s23 = smov %s8444_s26  ;;  %s8442_s24 = smov %s8448_s27 }
 0x7da   :  { %21 = sbr.rel (!%p19_p11) target bundleno = 3 (0x3), region = 151 }

</bundles_post_ra>
